<compile_context>
chip_gen: v6e
topology: v6e:2x2x1
jax: 0.10.0
libtpu: 0.0.40
codegen_flags: <defaults>
</compile_context>

<pallas_src>
import functools

import jax
import jax.numpy as jnp
from jax.experimental import pallas as pl
from jax.experimental.pallas import tpu as pltpu


def _round_up(x, m):
    return (x + m - 1) // m * m


def _vmem_capacity_bytes():
    """Per-generation VMEM capacity, with a conservative (v7x) fallback."""
    try:
        info = pltpu.get_tpu_info()
        cap = int(getattr(info, "vmem_capacity_bytes"))
        if cap > 0:
            return cap
    except Exception:
        pass
    return 64 * 1024 * 1024


def _make_tds_kernel(*, rpt, tt, ct, kw, width, channels, eps, out_dtype, has_halo):
    """Build the fused conv+ReLU+residual+LayerNorm kernel for one row tile.

    Row layout: r = t_local*rpt + n*width + w, lanes = channels.
    """
    C = channels
    F = channels * width
    rm = tt * rpt                   # main rows per tile
    halo = (kw - 1) * rpt           # halo rows per tile (0 if kw == 1)
    cr = ct * rpt                   # rows per inner chunk
    n_chunks = tt // ct
    inv_f = 1.0 / float(F)

    def kernel(*refs):
        if has_halo:
            x_ref, halo_ref, w_ref, b_ref, g_ref, bt_ref, o_ref, xw_ref = refs
        else:
            x_ref, w_ref, b_ref, g_ref, bt_ref, o_ref, xw_ref = refs
            halo_ref = None

        # Stage the halo-extended window once per tile in f32 (residual precision).
        xw_ref[0:rm, :] = x_ref[...].astype(jnp.float32)
        if has_halo:
            xw_ref[rm:rm + halo, :] = halo_ref[...].astype(jnp.float32)

        w = w_ref[...]              # (kw*C, C) bf16, VMEM-resident across tiles
        b = b_ref[...]              # (1, C)     f32
        g = g_ref[...]              # (width, C) f32  (LN gamma, channels-minor)
        bt = bt_ref[...]            # (width, C) f32  (LN beta,  channels-minor)

        for c in range(n_chunks):   # static unroll over inner chunks
            base = c * cr
            # im2col: pack the kw taps along the contraction dim (K = kw*C).
            taps = [xw_ref[base + k * rpt: base + k * rpt + cr, :] for k in range(kw)]
            a = (taps[0] if kw == 1
                 else jnp.concatenate(taps, axis=-1)).astype(jnp.bfloat16)   # (cr, kw*C)
            conv = jnp.dot(a, w, preferred_element_type=jnp.float32) + b     # (cr, C)
            # ReLU + residual (residual rows == last-tap rows, kept in f32).
            y = jnp.maximum(conv, 0.0) + xw_ref[halo + base: halo + base + cr, :]
            # LayerNorm over the (width, channels) feature group of each (t, n) row-group.
            y3 = y.reshape(cr // width, width, C)
            mean = jnp.sum(jnp.sum(y3, axis=2, keepdims=True),
                           axis=1, keepdims=True) * inv_f
            d = y3 - mean
            var = jnp.sum(jnp.sum(d * d, axis=2, keepdims=True),
                          axis=1, keepdims=True) * inv_f
            out3 = d * jax.lax.rsqrt(var + eps) * g + bt
            o_ref[base: base + cr, :] = out3.reshape(cr, C).astype(out_dtype)

    return kernel


@functools.partial(jax.jit, static_argnames=(
    "channels", "width", "kernel_width", "eps", "n_pad", "tt", "ct",
    "num_tiles", "vmem_limit"))
def _tds_impl(inputs, conv_w, conv_b, ln_w, ln_b, *, channels, width,
              kernel_width, eps, n_pad, tt, ct, num_tiles, vmem_limit):
    T_in, N, F = inputs.shape
    C = channels
    kw = kernel_width
    T_out = T_in - kw + 1
    rpt = n_pad * width                 # rows per time step
    rm = tt * rpt
    halo = (kw - 1) * rpt
    t_out_pad = num_tiles * tt
    K = kw * C

    # ---- relayout: channels-minor, width folded into rows (done once in XLA) ----
    #   row r = t*rpt + n*width + w, lane = channel
    x_g = inputs.reshape(T_in, N, C, width).transpose(0, 1, 3, 2)   # (T, N, w, c)
    t_build = t_out_pad + max(tt, kw - 1)
    x_full = jnp.pad(x_g, ((0, t_build - T_in), (0, n_pad - N), (0, 0), (0, 0)))
    x_full = x_full.reshape(t_build * rpt, C)

    x_main = x_full[: num_tiles * rm]

    # ---- halo slab: contiguous slice + reshape (no gather) ----------------------
    halo_slab = None
    if kw > 1:
        if num_tiles == 1:
            halo_slab = x_full[rm: rm + halo]
        elif halo <= rm:
            halo_slab = (x_full[rm: (num_tiles + 1) * rm]
                         .reshape(num_tiles, rm, C)[:, :halo]
                         .reshape(num_tiles * halo, C))
        else:   # tiny tiles (tt < kw-1): overlapping windows, build explicitly
            halo_slab = jnp.concatenate(
                [x_full[(i + 1) * rm: (i + 1) * rm + halo] for i in range(num_tiles)],
                axis=0)

    # ---- small conv / LN parameters in the channels-minor layout ----------------
    #   Wm[k*C + ci, co] = conv_w[co, ci, 0, k]
    w_mat = (jnp.transpose(conv_w[:, :, 0, :].astype(jnp.float32), (2, 1, 0))
             .reshape(K, C).astype(jnp.bfloat16))                   # (kw*C, C)
    b_vec = conv_b.astype(jnp.float32).reshape(1, C)
    g_mat = ln_w.astype(jnp.float32).reshape(C, width).T             # (width, C)
    bt_mat = ln_b.astype(jnp.float32).reshape(C, width).T

    kernel = _make_tds_kernel(rpt=rpt, tt=tt, ct=ct, kw=kw, width=width,
                              channels=C, eps=eps, out_dtype=inputs.dtype,
                              has_halo=(kw > 1))

    in_specs = [pl.BlockSpec((rm, C), lambda i: (i, 0))]             # main rows
    args = [x_main]
    if kw > 1:
        in_specs.append(pl.BlockSpec((halo, C), lambda i: (i, 0)))   # halo rows
        args.append(halo_slab)
    in_specs += [
        pl.BlockSpec((K, C), lambda i: (0, 0)),                      # conv weight (resident)
        pl.BlockSpec((1, C), lambda i: (0, 0)),                      # conv bias
        pl.BlockSpec((width, C), lambda i: (0, 0)),                  # LN gamma
        pl.BlockSpec((width, C), lambda i: (0, 0)),                  # LN beta
    ]
    args += [w_mat, b_vec, g_mat, bt_mat]

    out_rows = pl.pallas_call(
        kernel,
        out_shape=jax.ShapeDtypeStruct((num_tiles * rm, C), inputs.dtype),
        grid=(num_tiles,),
        in_specs=in_specs,
        out_specs=pl.BlockSpec((rm, C), lambda i: (i, 0)),
        scratch_shapes=[pltpu.VMEM((rm + halo, C), jnp.float32)],    # halo-extended window
        compiler_params=pltpu.CompilerParams(
            dimension_semantics=("parallel",),
            vmem_limit_bytes=vmem_limit),
    )(*args)

    out = out_rows.reshape(t_out_pad, n_pad, width, C)[:T_out, :N]   # (T_out, N, w, c)
    return out.transpose(0, 1, 3, 2).reshape(T_out, N, F)            # back to c*width + w


def tds_conv2d_block(inputs, conv_w, conv_b, ln_w, ln_b, *,
                     channels, width, kernel_width, eps=1e-5):
    """TDSConv2dBlock forward.  inputs: (T_in, N, F), F = channels*width."""
    T_in, N, F = inputs.shape
    if F != channels * width:
        raise ValueError("channels * width must equal the feature dim")
    kw = kernel_width
    T_out = T_in - kw + 1
    assert T_out >= 1, "sequence shorter than kernel_width"

    C = channels
    n_pad = _round_up(N, 16)             # sublane-aligned rows per (t, w)
    rpt = n_pad * width                  # rows per time step
    K = kw * C

    # ---- generation-aware tile sizing (static, outside jit) ---------------------
    vmem_cap = _vmem_capacity_bytes()
    chunk_budget = 4 << 20               # per-chunk im2col operand + f32 temporaries
    x_bytes = inputs.dtype.itemsize
    # per output-time-step: main block (x2 dbuf) + out block (x2 dbuf) + f32 scratch
    bytes_per_t = rpt * C * (2 * x_bytes + 2 * x_bytes + 4)
    fixed_bytes = ((kw - 1) * rpt * C * (2 * x_bytes + 4)
                   + 2 * (K * C * 2 + 3 * width * C * 4))
    budget = int(vmem_cap * 0.5) - fixed_bytes - chunk_budget
    tt_cap = max(1, budget // bytes_per_t)
    tt = int(min(T_out, tt_cap))

    num_tiles = pl.cdiv(T_out, tt)
    if T_out >= 2:
        num_tiles = max(num_tiles, 2)    # keep both v7x TensorCores busy
    if num_tiles > 1 and num_tiles % 2:
        num_tiles += 1                   # even split across the 2 TCs
    tt = pl.cdiv(T_out, num_tiles)

    # inner chunking so the (cr, kw*C) im2col operand stays well inside VMEM
    per_t_chunk_bytes = rpt * (K * 2 + C * 4 * 6)
    ct_cap = max(1, chunk_budget // per_t_chunk_bytes)
    ct = 1
    for d in range(1, tt + 1):
        if tt % d == 0 and d <= ct_cap:
            ct = d

    needed = fixed_bytes + tt * bytes_per_t + chunk_budget + (8 << 20)
    vmem_limit = int(max(16 << 20, min(int(vmem_cap * 0.9), needed)))

    return _tds_impl(inputs, conv_w, conv_b, ln_w, ln_b,
                     channels=channels, width=width, kernel_width=kw, eps=eps,
                     n_pad=n_pad, tt=int(tt), ct=int(ct),
                     num_tiles=int(num_tiles), vmem_limit=vmem_limit)


def _reference(inputs, conv_w, conv_b, ln_w, ln_b, *, channels, width,
               kernel_width, eps=1e-5):
    """Pure-JAX reference mirroring the PyTorch forward."""
    T_in, N, F = inputs.shape
    T_out = T_in - kernel_width + 1
    x = jnp.moveaxis(inputs, 0, -1).reshape(N, channels, width, T_in)
    out = jnp.zeros((N, channels, width, T_out), jnp.float32)
    for k in range(kernel_width):
        out = out + jnp.einsum("oc,ncwt->nowt", conv_w[:, :, 0, k],
                               x[..., k:k + T_out])
    out = out + conv_b[None, :, None, None]
    out = jnp.maximum(out, 0.0)
    out = jnp.moveaxis(out.reshape(N, F, T_out), -1, 0)
    out = out + inputs[-T_out:]
    mean = jnp.mean(out, -1, keepdims=True)
    var = jnp.mean((out - mean) ** 2, -1, keepdims=True)
    return (out - mean) * jax.lax.rsqrt(var + eps) * ln_w + ln_b


if __name__ == "__main__":
    channels, width, kernel_width = 4, 8, 3
    T_in, N = 8, 2
    F = channels * width                      # 32

    key = jax.random.PRNGKey(0)
    k0, k1, k2, k3, k4 = jax.random.split(key, 5)

    inputs = jax.random.normal(k0, (T_in, N, F), jnp.float32)
    conv_w = jax.random.normal(k1, (channels, channels, 1, kernel_width), jnp.float32) * 0.1
    conv_b = jax.random.normal(k2, (channels,), jnp.float32) * 0.1
    ln_w = 1.0 + 0.1 * jax.random.normal(k3, (F,), jnp.float32)
    ln_b = 0.1 * jax.random.normal(k4, (F,), jnp.float32)

    out = tds_conv2d_block(inputs, conv_w, conv_b, ln_w, ln_b,
                           channels=channels, width=width,
                           kernel_width=kernel_width)
    out = jax.block_until_ready(out)

    ref = _reference(inputs, conv_w, conv_b, ln_w, ln_b,
                     channels=channels, width=width, kernel_width=kernel_width)
    assert out.shape == (T_in - kernel_width + 1, N, F)
    # bf16 MXU operands -> ~1e-3-level deviation from the f32 reference.
    assert jnp.allclose(out, ref, atol=2e-2, rtol=2e-2), float(jnp.max(jnp.abs(out - ref)))

    print("KERNEL_OK")
</pallas_src>

<mosaic_0001>
module attributes {stable_mosaic.version = 11 : i64} {
  func.func @kernel(%arg0: i32, %arg1: memref<384x4xf32, #tpu.memory_space<vmem>>, %arg2: memref<256x4xf32, #tpu.memory_space<vmem>>, %arg3: memref<12x4xbf16, #tpu.memory_space<vmem>>, %arg4: memref<1x4xf32, #tpu.memory_space<vmem>>, %arg5: memref<8x4xf32, #tpu.memory_space<vmem>>, %arg6: memref<8x4xf32, #tpu.memory_space<vmem>>, %arg7: memref<384x4xf32, #tpu.memory_space<vmem>>, %arg8: memref<640x4xf32, #tpu.memory_space<vmem>>) attributes {dimension_semantics = [#tpu.dimension_semantics<parallel>], iteration_bounds = array<i64: 2>, scalar_prefetch = 0 : i64, scratch_operands = 1 : i64, tpu.core_type = #tpu.core_type<tc>, window_params = [{transform_indices = @transform_0, window_bounds = array<i64: 384, 4>}, {transform_indices = @transform_1, window_bounds = array<i64: 256, 4>}, {pipeline_mode = #tpu.pipeline_mode<synchronous>, transform_indices = @transform_2, window_bounds = array<i64: 12, 4>}, {pipeline_mode = #tpu.pipeline_mode<synchronous>, transform_indices = @transform_3, window_bounds = array<i64: 1, 4>}, {pipeline_mode = #tpu.pipeline_mode<synchronous>, transform_indices = @transform_4, window_bounds = array<i64: 8, 4>}, {pipeline_mode = #tpu.pipeline_mode<synchronous>, transform_indices = @transform_5, window_bounds = array<i64: 8, 4>}, {transform_indices = @transform_6, window_bounds = array<i64: 384, 4>}]} {
    %c0 = arith.constant 0 : index
    %c0_0 = arith.constant 0 : index
    %0 = vector.load %arg1[%c0, %c0_0] : memref<384x4xf32, #tpu.memory_space<vmem>>, vector<384x4xf32>
    %c0_1 = arith.constant 0 : index
    %c0_2 = arith.constant 0 : index
    %1 = vector.load %arg8[%c0_1, %c0_2] : memref<640x4xf32, #tpu.memory_space<vmem>>, vector<384x4xf32>
    tpu.vector_store %arg8[%c0_1, %c0_2], %0 {strides = array<i32>} : memref<640x4xf32, #tpu.memory_space<vmem>>, vector<384x4xf32>,
    %c0_3 = arith.constant 0 : index
    %c0_4 = arith.constant 0 : index
    %2 = vector.load %arg2[%c0_3, %c0_4] : memref<256x4xf32, #tpu.memory_space<vmem>>, vector<256x4xf32>
    %c384 = arith.constant 384 : index
    %c0_5 = arith.constant 0 : index
    %3 = vector.load %arg8[%c384, %c0_5] : memref<640x4xf32, #tpu.memory_space<vmem>>, vector<256x4xf32>
    tpu.vector_store %arg8[%c384, %c0_5], %2 {strides = array<i32>} : memref<640x4xf32, #tpu.memory_space<vmem>>, vector<256x4xf32>,
    %c0_6 = arith.constant 0 : index
    %c0_7 = arith.constant 0 : index
    %4 = vector.load %arg3[%c0_6, %c0_7] : memref<12x4xbf16, #tpu.memory_space<vmem>>, vector<12x4xbf16>
    %c0_8 = arith.constant 0 : index
    %c0_9 = arith.constant 0 : index
    %5 = vector.load %arg4[%c0_8, %c0_9] : memref<1x4xf32, #tpu.memory_space<vmem>>, vector<1x4xf32>
    %c0_10 = arith.constant 0 : index
    %c0_11 = arith.constant 0 : index
    %6 = vector.load %arg5[%c0_10, %c0_11] : memref<8x4xf32, #tpu.memory_space<vmem>>, vector<8x4xf32>
    %c0_12 = arith.constant 0 : index
    %c0_13 = arith.constant 0 : index
    %7 = vector.load %arg6[%c0_12, %c0_13] : memref<8x4xf32, #tpu.memory_space<vmem>>, vector<8x4xf32>
    %c0_14 = arith.constant 0 : index
    %c0_15 = arith.constant 0 : index
    %8 = vector.load %arg8[%c0_14, %c0_15] : memref<640x4xf32, #tpu.memory_space<vmem>>, vector<384x4xf32>
    %c128 = arith.constant 128 : index
    %c0_16 = arith.constant 0 : index
    %9 = vector.load %arg8[%c128, %c0_16] : memref<640x4xf32, #tpu.memory_space<vmem>>, vector<384x4xf32>
    %c256 = arith.constant 256 : index
    %c0_17 = arith.constant 0 : index
    %10 = vector.load %arg8[%c256, %c0_17] : memref<640x4xf32, #tpu.memory_space<vmem>>, vector<384x4xf32>
    %11 = tpu.concatenate %8, %9, %10 in 1 : vector<384x4xf32>, vector<384x4xf32>, vector<384x4xf32> -> vector<384x12xf32>
    %12 = arith.truncf %11 : vector<384x12xf32> to vector<384x12xbf16>
    %cst = arith.constant dense<0.000000e+00> : vector<384x4xf32>
    %13 = tpu.matmul %12, %4, %cst {dimension_numbers = #tpu.dot_dimension_numbers<[1], [0], [0], [1], [0, 0, 1, 1], [], []>} : vector<384x12xbf16>, vector<12x4xbf16>, vector<384x4xf32> -> vector<384x4xf32>
    %14 = vector.broadcast %5 : vector<1x4xf32> to vector<384x4xf32>
    %15 = arith.addf %13, %14 : vector<384x4xf32>
    %cst_18 = arith.constant 0.000000e+00 : f32
    %16 = vector.broadcast %cst_18 : f32 to vector<384x4xf32>
    %17 = arith.maximumf %15, %16 : vector<384x4xf32>
    %c256_19 = arith.constant 256 : index
    %c0_20 = arith.constant 0 : index
    %18 = vector.load %arg8[%c256_19, %c0_20] : memref<640x4xf32, #tpu.memory_space<vmem>>, vector<384x4xf32>
    %19 = arith.addf %17, %18 : vector<384x4xf32>
    %20 = vector.shape_cast %19 : vector<384x4xf32> to vector<48x8x4xf32>
    %cst_21 = arith.constant dense<0.000000e+00> : vector<48x8xf32>
    %21 = vector.multi_reduction <add>, %20, %cst_21 [2] : vector<48x8x4xf32> to vector<48x8xf32>
    %22 = vector.shape_cast %21 : vector<48x8xf32> to vector<48x8x1xf32>
    %cst_22 = arith.constant dense<0.000000e+00> : vector<48x1xf32>
    %23 = vector.multi_reduction <add>, %22, %cst_22 [1] : vector<48x8x1xf32> to vector<48x1xf32>
    %24 = vector.shape_cast %23 : vector<48x1xf32> to vector<48x1x1xf32>
    %cst_23 = arith.constant 3.125000e-02 : f32
    %25 = vector.broadcast %cst_23 : f32 to vector<48x1x1xf32>
    %26 = arith.mulf %24, %25 : vector<48x1x1xf32>
    %27 = vector.broadcast %26 : vector<48x1x1xf32> to vector<48x8x4xf32>
    %28 = arith.subf %20, %27 : vector<48x8x4xf32>
    %29 = arith.mulf %28, %28 : vector<48x8x4xf32>
    %cst_24 = arith.constant dense<0.000000e+00> : vector<48x8xf32>
    %30 = vector.multi_reduction <add>, %29, %cst_24 [2] : vector<48x8x4xf32> to vector<48x8xf32>
    %31 = vector.shape_cast %30 : vector<48x8xf32> to vector<48x8x1xf32>
    %cst_25 = arith.constant dense<0.000000e+00> : vector<48x1xf32>
    %32 = vector.multi_reduction <add>, %31, %cst_25 [1] : vector<48x8x1xf32> to vector<48x1xf32>
    %33 = vector.shape_cast %32 : vector<48x1xf32> to vector<48x1x1xf32>
    %cst_26 = arith.constant 3.125000e-02 : f32
    %34 = vector.broadcast %cst_26 : f32 to vector<48x1x1xf32>
    %35 = arith.mulf %33, %34 : vector<48x1x1xf32>
    %cst_27 = arith.constant 9.99999974E-6 : f32
    %36 = vector.broadcast %cst_27 : f32 to vector<48x1x1xf32>
    %37 = arith.addf %35, %36 : vector<48x1x1xf32>
    %38 = math.rsqrt %37 : vector<48x1x1xf32>
    %39 = vector.broadcast %38 : vector<48x1x1xf32> to vector<48x8x4xf32>
    %40 = arith.mulf %28, %39 : vector<48x8x4xf32>
    %41 = vector.shape_cast %6 : vector<8x4xf32> to vector<1x8x4xf32>
    %42 = vector.broadcast %41 : vector<1x8x4xf32> to vector<48x8x4xf32>
    %43 = arith.mulf %40, %42 : vector<48x8x4xf32>
    %44 = vector.shape_cast %7 : vector<8x4xf32> to vector<1x8x4xf32>
    %45 = vector.broadcast %44 : vector<1x8x4xf32> to vector<48x8x4xf32>
    %46 = arith.addf %43, %45 : vector<48x8x4xf32>
    %47 = vector.shape_cast %46 : vector<48x8x4xf32> to vector<384x4xf32>
    %c0_28 = arith.constant 0 : index
    %c0_29 = arith.constant 0 : index
    %48 = vector.load %arg7[%c0_28, %c0_29] : memref<384x4xf32, #tpu.memory_space<vmem>>, vector<384x4xf32>
    tpu.vector_store %arg7[%c0_28, %c0_29], %47 {strides = array<i32>} : memref<384x4xf32, #tpu.memory_space<vmem>>, vector<384x4xf32>,
    return
  }
  func.func @transform_0(%arg0: i32) -> (i32, i32) {
    %c0_i32 = arith.constant 0 : i32
    %c0_i32_0 = arith.constant 0 : i32
    return %arg0, %c0_i32 : i32, i32
  }
  func.func @transform_1(%arg0: i32) -> (i32, i32) {
    %c0_i32 = arith.constant 0 : i32
    %c0_i32_0 = arith.constant 0 : i32
    return %arg0, %c0_i32 : i32, i32
  }
  func.func @transform_2(%arg0: i32) -> (i32, i32) {
    %c0_i32 = arith.constant 0 : i32
    %c0_i32_0 = arith.constant 0 : i32
    %c0_i32_1 = arith.constant 0 : i32
    return %c0_i32, %c0_i32_0 : i32, i32
  }
  func.func @transform_3(%arg0: i32) -> (i32, i32) {
    %c0_i32 = arith.constant 0 : i32
    %c0_i32_0 = arith.constant 0 : i32
    %c0_i32_1 = arith.constant 0 : i32
    return %c0_i32, %c0_i32_0 : i32, i32
  }
  func.func @transform_4(%arg0: i32) -> (i32, i32) {
    %c0_i32 = arith.constant 0 : i32
    %c0_i32_0 = arith.constant 0 : i32
    %c0_i32_1 = arith.constant 0 : i32
    return %c0_i32, %c0_i32_0 : i32, i32
  }
  func.func @transform_5(%arg0: i32) -> (i32, i32) {
    %c0_i32 = arith.constant 0 : i32
    %c0_i32_0 = arith.constant 0 : i32
    %c0_i32_1 = arith.constant 0 : i32
    return %c0_i32, %c0_i32_0 : i32, i32
  }
  func.func @transform_6(%arg0: i32) -> (i32, i32) {
    %c0_i32 = arith.constant 0 : i32
    %c0_i32_0 = arith.constant 0 : i32
    return %arg0, %c0_i32 : i32, i32
  }
}

</mosaic_0001>

<bundles_post_ra>
// kernel: _tds_impl.1
= control target key start
LH: loop header
LB: loop body
LE: loop exit
PB: predicated region body
PF: predicated region fallthrough
CT: control target
= control target key end

     0   :  { %s3375_s21 = smov 0   ;;  %s4729_s0 = inlined_call_operand.vmem [shape: f32[768,4], index: 0, kind: input, shape index: {}]   ;;  %s4730_s1 = inlined_call_operand.vmem [shape: f32[512,4], index: 1, kind: input, shape index: {}]   ;;  %s4731_s2 = inlined_call_operand.vmem [shape: bf16[12,4], index: 2, kind: input, shape index: {}]   ;;  %s4732_s3 = inlined_call_operand.vmem [shape: f32[1,4], index: 3, kind: input, shape index: {}]   ;;  %s4733_s4 = inlined_call_operand.vmem [shape: f32[8,4], index: 4, kind: input, shape index: {}]   ;;  %s4734_s5 = inlined_call_operand.vmem [shape: f32[8,4], index: 5, kind: input, shape index: {}]   ;;  %s4735_s6 = inlined_call_operand.vmem [shape: f32[768,4], index: 6, kind: output, shape index: {}]  }
   0x1 LB: > { %s2818_s22 = sadd.s32 4294967295, %s3336_s21   ;;  %p2822_p0 = scmp.ge.s32.totalorder %s3336_s21, 1  ;;  %s3336_s21 = sphi %s3375_s21, %s16_s21  }
   0x2   : > { %p224_p1 = scmp.lt.s32.totalorder %s3336_s21, 3 }
   0x4   : > { %p225_p2 = pnand %p2822_p0, %p224_p1 }
   0x6   : > { %228 = sbr.rel (%p225_p2) target bundleno = 845 (0x34d), region = 44 }
   0xb   : > { %s2824_s23 = sshll.u32 %s2818_s22, 5  ;;  %s259_s24 = smul.u32 48, %s2818_s22  ;;  %vm326_vm0 = vcmask 31744   ;;  %vm1081_vm1 = vcmask 1045504   ;;  %vm924_vm2 = vcmask 64512   ;;  %vm1008_vm3 = vcmask 97280  }
   0xc   : > { %p266_p3 = scmp.lt.s32.totalorder %s2824_s23, 63  ;;  %s3338_s9 = smov 8  }
   0xd   : > { %p260_p4 = scmp.lt.s32.totalorder %s259_s24, 95  ;;  %s3339_s10 = smov 4  }
   0xe   : > { %s4812_s23 = smov (!%p266_p3, %s2824_s23), 63 }
   0xf   : > { %s2825_s25 = sshll.u32 %s4812_s23, 3  ;;  %s4814_s24 = smov (!%p260_p4, %s259_s24), 95 }
  0x10   : > { %s3386_s28 = scalar_lea.vmem %s4730_s1, %s2825_s25  ;;  %s2823_s29 = sshll.u32 %s4814_s24, 3 }
  0x11   : > { %v383_v0 = vld [vmem:[%s3386_s28 + $0x40] sm:$0xff]  ;;  %v384_v1 = vld [vmem:[%s3386_s28 + $0x48] sm:$0xff]  ;;  %v385_v2 = vld [vmem:[%s3386_s28 + $0x50] sm:$0xff]  ;;  %s3411_s8 = scalar_lea.vmem %s4729_s0, %s2823_s29  ;;  %s4476_s22 = scalar_lea.vmem %s4735_s6, %s2823_s29 }
  0x12   : > { %415 = vst.msk [vmem:[#allocation2 + $0x1c0] sm:$0xff] %vm326_vm0, %v383_v0  ;;  %416 = vst.msk [vmem:[#allocation2 + $0x1c8] sm:$0xff] %vm326_vm0, %v384_v1  ;;  %v386_v3 = vld [vmem:[%s3386_s28 + $0x58] sm:$0xff]  ;;  %v387_v4 = vld [vmem:[%s3386_s28 + $0x60] sm:$0xff] }
  0x13   : > { %417 = vst.msk [vmem:[#allocation2 + $0x1d0] sm:$0xff] %vm326_vm0, %v385_v2  ;;  %v388_v5 = vld [vmem:[%s3386_s28 + $0x68] sm:$0xff]  ;;  %418 = vst.msk [vmem:[#allocation2 + $0x1d8] sm:$0xff] %vm326_vm0, %v386_v3  ;;  %v389_v6 = vld [vmem:[%s3386_s28 + $0x70] sm:$0xff] }
  0x14   : > { %419 = vst.msk [vmem:[#allocation2 + $0x1e0] sm:$0xff] %vm326_vm0, %v387_v4  ;;  %420 = vst.msk [vmem:[#allocation2 + $0x1e8] sm:$0xff] %vm326_vm0, %v388_v5  ;;  %v390_v7 = vld [vmem:[%s3386_s28 + $0x78] sm:$0xff]  ;;  %v375_v8 = vld [vmem:[%s3386_s28] sm:$0xff] }
  0x15   : > { %421 = vst.msk [vmem:[#allocation2 + $0x1f0] sm:$0xff] %vm326_vm0, %v389_v6  ;;  %422 = vst.msk [vmem:[#allocation2 + $0x1f8] sm:$0xff] %vm326_vm0, %v390_v7  ;;  %v376_v9 = vld [vmem:[%s3386_s28 + $0x8] sm:$0xff]  ;;  %v377_v10 = vld [vmem:[%s3386_s28 + $0x10] sm:$0xff] }
  0x16   : > { %407 = vst.msk [vmem:[#allocation2 + $0x180] sm:$0xff] %vm326_vm0, %v375_v8  ;;  %v378_v11 = vld [vmem:[%s3386_s28 + $0x18] sm:$0xff]  ;;  %v294_v12 = vld [vmem:[%s3411_s8 + $0x80] sm:$0xff]  ;;  %v295_v13 = vld [vmem:[%s3411_s8 + $0x88] sm:$0xff] }
  0x17   : > { %v318_v14 = vld [vmem:[%s3411_s8 + $0x140] sm:$0xff]  ;;  %408 = vst.msk [vmem:[#allocation2 + $0x188] sm:$0xff] %vm326_vm0, %v376_v9  ;;  %409 = vst.msk [vmem:[#allocation2 + $0x190] sm:$0xff] %vm326_vm0, %v377_v10  ;;  %v319_v15 = vld [vmem:[%s3411_s8 + $0x148] sm:$0xff] }
  0x18   : > { %410 = vst.msk [vmem:[#allocation2 + $0x198] sm:$0xff] %vm326_vm0, %v378_v11  ;;  %343 = vst.msk [vmem:[#allocation2 + $0x80] sm:$0xff] %vm326_vm0, %v294_v12  ;;  %v296_v16 = vld [vmem:[%s3411_s8 + $0x90] sm:$0xff]  ;;  %v297_v17 = vld [vmem:[%s3411_s8 + $0x98] sm:$0xff] }
  0x19   : > { %344 = vst.msk [vmem:[#allocation2 + $0x88] sm:$0xff] %vm326_vm0, %v295_v13  ;;  %367 = vst.msk [vmem:[#allocation2 + $0x140] sm:$0xff] %vm326_vm0, %v318_v14  ;;  %v310_v18 = vld [vmem:[%s3411_s8 + $0x100] sm:$0xff]  ;;  %v311_v19 = vld [vmem:[%s3411_s8 + $0x108] sm:$0xff] }
  0x1a   : > { %368 = vst.msk [vmem:[#allocation2 + $0x148] sm:$0xff] %vm326_vm0, %v319_v15  ;;  %345 = vst.msk [vmem:[#allocation2 + $0x90] sm:$0xff] %vm326_vm0, %v296_v16  ;;  %v320_v20 = vld [vmem:[%s3411_s8 + $0x150] sm:$0xff]  ;;  %v321_v21 = vld [vmem:[%s3411_s8 + $0x158] sm:$0xff] }
  0x1b   : > { %346 = vst.msk [vmem:[#allocation2 + $0x98] sm:$0xff] %vm326_vm0, %v297_v17  ;;  %359 = vst.msk [vmem:[#allocation2 + $0x100] sm:$0xff] %vm326_vm0, %v310_v18  ;;  %v312_v22 = vld [vmem:[%s3411_s8 + $0x110] sm:$0xff]  ;;  %v313_v23 = vld [vmem:[%s3411_s8 + $0x118] sm:$0xff] }
  0x1c   : > { %360 = vst.msk [vmem:[#allocation2 + $0x108] sm:$0xff] %vm326_vm0, %v311_v19  ;;  %369 = vst.msk [vmem:[#allocation2 + $0x150] sm:$0xff] %vm326_vm0, %v320_v20  ;;  %v500_v24 = vld [vmem:[#allocation2 + $0x1c0] sm:$0xff]  ;;  %v501_v25 = vld [vmem:[#allocation2 + $0x1c8] sm:$0xff] }
  0x1d   : > { %v502_v26 = vld [vmem:[#allocation2 + $0x1d0] sm:$0xff]  ;;  %370 = vst.msk [vmem:[#allocation2 + $0x158] sm:$0xff] %vm326_vm0, %v321_v21  ;;  %361 = vst.msk [vmem:[#allocation2 + $0x110] sm:$0xff] %vm326_vm0, %v312_v22  ;;  %v3446_v27 = vpack.i.bf16 %v501_v25, %v500_v24  ;;  %v503_v28 = vld [vmem:[#allocation2 + $0x1d8] sm:$0xff] }
  0x1e   : > { %362 = vst.msk [vmem:[#allocation2 + $0x118] sm:$0xff] %vm326_vm0, %v313_v23  ;;  %v322_v29 = vld [vmem:[%s3411_s8 + $0x160] sm:$0xff]  ;;  %v323_v30 = vld [vmem:[%s3411_s8 + $0x168] sm:$0xff]  ;;  %v324_v33 = vld [vmem:[%s3411_s8 + $0x170] sm:$0xff]  ;;  %v3457_v34 = vpack.i.bf16 %v503_v28, %v502_v26 }
  0x1f   : > { %371 = vst.msk [vmem:[#allocation2 + $0x160] sm:$0xff] %vm326_vm0, %v322_v29  ;;  %372 = vst.msk [vmem:[#allocation2 + $0x168] sm:$0xff] %vm326_vm0, %v323_v30  ;;  %v298_v31 = vld [vmem:[%s3411_s8 + $0xa0] sm:$0xff]  ;;  %v299_v32 = vld [vmem:[%s3411_s8 + $0xa8] sm:$0xff]  ;;  %2945 = vrot.lane.b32.xlu1 %v3446_v27, %s3338_s9 }
  0x20   : > { %347 = vst.msk [vmem:[#allocation2 + $0xa0] sm:$0xff] %vm326_vm0, %v298_v31  ;;  %348 = vst.msk [vmem:[#allocation2 + $0xa8] sm:$0xff] %vm326_vm0, %v299_v32  ;;  %v325_v35 = vld [vmem:[%s3411_s8 + $0x178] sm:$0xff]  ;;  %v300_v36 = vld [vmem:[%s3411_s8 + $0xb0] sm:$0xff] }
  0x21   : > { %373 = vst.msk [vmem:[#allocation2 + $0x170] sm:$0xff] %vm326_vm0, %v324_v33  ;;  %v301_v37 = vld [vmem:[%s3411_s8 + $0xb8] sm:$0xff]  ;;  %v3465_v38 = vld [vmem:[#allocation2 + $0x80] sm:$0xff]  ;;  %v3467_v39 = vld [vmem:[#allocation2 + $0x88] sm:$0xff] }
  0x22   : > { %v3469_v40 = vld [vmem:[#allocation2 + $0x140] sm:$0xff]  ;;  %374 = vst.msk [vmem:[#allocation2 + $0x178] sm:$0xff] %vm326_vm0, %v325_v35  ;;  %349 = vst.msk [vmem:[#allocation2 + $0xb0] sm:$0xff] %vm326_vm0, %v300_v36  ;;  %v2954_v41 = vpack.i.bf16 %v3467_v39, %v3465_v38  ;;  %v3476_v42 = vld [vmem:[#allocation2 + $0x148] sm:$0xff] }
  0x23   : > { %350 = vst.msk [vmem:[#allocation2 + $0xb8] sm:$0xff] %vm326_vm0, %v301_v37  ;;  %v3478_v43 = vld [vmem:[#allocation2 + $0x90] sm:$0xff]  ;;  %v3480_v44 = vld [vmem:[#allocation2 + $0x98] sm:$0xff]  ;;  %2950 = vrot.lane.b32.xlu1 %v3457_v34, %s3338_s9  ;;  %v3487_v45 = vpack.i.bf16 %v3476_v42, %v3469_v40  ;;  %v3491_v47 = vld [vmem:[#allocation2 + $0x100] sm:$0xff] }
  0x24   : > { %2955 = vrot.lane.b32.xlu0 %v2954_v41, %s3339_s10  ;;  %v2964_v46 = vpack.i.bf16 %v3480_v44, %v3478_v43  ;;  %v3493_v48 = vld [vmem:[#allocation2 + $0x108] sm:$0xff]  ;;  %v3495_v49 = vld [vmem:[#allocation2 + $0x150] sm:$0xff]  ;;  %v3497_v50 = vld [vmem:[#allocation2 + $0x158] sm:$0xff] }
  0x25   : > { %v314_v51 = vld [vmem:[%s3411_s8 + $0x120] sm:$0xff]  ;;  %v315_v52 = vld [vmem:[%s3411_s8 + $0x128] sm:$0xff]  ;;  %v3508_v53 = vpack.i.bf16 %v3493_v48, %v3491_v47  ;;  %v3512_v54 = vpack.i.bf16 %v3497_v50, %v3495_v49  ;;  %v3514_v55 = vld [vmem:[#allocation2 + $0x110] sm:$0xff] }
  0x26   : > { %363 = vst.msk [vmem:[#allocation2 + $0x120] sm:$0xff] %vm326_vm0, %v314_v51  ;;  %364 = vst.msk [vmem:[#allocation2 + $0x128] sm:$0xff] %vm326_vm0, %v315_v52  ;;  %v3516_v56 = vld [vmem:[#allocation2 + $0x118] sm:$0xff]  ;;  %v3518_v57 = vld [vmem:[#allocation2 + $0x160] sm:$0xff] }
  0x27   : > { %2965 = vrot.lane.b32.xlu1 %v2964_v46, %s3339_s10  ;;  %v3520_v58 = vld [vmem:[#allocation2 + $0x168] sm:$0xff]  ;;  %v316_v59 = vld [vmem:[%s3411_s8 + $0x130] sm:$0xff]  ;;  %v317_v60 = vld [vmem:[%s3411_s8 + $0x138] sm:$0xff]  ;;  %v3538_v1 = vpack.i.bf16 %v3516_v56, %v3514_v55 }
  0x28   : > { %2960 = vrot.lane.b32.xlu0 %v3487_v45, %s3339_s10  ;;  %365 = vst.msk [vmem:[#allocation2 + $0x130] sm:$0xff] %vm326_vm0, %v316_v59  ;;  %v3525_v61 = vld [vmem:[#allocation2 + $0xa0] sm:$0xff]  ;;  %v3527_v62 = vld [vmem:[#allocation2 + $0xa8] sm:$0xff]  ;;  %366 = vst.msk [vmem:[#allocation2 + $0x138] sm:$0xff] %vm326_vm0, %v317_v60  ;;  %v3542_v2 = vpack.i.bf16 %v3520_v58, %v3518_v57 }
  0x29   : > { %v302_v63 = vld [vmem:[%s3411_s8 + $0xc0] sm:$0xff]  ;;  %v303_v0 = vld [vmem:[%s3411_s8 + $0xc8] sm:$0xff]  ;;  %v3544_v3 = vld [vmem:[#allocation2 + $0x170] sm:$0xff]  ;;  %v2984_v16 = vpack.i.bf16 %v3527_v62, %v3525_v61 }
  0x2a   : > { %351 = vst.msk [vmem:[#allocation2 + $0xc0] sm:$0xff] %vm326_vm0, %v302_v63  ;;  %352 = vst.msk [vmem:[#allocation2 + $0xc8] sm:$0xff] %vm326_vm0, %v303_v0  ;;  %v304_v4 = vld [vmem:[%s3411_s8 + $0xd0] sm:$0xff]  ;;  %v305_v5 = vld [vmem:[%s3411_s8 + $0xd8] sm:$0xff] }
  0x2b   : > { %2970 = vrot.lane.b32.xlu1 %v3512_v54, %s3339_s10  ;;  %v3550_v6 = vld [vmem:[#allocation2 + $0x178] sm:$0xff]  ;;  %353 = vst.msk [vmem:[#allocation2 + $0xd0] sm:$0xff] %vm326_vm0, %v304_v4  ;;  %354 = vst.msk [vmem:[#allocation2 + $0xd8] sm:$0xff] %vm326_vm0, %v305_v5  ;;  %v391_v7 = vld [vmem:[%s3386_s28 + $0x80] sm:$0xff] }
  0x2c   : > { %2975 = vrot.lane.b32.xlu0 %v3508_v53, %s3338_s9  ;;  %v392_v8 = vld [vmem:[%s3386_s28 + $0x88] sm:$0xff]  ;;  %423 = vst.msk [vmem:[#allocation2 + $0x200] sm:$0xff] %vm326_vm0, %v391_v7  ;;  %v393_v9 = vld [vmem:[%s3386_s28 + $0x90] sm:$0xff]  ;;  %v394_v10 = vld [vmem:[%s3386_s28 + $0x98] sm:$0xff]  ;;  %v3573_v17 = vpack.i.bf16 %v3550_v6, %v3544_v3 }
  0x2d   : > { %424 = vst.msk [vmem:[#allocation2 + $0x208] sm:$0xff] %vm326_vm0, %v392_v8  ;;  %v504_v11 = vld [vmem:[#allocation2 + $0x1e0] sm:$0xff]  ;;  %v505_v12 = vld [vmem:[#allocation2 + $0x1e8] sm:$0xff]  ;;  %425 = vst.msk [vmem:[#allocation2 + $0x210] sm:$0xff] %vm326_vm0, %v393_v9 }
  0x2e   : > { %426 = vst.msk [vmem:[#allocation2 + $0x218] sm:$0xff] %vm326_vm0, %v394_v10  ;;  %v379_v13 = vld [vmem:[%s3386_s28 + $0x20] sm:$0xff]  ;;  %v380_v14 = vld [vmem:[%s3386_s28 + $0x28] sm:$0xff]  ;;  %v3575_v18 = vld [vmem:[#allocation2 + $0xb0] sm:$0xff]  ;;  %v3600_v29 = vpack.i.bf16 %v505_v12, %v504_v11 }
  0x2f   : > { %v306_v15 = vld [vmem:[%s3411_s8 + $0xe0] sm:$0xff]  ;;  %2990 = vrot.lane.b32.xlu1 %v3542_v2, %s3339_s10  ;;  %411 = vst.msk [vmem:[#allocation2 + $0x1a0] sm:$0xff] %vm326_vm0, %v379_v13  ;;  %412 = vst.msk [vmem:[#allocation2 + $0x1a8] sm:$0xff] %vm326_vm0, %v380_v14  ;;  %v307_v19 = vld [vmem:[%s3411_s8 + $0xe8] sm:$0xff] }
  0x30   : > { %2980 = vrot.lane.b32.xlu0 %v3538_v1, %s3338_s9  ;;  %355 = vst.msk [vmem:[#allocation2 + $0xe0] sm:$0xff] %vm326_vm0, %v306_v15  ;;  %v381_v20 = vld [vmem:[%s3386_s28 + $0x30] sm:$0xff]  ;;  %v3582_v21 = vld [vmem:[#allocation2 + $0xb8] sm:$0xff]  ;;  %356 = vst.msk [vmem:[#allocation2 + $0xe8] sm:$0xff] %vm326_vm0, %v307_v19 }
  0x31   : > { %v382_v22 = vld [vmem:[%s3386_s28 + $0x38] sm:$0xff]  ;;  %413 = vst.msk [vmem:[#allocation2 + $0x1b0] sm:$0xff] %vm326_vm0, %v381_v20  ;;  %v308_v23 = vld [vmem:[%s3411_s8 + $0xf0] sm:$0xff]  ;;  %v395_v25 = vld [vmem:[%s3386_s28 + $0xa0] sm:$0xff]  ;;  %v2994_v28 = vpack.i.bf16 %v3582_v21, %v3575_v18 }
  0x32   : > { %414 = vst.msk [vmem:[#allocation2 + $0x1b8] sm:$0xff] %vm326_vm0, %v382_v22  ;;  %v309_v24 = vld [vmem:[%s3411_s8 + $0xf8] sm:$0xff]  ;;  %357 = vst.msk [vmem:[#allocation2 + $0xf0] sm:$0xff] %vm326_vm0, %v308_v23  ;;  %v396_v26 = vld [vmem:[%s3386_s28 + $0xa8] sm:$0xff] }
  0x33   : > { %358 = vst.msk [vmem:[#allocation2 + $0xf8] sm:$0xff] %vm326_vm0, %v309_v24  ;;  %427 = vst.msk [vmem:[#allocation2 + $0x220] sm:$0xff] %vm326_vm0, %v395_v25  ;;  %3000 = vrot.lane.b32.xlu1 %v3573_v17, %s3339_s10  ;;  %v506_v30 = vld [vmem:[#allocation2 + $0x1f0] sm:$0xff]  ;;  %v507_v31 = vld [vmem:[#allocation2 + $0x1f8] sm:$0xff] }
  0x34   : > { %2985 = vrot.lane.b32.xlu0 %v2984_v16, %s3339_s10  ;;  %428 = vst.msk [vmem:[#allocation2 + $0x228] sm:$0xff] %vm326_vm0, %v396_v26  ;;  %v397_v32 = vld [vmem:[%s3386_s28 + $0xb0] sm:$0xff]  ;;  %v3604_v33 = vld [vmem:[#allocation2 + $0x120] sm:$0xff]  ;;  %v3606_v35 = vld [vmem:[#allocation2 + $0x128] sm:$0xff]  ;;  %v3620_v46 = vpack.i.bf16 %v507_v31, %v506_v30 }
  0x35   : > { %v398_v36 = vld [vmem:[%s3386_s28 + $0xb8] sm:$0xff]  ;;  %429 = vst.msk [vmem:[#allocation2 + $0x230] sm:$0xff] %vm326_vm0, %v397_v32  ;;  %v399_v37 = vld [vmem:[%s3386_s28 + $0xc0] sm:$0xff]  ;;  %v3618_v41 = vpack.i.bf16 %v3606_v35, %v3604_v33  ;;  %v493_v52 = vld [vmem:[#allocation2 + $0x188] sm:$0xff] }
  0x36   : > { %430 = vst.msk [vmem:[#allocation2 + $0x238] sm:$0xff] %vm326_vm0, %v398_v36  ;;  %431 = vst.msk [vmem:[#allocation2 + $0x240] sm:$0xff] %vm326_vm0, %v399_v37  ;;  %v492_v51 = vld [vmem:[#allocation2 + $0x180] sm:$0xff]  ;;  %v400_v59 = vld [vmem:[%s3386_s28 + $0xc8] sm:$0xff] }
  0x37   : > { %3010 = vrot.lane.b32.xlu1 %v3600_v29, %s3338_s9  ;;  %v3623_v60 = vld [vmem:[#allocation2 + $0x130] sm:$0xff]  ;;  %v3625_v63 = vld [vmem:[#allocation2 + $0x138] sm:$0xff]  ;;  %432 = vst.msk [vmem:[#allocation2 + $0x248] sm:$0xff] %vm326_vm0, %v400_v59  ;;  %v403_v8 = vld [vmem:[%s3386_s28 + $0xe0] sm:$0xff]  ;;  %v3642_v11 = vpack.i.bf16 %v493_v52, %v492_v51 }
  0x38   : > { %2995 = vrot.lane.b32.xlu0 %v2994_v28, %s3339_s10  ;;  %v401_v0 = vld [vmem:[%s3386_s28 + $0xd0] sm:$0xff]  ;;  %v402_v4 = vld [vmem:[%s3386_s28 + $0xd8] sm:$0xff]  ;;  %v404_v9 = vld [vmem:[%s3386_s28 + $0xe8] sm:$0xff]  ;;  %v3640_v10 = vpack.i.bf16 %v3625_v63, %v3623_v60  ;;  %435 = vst.msk [vmem:[#allocation2 + $0x260] sm:$0xff] %vm326_vm0, %v403_v8 }
  0x39   : > { %433 = vst.msk [vmem:[#allocation2 + $0x250] sm:$0xff] %vm326_vm0, %v401_v0  ;;  %v494_v5 = vld [vmem:[#allocation2 + $0x190] sm:$0xff]  ;;  %v495_v7 = vld [vmem:[#allocation2 + $0x198] sm:$0xff]  ;;  %434 = vst.msk [vmem:[#allocation2 + $0x258] sm:$0xff] %vm326_vm0, %v402_v4 }
  0x3a   : > { %v3644_v12 = vld [vmem:[#allocation2 + $0xc0] sm:$0xff]  ;;  %436 = vst.msk [vmem:[#allocation2 + $0x268] sm:$0xff] %vm326_vm0, %v404_v9  ;;  %v405_v13 = vld [vmem:[%s3386_s28 + $0xf0] sm:$0xff]  ;;  %v406_v14 = vld [vmem:[%s3386_s28 + $0xf8] sm:$0xff]  ;;  %v3676_v31 = vpack.i.bf16 %v495_v7, %v494_v5 }
  0x3b   : > { %3020 = vrot.lane.b32.xlu1 %v3620_v46, %s3338_s9  ;;  %v3650_v15 = vld [vmem:[#allocation2 + $0xc8] sm:$0xff]  ;;  %437 = vst.msk [vmem:[#allocation2 + $0x270] sm:$0xff] %vm326_vm0, %v405_v13  ;;  %438 = vst.msk [vmem:[#allocation2 + $0x278] sm:$0xff] %vm326_vm0, %v406_v14  ;;  %v280_v16 = vld [vmem:[%s3411_s8 + $0x10] sm:$0xff] }
  0x3c   : > { %3005 = vrot.lane.b32.xlu0 %v3618_v41, %s3338_s9  ;;  %v281_v19 = vld [vmem:[%s3411_s8 + $0x18] sm:$0xff]  ;;  %329 = vst.msk [vmem:[#allocation2 + $0x10] sm:$0xff] %vm326_vm0, %v280_v16  ;;  %v3184_v20 = vld [vmem:[%s4731_s2] sm:$0x3f]   ;;  %v3662_v23 = vld [vmem:[#allocation2 + $0xd0] sm:$0xff]  ;;  %v3024_v30 = vpack.i.bf16 %v3650_v15, %v3644_v12 }
  0x3d   : > { %330 = vst.msk [vmem:[#allocation2 + $0x18] sm:$0xff] %vm326_vm0, %v281_v19  ;;  %v278_v22 = vld [vmem:[%s3411_s8] sm:$0xff]  ;;  %v3664_v24 = vld [vmem:[#allocation2 + $0xd8] sm:$0xff]  ;;  %v279_v25 = vld [vmem:[%s3411_s8 + $0x8] sm:$0xff]  ;;  %v1083_v36 = vsel %vm1081_vm1, %v3184_v20, 0  ;;  %2932 = vmatprep.subr.msk.bf16.mxu0 %vm1081_vm1, %v3184_v20  ;;  %2933 = vmatprep.subr.msk.bf16.mxu1 %vm1081_vm1, %v3184_v20 }
  0x3e   : > { %327 = vst.msk [vmem:[#allocation2] sm:$0xff] %vm326_vm0, %v278_v22  ;;  %v282_v26 = vld [vmem:[%s3411_s8 + $0x20] sm:$0xff]  ;;  %v283_v28 = vld [vmem:[%s3411_s8 + $0x28] sm:$0xff]  ;;  %328 = vst.msk [vmem:[#allocation2 + $0x8] sm:$0xff] %vm326_vm0, %v279_v25  ;;  %2881 = vmatpush3.bf16.msra.mxu0 %v1083_v36  ;;  %2931 = vmatpush3.bf16.msra.mxu1 %v1083_v36  ;;  %v3034_v8 = vpack.i.bf16 %v3664_v24, %v3662_v23 }
  0x3f   : > { %3030 = vrot.lane.b32.xlu1 %v3642_v11, %s3339_s10  ;;  %v508_v32 = vld [vmem:[#allocation2 + $0x200] sm:$0xff]  ;;  %331 = vst.msk [vmem:[#allocation2 + $0x20] sm:$0xff] %vm326_vm0, %v282_v26  ;;  %332 = vst.msk [vmem:[#allocation2 + $0x28] sm:$0xff] %vm326_vm0, %v283_v28  ;;  %v284_v37 = vld [vmem:[%s3411_s8 + $0x30] sm:$0xff] }
  0x40   : > { %3015 = vrot.lane.b32.xlu0 %v3640_v10, %s3338_s9  ;;  %v285_v51 = vld [vmem:[%s3411_s8 + $0x38] sm:$0xff]  ;;  %v509_v52 = vld [vmem:[#allocation2 + $0x208] sm:$0xff]  ;;  %333 = vst.msk [vmem:[#allocation2 + $0x30] sm:$0xff] %vm326_vm0, %v284_v37  ;;  %v286_v59 = vld [vmem:[%s3411_s8 + $0x40] sm:$0xff] }
  0x41   : > { %334 = vst.msk [vmem:[#allocation2 + $0x38] sm:$0xff] %vm326_vm0, %v285_v51  ;;  %v287_v0 = vld [vmem:[%s3411_s8 + $0x48] sm:$0xff]  ;;  %335 = vst.msk [vmem:[#allocation2 + $0x40] sm:$0xff] %vm326_vm0, %v286_v59  ;;  %v288_v4 = vld [vmem:[%s3411_s8 + $0x50] sm:$0xff]  ;;  %v3049_v9 = vpack.i.bf16 %v509_v52, %v508_v32 }
  0x42   : > { %336 = vst.msk [vmem:[#allocation2 + $0x48] sm:$0xff] %vm326_vm0, %v287_v0  ;;  %v289_v5 = vld [vmem:[%s3411_s8 + $0x58] sm:$0xff]  ;;  %337 = vst.msk [vmem:[#allocation2 + $0x50] sm:$0xff] %vm326_vm0, %v288_v4  ;;  %v290_v7 = vld [vmem:[%s3411_s8 + $0x60] sm:$0xff] }
  0x43   : > { %338 = vst.msk [vmem:[#allocation2 + $0x58] sm:$0xff] %vm326_vm0, %v289_v5  ;;  %3040 = vrot.lane.b32.xlu1 %v3676_v31, %s3339_s10  ;;  %v291_v13 = vld [vmem:[%s3411_s8 + $0x68] sm:$0xff]  ;;  %339 = vst.msk [vmem:[#allocation2 + $0x60] sm:$0xff] %vm326_vm0, %v290_v7  ;;  %v3704_v14 = vld [vmem:[#allocation2 + $0x210] sm:$0xff] }
  0x44   : > { %3025 = vrot.lane.b32.xlu0 %v3024_v30, %s3339_s10  ;;  %v511_v16 = vld [vmem:[#allocation2 + $0x218] sm:$0xff]  ;;  %340 = vst.msk [vmem:[#allocation2 + $0x68] sm:$0xff] %vm326_vm0, %v291_v13  ;;  %v292_v19 = vld [vmem:[%s3411_s8 + $0x70] sm:$0xff]  ;;  %v496_v25 = vld [vmem:[#allocation2 + $0x1a0] sm:$0xff] }
  0x45   : > { %v293_v20 = vld [vmem:[%s3411_s8 + $0x78] sm:$0xff]  ;;  %341 = vst.msk [vmem:[#allocation2 + $0x70] sm:$0xff] %vm326_vm0, %v292_v19  ;;  %v3059_v22 = vpack.i.bf16 %v511_v16, %v3704_v14  ;;  %v497_v26 = vld [vmem:[#allocation2 + $0x1a8] sm:$0xff]  ;;  %v3717_v30 = vld [vmem:[#allocation2 + $0xe0] sm:$0xff] }
  0x46   : > { %342 = vst.msk [vmem:[#allocation2 + $0x78] sm:$0xff] %vm326_vm0, %v293_v20  ;;  %v3069_v28 = vpack.i.bf16 %v497_v26, %v496_v25  ;;  %v3719_v32 = vld [vmem:[#allocation2 + $0xe8] sm:$0xff]  ;;  %v498_v36 = vld [vmem:[#allocation2 + $0x1b0] sm:$0xff]  ;;  %v499_v37 = vld [vmem:[#allocation2 + $0x1b8] sm:$0xff] }
  0x47   : > { %3050 = vrot.lane.b32.xlu1 %v3049_v9, %s3338_s9  ;;  %v3064_v51 = vpack.i.bf16 %v3719_v32, %v3717_v30  ;;  %v3079_v52 = vpack.i.bf16 %v499_v37, %v498_v36  ;;  %v3726_v59 = vld [vmem:[#allocation2 + $0xf0] sm:$0xff]  ;;  %v512_v0 = vld [vmem:[#allocation2 + $0x220] sm:$0xff]  ;;  %v513_v4 = vld [vmem:[#allocation2 + $0x228] sm:$0xff] }
  0x48   : > { %3035 = vrot.lane.b32.xlu0 %v3034_v8, %s3339_s10  ;;  %v514_v7 = vld [vmem:[#allocation2 + $0x230] sm:$0xff]  ;;  %v515_v8 = vld [vmem:[#allocation2 + $0x238] sm:$0xff]  ;;  %v516_v13 = vld [vmem:[#allocation2 + $0x240] sm:$0xff] }
  0x49   : > { %v3099_v9 = vpack.i.bf16 %v515_v8, %v514_v7  ;;  %v517_v16 = vld [vmem:[#allocation2 + $0x248] sm:$0xff]  ;;  %v518_v20 = vld [vmem:[#allocation2 + $0x250] sm:$0xff]  ;;  %v444_v7 = vld [vmem:[#allocation2] sm:$0xff] }
  0x4a   : > { %v3129_v19 = vpack.i.bf16 %v517_v16, %v516_v13  ;;  %v445_v8 = vld [vmem:[#allocation2 + $0x8] sm:$0xff] }
  0x4b   : > { %3060 = vrot.lane.b32.xlu1 %v3059_v22, %s3338_s9  ;;  %v519_v22 = vld [vmem:[#allocation2 + $0x258] sm:$0xff] }
  0x4c   : > { %3045 = vrot.lane.b32.xlu0 %v3487_v45, %s3338_s9  ;;  %v3728_v45 = vld [vmem:[#allocation2 + $0xf8] sm:$0xff] }
  0x4d   : > { %v3074_v5 = vpack.i.bf16 %v3728_v45, %v3726_v59 }
  0x4f   : > { %3070 = vrot.lane.b32.xlu1 %v3069_v28, %s3339_s10 }
  0x50   : > { %3055 = vrot.lane.b32.xlu0 %v3512_v54, %s3338_s9  ;;  %v3089_v54 = vpack.i.bf16 %v513_v4, %v512_v0 }
  0x53   : > { %3080 = vrot.lane.b32.xlu1 %v3079_v52, %s3339_s10 }
  0x54   : > { %3065 = vrot.lane.b32.xlu0 %v3064_v51, %s3339_s10 }
  0x57   : > { %3090 = vrot.lane.b32.xlu1 %v3089_v54, %s3338_s9  ;;  %v446_v54 = vld [vmem:[#allocation2 + $0x10] sm:$0xff] }
  0x58   : > { %3075 = vrot.lane.b32.xlu0 %v3074_v5, %s3339_s10 }
  0x5b   : > { %3100 = vrot.lane.b32.xlu1 %v3099_v9, %s3338_s9 }
  0x5c   : > { %3085 = vrot.lane.b32.xlu0 %v3542_v2, %s3338_s9  ;;  %v3139_v2 = vpack.i.bf16 %v519_v22, %v518_v20 }
  0x5f   : > { %3110 = vrot.lane.b32.xlu1 %v3446_v27, %s3339_s10  ;;  %v520_v27 = vld [vmem:[#allocation2 + $0x260] sm:$0xff] }
  0x60   : > { %3095 = vrot.lane.b32.xlu0 %v3573_v17, %s3338_s9  ;;  %v523_v17 = vld [vmem:[#allocation2 + $0x278] sm:$0xff] }
  0x63   : > { %3120 = vrot.lane.b32.xlu1 %v3457_v34, %s3339_s10  ;;  %v521_v34 = vld [vmem:[#allocation2 + $0x268] sm:$0xff] }
  0x64   : > { %3105 = vrot.lane.b32.xlu0 %v3508_v53, %s3339_s10  ;;  %v3169_v53 = vpack.i.bf16 %v521_v34, %v520_v27 }
  0x67   : > { %3130 = vrot.lane.b32.xlu1 %v3129_v19, %s3338_s9 }
  0x68   : > { %3115 = vrot.lane.b32.xlu0 %v3538_v1, %s3339_s10  ;;  %v522_v1 = vld [vmem:[#allocation2 + $0x270] sm:$0xff] }
  0x6b   : > { %3140 = vrot.lane.b32.xlu1 %v3139_v2, %s3338_s9  ;;  %v447_v2 = vld [vmem:[#allocation2 + $0x18] sm:$0xff] }
  0x6c   : > { %3125 = vrot.lane.b32.xlu0 %v3642_v11, %s3338_s9  ;;  %v3179_v11 = vpack.i.bf16 %v523_v17, %v522_v1 }
  0x6f   : > { %3150 = vrot.lane.b32.xlu1 %v3600_v29, %s3339_s10 }
  0x70   : > { %3135 = vrot.lane.b32.xlu0 %v3676_v31, %s3338_s9 }
  0x73   : > { %3160 = vrot.lane.b32.xlu1 %v3620_v46, %s3339_s10 }
  0x74   : > { %3145 = vrot.lane.b32.xlu0 %v3618_v41, %s3339_s10 }
  0x77   : > { %3170 = vrot.lane.b32.xlu1 %v3169_v53, %s3338_s9 }
  0x78   : > { %3155 = vrot.lane.b32.xlu0 %v3640_v10, %s3339_s10 }
  0x7b   : > { %3180 = vrot.lane.b32.xlu1 %v3179_v11, %s3338_s9 }
  0x7c   : > { %3165 = vrot.lane.b32.xlu0 %v3069_v28, %s3338_s9 }
  0x80   : > { %3175 = vrot.lane.b32.xlu0 %v3079_v52, %s3338_s9 }
  0x91   : > { %v2946_v29 = vpop.permute.xlu1 %2945 }
  0x92   : > { %v2948_v26 = vunpack.i.h.bf16 %v2946_v29  ;;  %v2947_v51 = vunpack.i.l.bf16 %v2946_v29 }
  0x95   : > { %v2951_v31 = vpop.permute.xlu1 %2950 }
  0x96   : > { %v2956_v41 = vpop.permute.xlu0 %2955  ;;  %v2953_v5 = vunpack.i.h.bf16 %v2951_v31  ;;  %v2952_v9 = vunpack.i.l.bf16 %v2951_v31 }
  0x97   : > { %v2958_v10 = vunpack.i.h.bf16 %v2956_v41  ;;  %v2957_v0 = vunpack.i.l.bf16 %v2956_v41 }
  0x99   : > { %v2966_v46 = vpop.permute.xlu1 %2965  ;;  %v877_v11 = vsel %vm326_vm0, %v445_v8, %v2958_v10 }
  0x9a   : > { %v2961_v25 = vpop.permute.xlu0 %2960  ;;  %v2967_v4 = vunpack.i.l.bf16 %v2966_v46  ;;  %v2968_v13 = vunpack.i.h.bf16 %v2966_v46 }
  0x9b   : > { %v2963_v36 = vunpack.i.h.bf16 %v2961_v25  ;;  %v2962_v37 = vunpack.i.l.bf16 %v2961_v25 }
  0x9c   : > { %v879_v46 = vsel %vm326_vm0, %v447_v2, %v2968_v13 }
  0x9d   : > { %v900_v28 = vsel %vm326_vm0, %v3644_v12, %v2962_v37  ;;  %v901_v52 = vsel %vm326_vm0, %v3650_v15, %v2963_v36  ;;  %v2971_v19 = vpop.permute.xlu1 %2970  ;;  %v878_v12 = vsel %vm326_vm0, %v446_v54, %v2967_v4  ;;  %v876_v15 = vsel %vm326_vm0, %v444_v7, %v2957_v0 }
  0x9e   : > { %v2976_v16 = vpop.permute.xlu0 %2975  ;;  %v949_v20 = vsel %vm924_vm2, %v900_v28, %v2947_v51  ;;  %v950_v22 = vsel %vm924_vm2, %v901_v52, %v2948_v26  ;;  %v2973_v53 = vunpack.i.h.bf16 %v2971_v19  ;;  %v2972_v1 = vunpack.i.l.bf16 %v2971_v19 }
  0x9f   : > { %v2978_v27 = vunpack.i.h.bf16 %v2976_v16  ;;  %v2977_v34 = vunpack.i.l.bf16 %v2976_v16  ;;  %v985_v17 = vpack.c.bf16 %v950_v22, %v949_v20  ;;  %v448_v20 = vld [vmem:[#allocation2 + $0x20] sm:$0xff]  ;;  %v449_v22 = vld [vmem:[#allocation2 + $0x28] sm:$0xff] }
  0xa0   : > { %v903_v29 = vsel %vm326_vm0, %v3664_v24, %v2973_v53  ;;  %v902_v41 = vsel %vm326_vm0, %v3662_v23, %v2972_v1 }
  0xa1   : > { %v925_v31 = vsel %vm924_vm2, %v876_v15, %v2977_v34  ;;  %v926_v25 = vsel %vm924_vm2, %v877_v11, %v2978_v27  ;;  %2906 = vmatprep.mubr.msk.bf16.mxu1 %vm1008_vm3, %v985_v17  ;;  %v2991_v37 = vpop.permute.xlu1 %2990  ;;  %v951_v51 = vsel %vm924_vm2, %v902_v41, %v2952_v9  ;;  %v952_v10 = vsel %vm924_vm2, %v903_v29, %v2953_v5 }
  0xa2   : > { %v2981_v26 = vpop.permute.xlu0 %2980  ;;  %v973_v36 = vpack.c.bf16 %v926_v25, %v925_v31  ;;  %v986_v23 = vpack.c.bf16 %v952_v10, %v951_v51  ;;  %v2993_v8 = vunpack.i.h.bf16 %v2991_v37  ;;  %v2992_v13 = vunpack.i.l.bf16 %v2991_v37 }
  0xa3   : > { %v2983_v0 = vunpack.i.h.bf16 %v2981_v26  ;;  %v2982_v24 = vunpack.i.l.bf16 %v2981_v26 }
  0xa4   : > { %2882 = vmatprep.mubr.msk.bf16.mxu0 %vm1008_vm3, %v973_v36  ;;  %2907 = vmatmul.mubr.msk.bf16.vlgmr.msra.gmra.mxu1 %vm1008_vm3, %v986_v23  ;;  %v905_v34 = vsel %vm326_vm0, %v3719_v32, %v2993_v8  ;;  %v904_v53 = vsel %vm326_vm0, %v3717_v30, %v2992_v13 }
  0xa5   : > { %v927_v4 = vsel %vm924_vm2, %v878_v12, %v2982_v24  ;;  %v928_v54 = vsel %vm924_vm2, %v879_v46, %v2983_v0  ;;  %v3001_v7 = vpop.permute.xlu1 %3000  ;;  %v450_v0 = vld [vmem:[#allocation2 + $0x30] sm:$0xff]  ;;  %v451_v24 = vld [vmem:[#allocation2 + $0x38] sm:$0xff] }
  0xa6   : > { %v2986_v28 = vpop.permute.xlu0 %2985  ;;  %v974_v52 = vpack.c.bf16 %v928_v54, %v927_v4  ;;  %v3003_v1 = vunpack.i.h.bf16 %v3001_v7  ;;  %v3002_v12 = vunpack.i.l.bf16 %v3001_v7 }
  0xa7   : > { %v2988_v9 = vunpack.i.h.bf16 %v2986_v28  ;;  %v2987_v5 = vunpack.i.l.bf16 %v2986_v28 }
  0xa8   : > { %2883 = vmatmul.mubr.msk.bf16.vlgmr.msra.gmra.mxu0 %vm1008_vm3, %v974_v52  ;;  %v907_v30 = vsel %vm326_vm0, %v3728_v45, %v3003_v1  ;;  %v906_v37 = vsel %vm326_vm0, %v3726_v59, %v3002_v12 }
  0xa9   : > { %v3011_v19 = vpop.permute.xlu1 %3010  ;;  %v880_v11 = vsel %vm326_vm0, %v448_v20, %v2987_v5  ;;  %v881_v29 = vsel %vm326_vm0, %v449_v22, %v2988_v9 }
  0xaa   : > { %v2996_v16 = vpop.permute.xlu0 %2995  ;;  %v3013_v2 = vunpack.i.h.bf16 %v3011_v19  ;;  %v3012_v27 = vunpack.i.l.bf16 %v3011_v19 }
  0xab   : > { %v2998_v51 = vunpack.i.h.bf16 %v2996_v16  ;;  %v2997_v10 = vunpack.i.l.bf16 %v2996_v16 }
  0xac   : > { %v953_v17 = vsel %vm924_vm2, %v904_v53, %v3012_v27  ;;  %v954_v15 = vsel %vm924_vm2, %v905_v34, %v3013_v2 }
  0xad   : > { %v3021_v31 = vpop.permute.xlu1 %3020  ;;  %v987_v25 = vpack.c.bf16 %v954_v15, %v953_v17  ;;  %v882_v9 = vsel %vm326_vm0, %v450_v0, %v2997_v10  ;;  %v883_v5 = vsel %vm326_vm0, %v451_v24, %v2998_v51  ;;  %v452_v15 = vld [vmem:[#allocation2 + $0x40] sm:$0xff] }
  0xae   : > { %v3006_v41 = vpop.permute.xlu0 %3005  ;;  %v3023_v36 = vunpack.i.h.bf16 %v3021_v31  ;;  %v3022_v32 = vunpack.i.l.bf16 %v3021_v31 }
  0xaf   : > { %v3008_v46 = vunpack.i.h.bf16 %v3006_v41  ;;  %v3007_v26 = vunpack.i.l.bf16 %v3006_v41  ;;  %2910 = vmatprep.mubr.msk.bf16.mxu1 %vm1008_vm3, %v987_v25 }
  0xb0   : > { %v955_v54 = vsel %vm924_vm2, %v906_v37, %v3022_v32  ;;  %v956_v28 = vsel %vm924_vm2, %v907_v30, %v3023_v36 }
  0xb1   : > { %v929_v23 = vsel %vm924_vm2, %v880_v11, %v3007_v26  ;;  %v930_v4 = vsel %vm924_vm2, %v881_v29, %v3008_v46  ;;  %v3031_v45 = vpop.permute.xlu1 %3030  ;;  %v988_v8 = vpack.c.bf16 %v956_v28, %v955_v54  ;;  %v453_v11 = vld [vmem:[#allocation2 + $0x48] sm:$0xff] }
  0xb2   : > { %v3016_v52 = vpop.permute.xlu0 %3015  ;;  %v975_v7 = vpack.c.bf16 %v930_v4, %v929_v23  ;;  %v3033_v27 = vunpack.i.h.bf16 %v3031_v45  ;;  %v3032_v34 = vunpack.i.l.bf16 %v3031_v45  ;;  %v455_v45 = vld [vmem:[#allocation2 + $0x58] sm:$0xff] }
  0xb3   : > { %v3018_v13 = vunpack.i.h.bf16 %v3016_v52  ;;  %v3017_v59 = vunpack.i.l.bf16 %v3016_v52  ;;  %2911 = vmatmul.mubr.msk.bf16.gmra.mxu1 %vm1008_vm3, %v988_v8 }
  0xb4   : > { %2886 = vmatprep.mubr.msk.bf16.mxu0 %vm1008_vm3, %v975_v7  ;;  %v909_v31 = vsel %vm326_vm0, %v3493_v48, %v3033_v27  ;;  %v908_v25 = vsel %vm326_vm0, %v3491_v47, %v3032_v34  ;;  %v454_v7 = vld [vmem:[#allocation2 + $0x50] sm:$0xff] }
  0xb5   : > { %v931_v16 = vsel %vm924_vm2, %v882_v9, %v3017_v59  ;;  %v932_v19 = vsel %vm924_vm2, %v883_v5, %v3018_v13  ;;  %v3041_v2 = vpop.permute.xlu1 %3040 }
  0xb6   : > { %v3026_v20 = vpop.permute.xlu0 %3025  ;;  %v976_v22 = vpack.c.bf16 %v932_v19, %v931_v16  ;;  %v3043_v46 = vunpack.i.h.bf16 %v3041_v2  ;;  %v3042_v26 = vunpack.i.l.bf16 %v3041_v2 }
  0xb7   : > { %v3028_v53 = vunpack.i.h.bf16 %v3026_v20  ;;  %v3027_v1 = vunpack.i.l.bf16 %v3026_v20 }
  0xb8   : > { %2887 = vmatmul.mubr.msk.bf16.gmra.mxu0 %vm1008_vm3, %v976_v22  ;;  %v911_v47 = vsel %vm326_vm0, %v3516_v56, %v3043_v46  ;;  %v910_v54 = vsel %vm326_vm0, %v3514_v55, %v3042_v26  ;;  %v457_v46 = vld [vmem:[#allocation2 + $0x68] sm:$0xff] }
  0xb9   : > { %v3051_v17 = vpop.permute.xlu1 %3050  ;;  %v884_v30 = vsel %vm326_vm0, %v452_v15, %v3027_v1  ;;  %v885_v37 = vsel %vm326_vm0, %v453_v11, %v3028_v53 }
  0xba   : > { %v3036_v12 = vpop.permute.xlu0 %3035  ;;  %v3053_v29 = vunpack.i.h.bf16 %v3051_v17  ;;  %v3052_v41 = vunpack.i.l.bf16 %v3051_v17 }
  0xbb   : > { %v3038_v28 = vunpack.i.h.bf16 %v3036_v12  ;;  %v3037_v52 = vunpack.i.l.bf16 %v3036_v12 }
  0xbc   : > { %v957_v36 = vsel %vm924_vm2, %v908_v25, %v3052_v41  ;;  %v958_v32 = vsel %vm924_vm2, %v909_v31, %v3053_v29  ;;  %v456_v25 = vld [vmem:[#allocation2 + $0x60] sm:$0xff] }
  0xbd   : > { %v3061_v10 = vpop.permute.xlu1 %3060  ;;  %v989_v0 = vpack.c.bf16 %v958_v32, %v957_v36  ;;  %v886_v22 = vsel %vm326_vm0, %v454_v7, %v3037_v52  ;;  %v887_v2 = vsel %vm326_vm0, %v455_v45, %v3038_v28 }
  0xbe   : > { %v3046_v51 = vpop.permute.xlu0 %3045  ;;  %v3063_v4 = vunpack.i.h.bf16 %v3061_v10  ;;  %v3062_v48 = vunpack.i.l.bf16 %v3061_v10 }
  0xbf   : > { %v3048_v24 = vunpack.i.h.bf16 %v3046_v51  ;;  %v3047_v23 = vunpack.i.l.bf16 %v3046_v51  ;;  %2914 = vmatprep.mubr.msk.bf16.mxu1 %vm1008_vm3, %v989_v0 }
  0xc0   : > { %v959_v59 = vsel %vm924_vm2, %v910_v54, %v3062_v48  ;;  %v960_v9 = vsel %vm924_vm2, %v911_v47, %v3063_v4 }
  0xc1   : > { %v933_v8 = vsel %vm924_vm2, %v884_v30, %v3047_v23  ;;  %v934_v13 = vsel %vm924_vm2, %v885_v37, %v3048_v24  ;;  %v3071_v56 = vpop.permute.xlu1 %3070  ;;  %v990_v19 = vpack.c.bf16 %v960_v9, %v959_v59  ;;  %v459_v59 = vld [vmem:[#allocation2 + $0x78] sm:$0xff] }
  0xc2   : > { %v3056_v5 = vpop.permute.xlu0 %3055  ;;  %v977_v16 = vpack.c.bf16 %v934_v13, %v933_v8  ;;  %v3073_v17 = vunpack.i.h.bf16 %v3071_v56  ;;  %v3072_v15 = vunpack.i.l.bf16 %v3071_v56  ;;  %v458_v13 = vld [vmem:[#allocation2 + $0x70] sm:$0xff] }
  0xc3   : > { %v3058_v20 = vunpack.i.h.bf16 %v3056_v5  ;;  %v3057_v55 = vunpack.i.l.bf16 %v3056_v5  ;;  %2915 = vmatmul.mubr.msk.bf16.gmra.mxu1 %vm1008_vm3, %v990_v19 }
  0xc4   : > { %2890 = vmatprep.mubr.msk.bf16.mxu0 %vm1008_vm3, %v977_v16  ;;  %v913_v32 = vsel %vm326_vm0, %v3606_v35, %v3073_v17  ;;  %v912_v30 = vsel %vm326_vm0, %v3604_v33, %v3072_v15 }
  0xc5   : > { %v935_v27 = vsel %vm924_vm2, %v886_v22, %v3057_v55  ;;  %v936_v34 = vsel %vm924_vm2, %v887_v2, %v3058_v20  ;;  %v3081_v12 = vpop.permute.xlu1 %3080 }
  0xc6   : > { %v3066_v53 = vpop.permute.xlu0 %3065  ;;  %v978_v1 = vpack.c.bf16 %v936_v34, %v935_v27  ;;  %v3083_v37 = vunpack.i.h.bf16 %v3081_v12  ;;  %v3082_v51 = vunpack.i.l.bf16 %v3081_v12 }
  0xc7   : > { %v3068_v11 = vunpack.i.h.bf16 %v3066_v53  ;;  %v3067_v29 = vunpack.i.l.bf16 %v3066_v53 }
  0xc8   : > { %2891 = vmatmul.mubr.msk.bf16.gmra.mxu0 %vm1008_vm3, %v978_v1  ;;  %v915_v33 = vsel %vm326_vm0, %v3625_v63, %v3083_v37  ;;  %v914_v7 = vsel %vm326_vm0, %v3623_v60, %v3082_v51 }
  0xc9   : > { %v3091_v31 = vpop.permute.xlu1 %3090  ;;  %v888_v24 = vsel %vm326_vm0, %v456_v25, %v3067_v29  ;;  %v889_v23 = vsel %vm326_vm0, %v457_v46, %v3068_v11 }
  0xca   : > { %v3076_v41 = vpop.permute.xlu0 %3075  ;;  %v3093_v26 = vunpack.i.h.bf16 %v3091_v31  ;;  %v3092_v36 = vunpack.i.l.bf16 %v3091_v31 }
  0xcb   : > { %v3078_v45 = vunpack.i.h.bf16 %v3076_v41  ;;  %v3077_v8 = vunpack.i.l.bf16 %v3076_v41 }
  0xcc   : > { %v961_v10 = vsel %vm924_vm2, %v912_v30, %v3092_v36  ;;  %v962_v0 = vsel %vm924_vm2, %v913_v32, %v3093_v26 }
  0xcd   : > { %v3101_v48 = vpop.permute.xlu1 %3100  ;;  %v991_v47 = vpack.c.bf16 %v962_v0, %v961_v10  ;;  %v890_v2 = vsel %vm326_vm0, %v458_v13, %v3077_v8  ;;  %v891_v27 = vsel %vm326_vm0, %v459_v59, %v3078_v45 }
  0xce   : > { %v3086_v4 = vpop.permute.xlu0 %3085  ;;  %v3103_v52 = vunpack.i.h.bf16 %v3101_v48  ;;  %v3102_v35 = vunpack.i.l.bf16 %v3101_v48 }
  0xcf   : > { %v3088_v54 = vunpack.i.h.bf16 %v3086_v4  ;;  %v3087_v28 = vunpack.i.l.bf16 %v3086_v4  ;;  %2918 = vmatprep.mubr.msk.bf16.mxu1 %vm1008_vm3, %v991_v47 }
  0xd0   : > { %v963_v16 = vsel %vm924_vm2, %v914_v7, %v3102_v35  ;;  %v964_v56 = vsel %vm924_vm2, %v915_v33, %v3103_v52 }
  0xd1   : > { %v937_v9 = vsel %vm924_vm2, %v888_v24, %v3087_v28  ;;  %v938_v5 = vsel %vm924_vm2, %v889_v23, %v3088_v54  ;;  %v3111_v63 = vpop.permute.xlu1 %3110  ;;  %v992_v55 = vpack.c.bf16 %v964_v56, %v963_v16 }
  0xd2   : > { %v3096_v19 = vpop.permute.xlu0 %3095  ;;  %v979_v20 = vpack.c.bf16 %v938_v5, %v937_v9  ;;  %v3113_v15 = vunpack.i.h.bf16 %v3111_v63  ;;  %v3112_v11 = vunpack.i.l.bf16 %v3111_v63 }
  0xd3   : > { %v3098_v22 = vunpack.i.h.bf16 %v3096_v19  ;;  %v3097_v60 = vunpack.i.l.bf16 %v3096_v19  ;;  %2919 = vmatmul.mubr.msk.bf16.gmra.mxu1 %vm1008_vm3, %v992_v55 }
  0xd4   : > { %2894 = vmatprep.mubr.msk.bf16.mxu0 %vm1008_vm3, %v979_v20  ;;  %v917_v36 = vsel %vm326_vm0, %v3476_v42, %v3113_v15  ;;  %v916_v32 = vsel %vm326_vm0, %v3469_v40, %v3112_v11 }
  0xd5   : > { %v939_v34 = vsel %vm924_vm2, %v890_v2, %v3097_v60  ;;  %v940_v53 = vsel %vm924_vm2, %v891_v27, %v3098_v22  ;;  %v3121_v17 = vpop.permute.xlu1 %3120 }
  0xd6   : > { %v3106_v1 = vpop.permute.xlu0 %3105  ;;  %v980_v12 = vpack.c.bf16 %v940_v53, %v939_v34  ;;  %v3123_v30 = vunpack.i.h.bf16 %v3121_v17  ;;  %v3122_v37 = vunpack.i.l.bf16 %v3121_v17 }
  0xd7   : > { %v3108_v29 = vunpack.i.h.bf16 %v3106_v1  ;;  %v3107_v41 = vunpack.i.l.bf16 %v3106_v1 }
  0xd8   : > { %2895 = vmatmul.mubr.msk.bf16.gmra.mxu0 %vm1008_vm3, %v980_v12  ;;  %v919_v40 = vsel %vm326_vm0, %v3497_v50, %v3123_v30  ;;  %v918_v52 = vsel %vm326_vm0, %v3495_v49, %v3122_v37 }
  0xd9   : > { %v3131_v25 = vpop.permute.xlu1 %3130  ;;  %v893_v0 = vsel %vm326_vm0, %v3467_v39, %v3108_v29  ;;  %v892_v24 = vsel %vm326_vm0, %v3465_v38, %v3107_v41 }
  0xda   : > { %v3116_v31 = vpop.permute.xlu0 %3115  ;;  %v3133_v46 = vunpack.i.h.bf16 %v3131_v25  ;;  %v3132_v26 = vunpack.i.l.bf16 %v3131_v25 }
  0xdb   : > { %v3118_v35 = vunpack.i.h.bf16 %v3116_v31  ;;  %v3117_v33 = vunpack.i.l.bf16 %v3116_v31 }
  0xdc   : > { %v965_v51 = vsel %vm924_vm2, %v916_v32, %v3132_v26  ;;  %v966_v10 = vsel %vm924_vm2, %v917_v36, %v3133_v46 }
  0xdd   : > { %v3141_v4 = vpop.permute.xlu1 %3140  ;;  %v993_v48 = vpack.c.bf16 %v966_v10, %v965_v51  ;;  %v895_v49 = vsel %vm326_vm0, %v3480_v44, %v3118_v35  ;;  %v894_v16 = vsel %vm326_vm0, %v3478_v43, %v3117_v33 }
  0xde   : > { %v3126_v23 = vpop.permute.xlu0 %3125  ;;  %v3143_v54 = vunpack.i.h.bf16 %v3141_v4  ;;  %v3142_v28 = vunpack.i.l.bf16 %v3141_v4 }
  0xdf   : > { %v3128_v47 = vunpack.i.h.bf16 %v3126_v23  ;;  %v3127_v42 = vunpack.i.l.bf16 %v3126_v23  ;;  %2922 = vmatprep.mubr.msk.bf16.mxu1 %vm1008_vm3, %v993_v48 }
  0xe0   : > { %v967_v7 = vsel %vm924_vm2, %v918_v52, %v3142_v28  ;;  %v968_v45 = vsel %vm924_vm2, %v919_v40, %v3143_v54  ;;  %v3922_v52 = vld [vmem:[%s4732_s3] ss:$0 sm:$0xff] }
  0xe1   : > { %v941_v39 = vsel %vm924_vm2, %v892_v24, %v3127_v42  ;;  %v942_v38 = vsel %vm924_vm2, %v893_v0, %v3128_v47  ;;  %v3151_v59 = vpop.permute.xlu1 %3150  ;;  %v994_v9 = vpack.c.bf16 %v968_v45, %v967_v7 }
  0xe2   : > { %v3136_v8 = vpop.permute.xlu0 %3135  ;;  %v981_v13 = vpack.c.bf16 %v942_v38, %v941_v39  ;;  %v3153_v22 = vunpack.i.h.bf16 %v3151_v59  ;;  %v3152_v60 = vunpack.i.l.bf16 %v3151_v59 }
  0xe3   : > { %v3138_v50 = vunpack.i.h.bf16 %v3136_v8  ;;  %v3137_v5 = vunpack.i.l.bf16 %v3136_v8  ;;  %2923 = vmatmul.mubr.msk.bf16.gmra.mxu1 %vm1008_vm3, %v994_v9 }
  0xe4   : > { %2898 = vmatprep.mubr.msk.bf16.mxu0 %vm1008_vm3, %v981_v13  ;;  %v921_v1 = vsel %vm326_vm0, %v3520_v58, %v3153_v22  ;;  %v920_v12 = vsel %vm326_vm0, %v3518_v57, %v3152_v60  ;;  %v3283_v22 = vld [vmem:[#allocation2 + $0x1c0] sm:$0xff] }
  0xe5   : > { %v943_v56 = vsel %vm924_vm2, %v894_v16, %v3137_v5  ;;  %v944_v19 = vsel %vm924_vm2, %v895_v49, %v3138_v50  ;;  %v3161_v55 = vpop.permute.xlu1 %3160  ;;  %v3281_v50 = vld [vmem:[#allocation2 + $0x1d0] sm:$0xff] }
  0xe6   : > { %v3146_v20 = vpop.permute.xlu0 %3145  ;;  %v982_v63 = vpack.c.bf16 %v944_v19, %v943_v56  ;;  %v3163_v17 = vunpack.i.h.bf16 %v3161_v55  ;;  %v3162_v15 = vunpack.i.l.bf16 %v3161_v55 }
  0xe7   : > { %v3148_v2 = vunpack.i.h.bf16 %v3146_v20  ;;  %v3147_v44 = vunpack.i.l.bf16 %v3146_v20 }
  0xe8   : > { %2899 = vmatmul.mubr.msk.bf16.gmra.mxu0 %vm1008_vm3, %v982_v63  ;;  %v923_v57 = vsel %vm326_vm0, %v3550_v6, %v3163_v17  ;;  %v922_v37 = vsel %vm326_vm0, %v3544_v3, %v3162_v15  ;;  %v3282_v63 = vld [vmem:[#allocation2 + $0x110] sm:$0xff]  ;;  %v3285_v15 = vld [vmem:[#allocation2 + $0x108] sm:$0xff] }
  0xe9   : > { %v3171_v34 = vpop.permute.xlu1 %3170  ;;  %v897_v41 = vsel %vm326_vm0, %v3527_v62, %v3148_v2  ;;  %v896_v31 = vsel %vm326_vm0, %v3525_v61, %v3147_v44 }
  0xea   : > { %v3156_v27 = vpop.permute.xlu0 %3155  ;;  %v3173_v43 = vunpack.i.h.bf16 %v3171_v34  ;;  %v3172_v53 = vunpack.i.l.bf16 %v3171_v34 }
  0xeb   : > { %v3158_v51 = vunpack.i.h.bf16 %v3156_v27  ;;  %v3157_v10 = vunpack.i.l.bf16 %v3156_v27 }
  0xec   : > { %v969_v11 = vsel %vm924_vm2, %v920_v12, %v3172_v53  ;;  %v970_v29 = vsel %vm924_vm2, %v921_v1, %v3173_v43  ;;  %v3284_v43 = vld [vmem:[#allocation2 + $0x100] sm:$0xff] }
  0xed   : > { %v995_v25 = vpack.c.bf16 %v970_v29, %v969_v11  ;;  %v3181_v26 = vpop.permute.xlu1 %3180  ;;  %v899_v3 = vsel %vm326_vm0, %v3582_v21, %v3158_v51  ;;  %v898_v42 = vsel %vm326_vm0, %v3575_v18, %v3157_v10  ;;  %v3287_v51 = vld [vmem:[#allocation2 + $0x1d8] sm:$0xff] }
  0xee   : > { %v3166_v46 = vpop.permute.xlu0 %3165  ;;  %v3183_v32 = vunpack.i.h.bf16 %v3181_v26  ;;  %v3182_v30 = vunpack.i.l.bf16 %v3181_v26 }
  0xef   : > { %v3168_v36 = vunpack.i.h.bf16 %v3166_v46  ;;  %v3167_v58 = vunpack.i.l.bf16 %v3166_v46  ;;  %2926 = vmatprep.mubr.msk.bf16.mxu1 %vm1008_vm3, %v995_v25  ;;  %v3286_v46 = vld [vmem:[#allocation2 + $0x118] sm:$0xff] }
  0xf0   : > { %v971_v0 = vsel %vm924_vm2, %v922_v37, %v3182_v30  ;;  %v972_v24 = vsel %vm924_vm2, %v923_v57, %v3183_v32 }
  0xf1   : > { %v945_v62 = vsel %vm924_vm2, %v896_v31, %v3167_v58  ;;  %v946_v61 = vsel %vm924_vm2, %v897_v41, %v3168_v36  ;;  %v996_v23 = vpack.c.bf16 %v972_v24, %v971_v0 }
  0xf2   : > { %v3176_v4 = vpop.permute.xlu0 %3175  ;;  %v983_v48 = vpack.c.bf16 %v946_v61, %v945_v62 }
  0xf3   : > { %v3178_v47 = vunpack.i.h.bf16 %v3176_v4  ;;  %v3177_v6 = vunpack.i.l.bf16 %v3176_v4  ;;  %2927 = vmatmul.mubr.msk.bf16.gmra.mxu1 %vm1008_vm3, %v996_v23 }
  0xf4   : > { %2902 = vmatprep.mubr.msk.bf16.mxu0 %vm1008_vm3, %v983_v48 }
  0xf5   : > { %v947_v54 = vsel %vm924_vm2, %v898_v42, %v3177_v6  ;;  %v948_v28 = vsel %vm924_vm2, %v899_v3, %v3178_v47  ;;  %v3288_v3 = vld [vmem:[#allocation2 + $0x1c8] sm:$0xff] }
  0xf6   : > { %v984_v40 = vpack.c.bf16 %v948_v28, %v947_v54  ;;  %v3289_v28 = vld [vmem:[#allocation2 + $0x130] sm:$0xff] }
  0xf8   : > { %2903 = vmatmul.mubr.msk.bf16.gmra.mxu0 %vm1008_vm3, %v984_v40 }
 0x164   : > { %v2908_v21 = vpop.f32.mrf.mxu1 }
 0x165   : > { %v1224_v35 = vadd.f32 %v2908_v21, %v3922_v52 }
 0x166   : > { %v1215_v33 = vpop.f32.mrf.mxu1 }
 0x167   : > { %v1336_v38 = vmax.f32 %v1224_v35, 0.0  ;;  %v1216_v7 = vadd.f32 %v3922_v52, %v1215_v33 }
 0x168   : > { %v2884_v18 = vpop.f32.mrf.mxu0  ;;  %v2909_v56 = vpop.f32.mrf.mxu1 }
 0x169   : > { %v1128_v39 = vadd.f32 %v2884_v18, %v3922_v52  ;;  %v1334_v59 = vmax.f32 %v1216_v7, 0.0  ;;  %v3928_v5 = vadd.f32 %v3281_v50, %v1336_v38  ;;  %v1227_v27 = vadd.f32 %v2909_v56, %v3922_v52  ;;  %v3290_v38 = vld [vmem:[#allocation2 + $0x1f0] sm:$0xff] }
 0x16a   : > { %v1119_v45 = vpop.f32.mrf.mxu0  ;;  %v1218_v12 = vpop.f32.mrf.mxu1 }
 0x16b   : > { %v1312_v8 = vmax.f32 %v1128_v39, 0.0  ;;  %v1120_v13 = vadd.f32 %v3922_v52, %v1119_v45  ;;  %v1484_v20 = vsel %vm326_vm0, %v3928_v5, 0.0  ;;  %v3935_v60 = vadd.f32 %v3283_v22, %v1334_v59 }
 0x16c   : > { %v2885_v9 = vpop.f32.mrf.mxu0  ;;  %1485 = vadd.xlane.f32.xlu1 %v1484_v20  ;;  %v1337_v29 = vmax.f32 %v1227_v27, 0.0  ;;  %v1219_v41 = vadd.f32 %v3922_v52, %v1218_v12  ;;  %v3294_v12 = vld [vmem:[#allocation2 + $0x1e0] sm:$0xff] }
 0x16d   : > { %v1310_v49 = vmax.f32 %v1120_v13, 0.0  ;;  %v1131_v16 = vadd.f32 %v2885_v9, %v3922_v52  ;;  %v3933_v55 = vadd.f32 %v3282_v63, %v1312_v8  ;;  %v1478_v17 = vsel %vm326_vm0, %v3935_v60, 0.0  ;;  %v3291_v9 = vld [vmem:[#allocation2 + $0x138] sm:$0xff] }
 0x16e   : > { %v1122_v19 = vpop.f32.mrf.mxu0  ;;  %v1335_v30 = vmax.f32 %v1219_v41, 0.0  ;;  %v3957_v10 = vadd.f32 %v3287_v51, %v1337_v29 }
 0x16f   : > { %v1123_v2 = vadd.f32 %v3922_v52, %v1122_v19  ;;  %v1313_v44 = vmax.f32 %v1131_v16, 0.0  ;;  %v1412_v34 = vsel %vm326_vm0, %v3933_v55, 0.0  ;;  %v3941_v53 = vadd.f32 %v3284_v43, %v1310_v49  ;;  %v3292_v19 = vld [vmem:[#allocation2 + $0x120] sm:$0xff] }
 0x170   : > { %1413 = vadd.xlane.f32.xlu0 %v1412_v34  ;;  %1479 = vadd.xlane.f32.xlu1 %v1478_v17  ;;  %v1487_v6 = vsel %vm326_vm0, %v3957_v10, 0.0  ;;  %v3964_v42 = vadd.f32 %v3288_v3, %v1335_v30 }
 0x171   : > { %v1311_v1 = vmax.f32 %v1123_v2, 0.0  ;;  %v1406_v31 = vsel %vm326_vm0, %v3941_v53, 0.0  ;;  %v3950_v26 = vadd.f32 %v3286_v46, %v1313_v44  ;;  %v3293_v44 = vld [vmem:[#allocation2 + $0x1f8] sm:$0xff] }
 0x172   : > { %v1481_v13 = vsel %vm326_vm0, %v3964_v42, 0.0 }
 0x173   : > { %v3945_v11 = vadd.f32 %v3285_v15, %v1311_v1  ;;  %v2912_v25 = vpop.f32.mrf.mxu1  ;;  %v1415_v37 = vsel %vm326_vm0, %v3950_v26, 0.0 }
 0x174   : > { %1407 = vadd.xlane.f32.xlu0 %v1406_v31  ;;  %v1240_v32 = vadd.f32 %v2912_v25, %v3922_v52  ;;  %v3295_v31 = vld [vmem:[#allocation2 + $0x128] sm:$0xff] }
 0x175   : > { %v1409_v36 = vsel %vm326_vm0, %v3945_v11, 0.0  ;;  %v1231_v58 = vpop.f32.mrf.mxu1 }
 0x176   : > { %1410 = vadd.xlane.f32.xlu1 %v1409_v36  ;;  %v1340_v24 = vmax.f32 %v1240_v32, 0.0  ;;  %v1232_v21 = vadd.f32 %v3922_v52, %v1231_v58 }
 0x177   : > { %v2913_v61 = vpop.f32.mrf.mxu1 }
 0x178   : > { %v2888_v57 = vpop.f32.mrf.mxu0  ;;  %1416 = vadd.xlane.f32.xlu0 %v1415_v37  ;;  %v1243_v48 = vadd.f32 %v2913_v61, %v3922_v52  ;;  %v3972_v7 = vadd.f32 %v3290_v38, %v1340_v24  ;;  %v1338_v49 = vmax.f32 %v1232_v21, 0.0  ;;  %v3298_v38 = vld [vmem:[#allocation2 + $0x158] sm:$0xff] }
 0x179   : > { %v1144_v62 = vadd.f32 %v2888_v57, %v3922_v52  ;;  %v1234_v59 = vpop.f32.mrf.mxu1 }
 0x17a   : > { %v1135_v0 = vpop.f32.mrf.mxu0  ;;  %v1341_v45 = vmax.f32 %v1243_v48, 0.0  ;;  %v1496_v16 = vsel %vm326_vm0, %v3972_v7, 0.0  ;;  %v1235_v63 = vadd.f32 %v3922_v52, %v1234_v59  ;;  %v3991_v17 = vadd.f32 %v3294_v12, %v1338_v49  ;;  %v3299_v59 = vld [vmem:[#allocation2 + $0x140] sm:$0xff] }
 0x17b   : > { %v1316_v23 = vmax.f32 %v1144_v62, 0.0  ;;  %v1136_v4 = vadd.f32 %v3922_v52, %v1135_v0  ;;  %v3296_v0 = vld [vmem:[#allocation2 + $0x1e8] sm:$0xff] }
 0x17c   : > { %v2889_v47 = vpop.f32.mrf.mxu0  ;;  %1488 = vadd.xlane.f32.xlu0 %v1487_v6  ;;  %v3986_v27 = vadd.f32 %v3293_v44, %v1341_v45  ;;  %v1339_v15 = vmax.f32 %v1235_v63, 0.0  ;;  %v1490_v37 = vsel %vm326_vm0, %v3991_v17, 0.0 }
 0x17d   : > { %v1147_v54 = vadd.f32 %v2889_v47, %v3922_v52  ;;  %v3967_v40 = vadd.f32 %v3289_v28, %v1316_v23  ;;  %v1314_v18 = vmax.f32 %v1136_v4, 0.0  ;;  %v3297_v4 = vld [vmem:[#allocation2 + $0x150] sm:$0xff] }
 0x17e   : > { %v1138_v35 = vpop.f32.mrf.mxu0  ;;  %v1499_v41 = vsel %vm326_vm0, %v3986_v27, 0.0  ;;  %v4004_v24 = vadd.f32 %v3296_v0, %v1339_v15 }
 0x17f   : > { %v1317_v33 = vmax.f32 %v1147_v54, 0.0  ;;  %v1424_v39 = vsel %vm326_vm0, %v3967_v40, 0.0  ;;  %v1139_v8 = vadd.f32 %v3922_v52, %v1138_v35  ;;  %v3983_v20 = vadd.f32 %v3292_v19, %v1314_v18  ;;  %v3300_v19 = vld [vmem:[#allocation2 + $0x218] sm:$0xff] }
 0x180   : > { %1425 = vadd.xlane.f32.xlu1 %v1424_v39  ;;  %1482 = vadd.xlane.f32.xlu0 %v1481_v13 }
 0x181   : > { %v3977_v50 = vadd.f32 %v3291_v9, %v1317_v33  ;;  %v1315_v22 = vmax.f32 %v1139_v8, 0.0  ;;  %v1418_v1 = vsel %vm326_vm0, %v3983_v20, 0.0  ;;  %v1493_v33 = vsel %vm326_vm0, %v4004_v24, 0.0 }
 0x183   : > { %v1427_v56 = vsel %vm326_vm0, %v3977_v50, 0.0  ;;  %v2916_v2 = vpop.f32.mrf.mxu1  ;;  %v3995_v25 = vadd.f32 %v3295_v31, %v1315_v22 }
 0x184   : > { %1497 = vadd.xlane.f32.xlu1 %v1496_v16  ;;  %1428 = vadd.xlane.f32.xlu0 %v1427_v56  ;;  %v1256_v43 = vadd.f32 %v2916_v2, %v3922_v52 }
 0x185   : > { %v1247_v34 = vpop.f32.mrf.mxu1  ;;  %v1421_v61 = vsel %vm326_vm0, %v3995_v25, 0.0 }
 0x186   : > { %v1344_v32 = vmax.f32 %v1256_v43, 0.0  ;;  %v1248_v47 = vadd.f32 %v3922_v52, %v1247_v34  ;;  %v3301_v34 = vld [vmem:[#allocation2 + $0x200] sm:$0xff] }
 0x187   : > { %v2917_v36 = vpop.f32.mrf.mxu1 }
 0x188   : > { %v2892_v29 = vpop.f32.mrf.mxu0  ;;  %1419 = vadd.xlane.f32.xlu1 %v1418_v1  ;;  %1500 = vadd.xlane.f32.xlu0 %v1499_v41  ;;  %v1259_v51 = vadd.f32 %v2917_v36, %v3922_v52  ;;  %v4013_v21 = vadd.f32 %v1344_v32, %v3704_v14  ;;  %v1342_v8 = vmax.f32 %v1248_v47, 0.0 }
 0x189   : > { %v1160_v46 = vadd.f32 %v2892_v29, %v3922_v52  ;;  %v1250_v39 = vpop.f32.mrf.mxu1  ;;  %v3302_v29 = vld [vmem:[#allocation2 + $0x148] sm:$0xff] }
 0x18a   : > { %v1151_v58 = vpop.f32.mrf.mxu0  ;;  %v1345_v35 = vmax.f32 %v1259_v51, 0.0  ;;  %v1508_v13 = vsel %vm326_vm0, %v4013_v21, 0.0  ;;  %v1251_v49 = vadd.f32 %v3922_v52, %v1250_v39  ;;  %v4032_v43 = vadd.f32 %v3301_v34, %v1342_v8 }
 0x18b   : > { %v1320_v30 = vmax.f32 %v1160_v46, 0.0  ;;  %v1152_v57 = vadd.f32 %v3922_v52, %v1151_v58 }
 0x18c   : > { %v2893_v62 = vpop.f32.mrf.mxu0  ;;  %1491 = vadd.xlane.f32.xlu1 %v1490_v37  ;;  %1422 = vadd.xlane.f32.xlu0 %v1421_v61  ;;  %v4027_v63 = vadd.f32 %v3300_v19, %v1345_v35  ;;  %v1343_v1 = vmax.f32 %v1251_v49, 0.0  ;;  %v3303_v61 = vld [vmem:[#allocation2 + $0x208] sm:$0xff]  ;;  %v3307_v19 = vld [vmem:[#allocation2 + $0x160] sm:$0xff] }
 0x18d   : > { %v1163_v23 = vadd.f32 %v2893_v62, %v3922_v52  ;;  %v4007_v48 = vadd.f32 %v3297_v4, %v1320_v30  ;;  %v1318_v3 = vmax.f32 %v1152_v57, 0.0  ;;  %v1502_v57 = vsel %vm326_vm0, %v4032_v43, 0.0  ;;  %v3304_v4 = vld [vmem:[#allocation2 + $0x170] sm:$0xff] }
 0x18e   : > { %v1154_v6 = vpop.f32.mrf.mxu0  ;;  %v1511_v15 = vsel %vm326_vm0, %v4027_v63, 0.0  ;;  %v4045_v0 = vadd.f32 %v3303_v61, %v1343_v1  ;;  %v3308_v1 = vld [vmem:[#allocation2 + $0x238] sm:$0xff] }
 0x18f   : > { %v1321_v54 = vmax.f32 %v1163_v23, 0.0  ;;  %v1436_v28 = vsel %vm326_vm0, %v4007_v48, 0.0  ;;  %v1155_v18 = vadd.f32 %v3922_v52, %v1154_v6  ;;  %v4024_v9 = vadd.f32 %v3299_v59, %v1318_v3 }
 0x190   : > { %1437 = vadd.xlane.f32.xlu1 %v1436_v28  ;;  %1494 = vadd.xlane.f32.xlu0 %v1493_v33  ;;  %v1505_v8 = vsel %vm326_vm0, %v4045_v0, 0.0 }
 0x191   : > { %v4018_v45 = vadd.f32 %v3298_v38, %v1321_v54  ;;  %v1319_v16 = vmax.f32 %v1155_v18, 0.0  ;;  %v1430_v44 = vsel %vm326_vm0, %v4024_v9, 0.0  ;;  %v3305_v18 = vld [vmem:[#allocation2 + $0x230] sm:$0xff] }
 0x193   : > { %v1439_v14 = vsel %vm326_vm0, %v4018_v45, 0.0  ;;  %v2920_v56 = vpop.f32.mrf.mxu1  ;;  %v4036_v41 = vadd.f32 %v3302_v29, %v1319_v16 }
 0x194   : > { %1509 = vadd.xlane.f32.xlu1 %v1508_v13  ;;  %1440 = vadd.xlane.f32.xlu0 %v1439_v14  ;;  %v1272_v2 = vadd.f32 %v2920_v56, %v3922_v52  ;;  %v3306_v14 = vld [vmem:[#allocation2 + $0x178] sm:$0xff] }
 0x195   : > { %v1263_v22 = vpop.f32.mrf.mxu1  ;;  %v1433_v62 = vsel %vm326_vm0, %v4036_v41, 0.0 }
 0x196   : > { %v1348_v58 = vmax.f32 %v1272_v2, 0.0  ;;  %v1264_v6 = vadd.f32 %v3922_v52, %v1263_v22 }
 0x197   : > { %v2921_v46 = vpop.f32.mrf.mxu1 }
 0x198   : > { %v2896_v12 = vpop.f32.mrf.mxu0  ;;  %1431 = vadd.xlane.f32.xlu1 %v1430_v44  ;;  %1512 = vadd.xlane.f32.xlu0 %v1511_v15  ;;  %v1275_v37 = vadd.f32 %v2921_v46, %v3922_v52  ;;  %v4053_v33 = vadd.f32 %v3305_v18, %v1348_v58  ;;  %v1346_v49 = vmax.f32 %v1264_v6, 0.0  ;;  %v3309_v46 = vld [vmem:[#allocation2 + $0x220] sm:$0xff]  ;;  %v3311_v18 = vld [vmem:[#allocation2 + $0x228] sm:$0xff] }
 0x199   : > { %v1176_v31 = vadd.f32 %v2896_v12, %v3922_v52  ;;  %v1266_v13 = vpop.f32.mrf.mxu1 }
 0x19a   : > { %v1167_v36 = vpop.f32.mrf.mxu0  ;;  %v1349_v39 = vmax.f32 %v1275_v37, 0.0  ;;  %v1520_v16 = vsel %vm326_vm0, %v4053_v33, 0.0  ;;  %v1267_v2 = vadd.f32 %v3922_v52, %v1266_v13 }
 0x19b   : > { %v1324_v32 = vmax.f32 %v1176_v31, 0.0  ;;  %v1168_v30 = vadd.f32 %v3922_v52, %v1167_v36  ;;  %v4072_v36 = vadd.f32 %v3309_v46, %v1346_v49  ;;  %v3314_v46 = vld [vmem:[#allocation2 + $0x198] sm:$0xff] }
 0x19c   : > { %v2897_v51 = vpop.f32.mrf.mxu0  ;;  %1503 = vadd.xlane.f32.xlu1 %v1502_v57  ;;  %1434 = vadd.xlane.f32.xlu0 %v1433_v62  ;;  %v4067_v12 = vadd.f32 %v3308_v1, %v1349_v39  ;;  %v1347_v58 = vmax.f32 %v1267_v2, 0.0  ;;  %v3310_v57 = vld [vmem:[#allocation2 + $0x168] sm:$0xff]  ;;  %v3313_v2 = vld [vmem:[#allocation2 + $0x250] sm:$0xff] }
 0x19d   : > { %v1179_v23 = vadd.f32 %v2897_v51, %v3922_v52  ;;  %v4048_v47 = vadd.f32 %v3304_v4, %v1324_v32  ;;  %v1322_v54 = vmax.f32 %v1168_v30, 0.0 }
 0x19e   : > { %v1170_v3 = vpop.f32.mrf.mxu0  ;;  %v1523_v30 = vsel %vm326_vm0, %v4067_v12, 0.0  ;;  %v4085_v39 = vadd.f32 %v3311_v18, %v1347_v58 }
 0x19f   : > { %v1325_v28 = vmax.f32 %v1179_v23, 0.0  ;;  %v1448_v35 = vsel %vm326_vm0, %v4048_v47, 0.0  ;;  %v1171_v38 = vadd.f32 %v3922_v52, %v1170_v3  ;;  %v4064_v22 = vadd.f32 %v3307_v19, %v1322_v54 }
 0x1a0   : > { %1449 = vadd.xlane.f32.xlu1 %v1448_v35  ;;  %1506 = vadd.xlane.f32.xlu0 %v1505_v8  ;;  %v1514_v3 = vsel %vm326_vm0, %v4072_v36, 0.0  ;;  %v3312_v8 = vld [vmem:[#allocation2 + $0x190] sm:$0xff] }
 0x1a1   : > { %v4058_v59 = vadd.f32 %v3306_v14, %v1325_v28  ;;  %v1323_v44 = vmax.f32 %v1171_v38, 0.0  ;;  %v1442_v31 = vsel %vm326_vm0, %v4064_v22, 0.0 }
 0x1a3   : > { %v1451_v56 = vsel %vm326_vm0, %v4058_v59, 0.0  ;;  %v2924_v34 = vpop.f32.mrf.mxu1  ;;  %v4076_v37 = vadd.f32 %v3310_v57, %v1323_v44  ;;  %v3315_v57 = vld [vmem:[#allocation2 + $0x180] sm:$0xff] }
 0x1a4   : > { %1521 = vadd.xlane.f32.xlu1 %v1520_v16  ;;  %1452 = vadd.xlane.f32.xlu0 %v1451_v56  ;;  %v1288_v29 = vadd.f32 %v2924_v34, %v3922_v52 }
 0x1a5   : > { %v1279_v15 = vpop.f32.mrf.mxu1  ;;  %v1445_v35 = vsel %vm326_vm0, %v4076_v37, 0.0 }
 0x1a6   : > { %v1352_v23 = vmax.f32 %v1288_v29, 0.0  ;;  %v1280_v14 = vadd.f32 %v3922_v52, %v1279_v15  ;;  %v1517_v29 = vsel %vm326_vm0, %v4085_v39, 0.0 }
 0x1a7   : > { %v2925_v62 = vpop.f32.mrf.mxu1 }
 0x1a8   : > { %v2900_v32 = vpop.f32.mrf.mxu0  ;;  %1443 = vadd.xlane.f32.xlu1 %v1442_v31  ;;  %1524 = vadd.xlane.f32.xlu0 %v1523_v30  ;;  %v1291_v54 = vadd.f32 %v2925_v62, %v3922_v52  ;;  %v4093_v44 = vadd.f32 %v3313_v2, %v1352_v23  ;;  %v1350_v58 = vmax.f32 %v1280_v14, 0.0 }
 0x1a9   : > { %v1192_v51 = vadd.f32 %v2900_v32, %v3922_v52  ;;  %v1282_v31 = vpop.f32.mrf.mxu1 }
 0x1aa   : > { %v1183_v61 = vpop.f32.mrf.mxu0  ;;  %v1353_v34 = vmax.f32 %v1291_v54, 0.0  ;;  %v1532_v32 = vsel %vm326_vm0, %v4093_v44, 0.0  ;;  %v1283_v62 = vadd.f32 %v3922_v52, %v1282_v31 }
 0x1ab   : > { %v1328_v4 = vmax.f32 %v1192_v51, 0.0  ;;  %v1184_v6 = vadd.f32 %v3922_v52, %v1183_v61 }
 0x1ac   : > { %v2901_v28 = vpop.f32.mrf.mxu0  ;;  %1515 = vadd.xlane.f32.xlu1 %v1514_v3  ;;  %1446 = vadd.xlane.f32.xlu0 %v1445_v35  ;;  %v3317_v35 = vld [vmem:[#allocation2 + $0x240] sm:$0xff] }
 0x1ad   : > { %v1195_v38 = vadd.f32 %v2901_v28, %v3922_v52  ;;  %v4088_v13 = vadd.f32 %v3312_v8, %v1328_v4  ;;  %v1326_v16 = vmax.f32 %v1184_v6, 0.0  ;;  %v3316_v4 = vld [vmem:[#allocation2 + $0x258] sm:$0xff]  ;;  %v4112_v18 = vadd.f32 %v3317_v35, %v1350_v58 }
 0x1ae   : > { %v1186_v49 = vpop.f32.mrf.mxu0  ;;  %v4107_v6 = vadd.f32 %v3316_v4, %v1353_v34 }
 0x1af   : > { %v1329_v56 = vmax.f32 %v1195_v38, 0.0  ;;  %v1460_v19 = vsel %vm326_vm0, %v4088_v13, 0.0  ;;  %v1187_v1 = vadd.f32 %v3922_v52, %v1186_v49  ;;  %v4104_v51 = vadd.f32 %v3315_v57, %v1326_v16  ;;  %4762 = vst [vmem:[#allocation4_spill] sm:$0xff] %v4112_v18  ;;  %v3318_v49 = vld [vmem:[#allocation2 + $0x188] sm:$0xff] }
 0x1b0   : > { %1461 = vadd.xlane.f32.xlu1 %v1460_v19  ;;  %1518 = vadd.xlane.f32.xlu0 %v1517_v29  ;;  %4761 = vst [vmem:[#allocation3_spill] sm:$0xff] %v4107_v6  ;;  %v1351_v38 = vmax.f32 %v1283_v62, 0.0  ;;  %v1535_v14 = vsel %vm326_vm0, %v4107_v6, 0.0  ;;  %v1526_v31 = vsel %vm326_vm0, %v4112_v18, 0.0 }
 0x1b1   : > { %v4098_v15 = vadd.f32 %v3314_v46, %v1329_v56  ;;  %v1327_v61 = vmax.f32 %v1187_v1, 0.0  ;;  %v1454_v28 = vsel %vm326_vm0, %v4104_v51, 0.0 }
 0x1b3   : > { %v1463_v30 = vsel %vm326_vm0, %v4098_v15, 0.0  ;;  %v2928_v23 = vpop.f32.mrf.mxu1  ;;  %v4116_v16 = vadd.f32 %v3318_v49, %v1327_v61  ;;  %v3320_v61 = vld [vmem:[#allocation2 + $0x1b0] sm:$0xff] }
 0x1b4   : > { %1533 = vadd.xlane.f32.xlu1 %v1532_v32  ;;  %1464 = vadd.xlane.f32.xlu0 %v1463_v30  ;;  %v1304_v54 = vadd.f32 %v2928_v23, %v3922_v52  ;;  %v3319_v30 = vld [vmem:[#allocation2 + $0x248] sm:$0xff] }
 0x1b5   : > { %v1295_v3 = vpop.f32.mrf.mxu1  ;;  %4763 = vst [vmem:[#allocation5_spill] sm:$0xff] %v4116_v16  ;;  %v1457_v32 = vsel %vm326_vm0, %v4116_v16, 0.0  ;;  %v4125_v57 = vadd.f32 %v3319_v30, %v1351_v38 }
 0x1b6   : > { %v1356_v34 = vmax.f32 %v1304_v54, 0.0  ;;  %v1296_v4 = vadd.f32 %v3922_v52, %v1295_v3 }
 0x1b7   : > { %v2929_v19 = vpop.f32.mrf.mxu1  ;;  %4764 = vst [vmem:[#allocation6_spill] sm:$0xff] %v4125_v57 }
 0x1b8   : > { %v2904_v8 = vpop.f32.mrf.mxu0  ;;  %1455 = vadd.xlane.f32.xlu1 %v1454_v28  ;;  %1536 = vadd.xlane.f32.xlu0 %v1535_v14  ;;  %v1307_v46 = vadd.f32 %v2929_v19, %v3922_v52  ;;  %v3321_v14 = vld [vmem:[#allocation2 + $0x270] sm:$0xff]  ;;  %v1529_v19 = vsel %vm326_vm0, %v4125_v57, 0.0 }
 0x1b9   : > { %v1208_v56 = vadd.f32 %v2904_v8, %v3922_v52  ;;  %v4133_v49 = vadd.f32 %v3321_v14, %v1356_v34  ;;  %v3326_v14 = vld [vmem:[#allocation2 + $0x1a8] sm:$0xff] }
 0x1ba   : > { %v1199_v2 = vpop.f32.mrf.mxu0 }
 0x1bb   : > { %v1332_v1 = vmax.f32 %v1208_v56, 0.0  ;;  %v1200_v29 = vadd.f32 %v3922_v52, %v1199_v2  ;;  %4766 = vst [vmem:[#allocation8_spill] sm:$0xff] %v4133_v49  ;;  %v1357_v56 = vmax.f32 %v1307_v46, 0.0  ;;  %v1298_v2 = vpop.f32.mrf.mxu1 }
 0x1bc   : > { %v2905_v58 = vpop.f32.mrf.mxu0  ;;  %1527 = vadd.xlane.f32.xlu1 %v1526_v31  ;;  %1458 = vadd.xlane.f32.xlu0 %v1457_v32  ;;  %v1544_v31 = vsel %vm326_vm0, %v4133_v49, 0.0  ;;  %v1299_v32 = vadd.f32 %v3922_v52, %v1298_v2 }
 0x1bd   : > { %v1211_v62 = vadd.f32 %v2905_v58, %v3922_v52  ;;  %v4128_v23 = vadd.f32 %v3320_v61, %v1332_v1  ;;  %v1330_v28 = vmax.f32 %v1200_v29, 0.0  ;;  %v3322_v1 = vld [vmem:[#allocation2 + $0x1b8] sm:$0xff]  ;;  %v1354_v29 = vmax.f32 %v1296_v4, 0.0  ;;  %v3323_v58 = vld [vmem:[#allocation2 + $0x1a0] sm:$0xff] }
 0x1be   : > { %v1202_v54 = vpop.f32.mrf.mxu0 }
 0x1bf   : > { %4765 = vst [vmem:[#allocation7_spill] sm:$0xff] %v4128_v23  ;;  %v1333_v35 = vmax.f32 %v1211_v62, 0.0  ;;  %v1472_v8 = vsel %vm326_vm0, %v4128_v23, 0.0  ;;  %v1203_v38 = vadd.f32 %v3922_v52, %v1202_v54  ;;  %v4144_v46 = vadd.f32 %v3323_v58, %v1330_v28  ;;  %v3324_v62 = vld [vmem:[#allocation2 + $0x278] sm:$0xff]  ;;  %v3325_v54 = vld [vmem:[#allocation2 + $0x260] sm:$0xff] }
 0x1c0   : > { %1473 = vadd.xlane.f32.xlu1 %v1472_v8  ;;  %1530 = vadd.xlane.f32.xlu0 %v1529_v19  ;;  %v4147_v61 = vadd.f32 %v3324_v62, %v1357_v56  ;;  %v1355_v8 = vmax.f32 %v1299_v32, 0.0 }
 0x1c1   : > { %v4138_v3 = vadd.f32 %v3322_v1, %v1333_v35  ;;  %4768 = vst [vmem:[#allocation10_spill] sm:$0xff] %v4144_v46  ;;  %v1331_v30 = vmax.f32 %v1203_v38, 0.0  ;;  %v1466_v4 = vsel %vm326_vm0, %v4144_v46, 0.0  ;;  %v4151_v35 = vadd.f32 %v3325_v54, %v1354_v29  ;;  %v3327_v38 = vld [vmem:[#allocation2 + $0x268] sm:$0xff] }
 0x1c2   : > { %4769 = vst [vmem:[#allocation11_spill] sm:$0xff] %v4147_v61  ;;  %v1547_v28 = vsel %vm326_vm0, %v4147_v61, 0.0  ;;  %v4161_v2 = vadd.f32 %v3327_v38, %v1355_v8 }
 0x1c3   : > { %4767 = vst [vmem:[#allocation9_spill] sm:$0xff] %v4138_v3  ;;  %v1475_v34 = vsel %vm326_vm0, %v4138_v3, 0.0  ;;  %4770 = vst [vmem:[#allocation12_spill] sm:$0xff] %v4151_v35  ;;  %v4155_v19 = vadd.f32 %v3326_v14, %v1331_v30  ;;  %v1538_v52 = vsel %vm326_vm0, %v4151_v35, 0.0 }
 0x1c4   : > { %1545 = vadd.xlane.f32.xlu1 %v1544_v31  ;;  %1476 = vadd.xlane.f32.xlu0 %v1475_v34  ;;  %4772 = vst [vmem:[#allocation14_spill] sm:$0xff] %v4161_v2  ;;  %v1541_v1 = vsel %vm326_vm0, %v4161_v2, 0.0 }
 0x1c5   : > { %4771 = vst [vmem:[#allocation13_spill] sm:$0xff] %v4155_v19  ;;  %v1469_v56 = vsel %vm326_vm0, %v4155_v19, 0.0 }
 0x1c8   : > { %1467 = vadd.xlane.f32.xlu1 %v1466_v4  ;;  %1548 = vadd.xlane.f32.xlu0 %v1547_v28 }
 0x1cc   : > { %1539 = vadd.xlane.f32.xlu1 %v1538_v52  ;;  %1470 = vadd.xlane.f32.xlu0 %v1469_v56 }
 0x1d0   : > { %1542 = vadd.xlane.f32.xlu0 %v1541_v1 }
 0x1f5   : > { %v1486_v29 = vpop.xlane.xlu1 %1485 }
 0x1f6   : > { %v1706_v31 = vrot.slane %v1486_v29, 4 }
 0x1f8   : > { %v1707_v58 = vadd.f32 %v1706_v31, %v1486_v29 }
 0x1f9   : > { %v1414_v34 = vpop.xlane.xlu0 %1413  ;;  %v1480_v30 = vpop.xlane.xlu1 %1479 }
 0x1fa   : > { %v1562_v32 = vrot.slane %v1414_v34, 4  ;;  %v1708_v62 = vrot.slane %v1707_v58, 2  ;;  %v1694_v54 = vrot.slane %v1480_v30, 4 }
 0x1fc   : > { %v1563_v4 = vadd.f32 %v1562_v32, %v1414_v34  ;;  %v1709_v14 = vadd.f32 %v1708_v62, %v1707_v58  ;;  %v1695_v61 = vadd.f32 %v1694_v54, %v1480_v30 }
 0x1fd   : > { %v1408_v28 = vpop.xlane.xlu0 %1407 }
 0x1fe   : > { %v1564_v52 = vrot.slane %v1563_v4, 2  ;;  %v1550_v8 = vrot.slane %v1408_v28, 4  ;;  %v1710_v56 = vrot.slane %v1709_v14, 1  ;;  %v1696_v19 = vrot.slane %v1695_v61, 2 }
 0x1ff   : > { %v1411_v38 = vpop.xlane.xlu1 %1410 }
 0x200   : > { %v1565_v49 = vadd.f32 %v1564_v52, %v1563_v4  ;;  %v1551_v2 = vadd.f32 %v1550_v8, %v1408_v28  ;;  %v1556_v1 = vrot.slane %v1411_v38, 4  ;;  %v1711_v35 = vadd.f32 %v1710_v56, %v1709_v14 }
 0x201   : > { %v1417_v3 = vpop.xlane.xlu0 %1416  ;;  %v1697_v29 = vadd.f32 %v1696_v19, %v1695_v61 }
 0x202   : > { %v1566_v46 = vrot.slane %v1565_v49, 1  ;;  %v1552_v31 = vrot.slane %v1551_v2, 2  ;;  %v1557_v57 = vadd.f32 %v1556_v1, %v1411_v38  ;;  %v1568_v16 = vrot.slane %v1417_v3, 4 }
 0x203   : > { %v1864_v34 = vmul.f32 0.03125, %v1711_v35  ;;  %v1698_v23 = vrot.slane %v1697_v29, 1 }
 0x204   : > { %v1567_v32 = vadd.f32 %v1566_v46, %v1565_v49  ;;  %v1553_v58 = vadd.f32 %v1552_v31, %v1551_v2  ;;  %v1558_v62 = vrot.slane %v1557_v57, 2  ;;  %v1569_v30 = vadd.f32 %v1568_v16, %v1417_v3 }
 0x205   : > { %v1489_v54 = vpop.xlane.xlu0 %1488  ;;  %v1699_v52 = vadd.f32 %v1698_v23, %v1697_v29  ;;  %v4166_v8 = vsub.f32 %v3928_v5, %v1864_v34 }
 0x206   : > { %v1840_v6 = vmul.f32 0.03125, %v1567_v32  ;;  %v1554_v18 = vrot.slane %v1553_v58, 1  ;;  %v1712_v4 = vrot.slane %v1489_v54, 4  ;;  %v1570_v28 = vrot.slane %v1569_v30, 2 }
 0x207   : > { %4773 = vst [vmem:[#allocation15_spill] sm:$0xff] %v4166_v8  ;;  %v1559_v49 = vadd.f32 %v1558_v62, %v1557_v57  ;;  %v1862_v1 = vmul.f32 0.03125, %v1699_v52 }
 0x208   : > { %v1555_v14 = vadd.f32 %v1554_v18, %v1553_v58  ;;  %v1713_v61 = vadd.f32 %v1712_v4, %v1489_v54  ;;  %v4169_v38 = vsub.f32 %v3933_v55, %v1840_v6  ;;  %v1571_v46 = vadd.f32 %v1570_v28, %v1569_v30 }
 0x209   : > { %v1426_v19 = vpop.xlane.xlu1 %1425  ;;  %v1483_v2 = vpop.xlane.xlu0 %1482  ;;  %v1960_v18 = vmul.f32 %v4166_v8, %v4166_v8  ;;  %v1560_v32 = vrot.slane %v1559_v49, 1 }
 0x20a   : > { %4774 = vst [vmem:[#allocation16_spill] sm:$0xff] %v4169_v38  ;;  %v1586_v35 = vrot.slane %v1426_v19, 4  ;;  %v1838_v16 = vmul.f32 0.03125, %v1555_v14  ;;  %v1714_v3 = vrot.slane %v1713_v61, 2  ;;  %v1700_v56 = vrot.slane %v1483_v2, 4 }
 0x20b   : > { %v1936_v23 = vmul.f32 %v4169_v38, %v4169_v38  ;;  %v1572_v29 = vrot.slane %v1571_v46, 1 }
 0x20c   : > { %v1587_v5 = vadd.f32 %v1586_v35, %v1426_v19  ;;  %v1715_v31 = vadd.f32 %v1714_v3, %v1713_v61  ;;  %v1701_v34 = vadd.f32 %v1700_v56, %v1483_v2  ;;  %v4177_v57 = vsub.f32 %v3941_v53, %v1838_v16 }
 0x20d   : > { %v1988_v55 = vsel %vm326_vm0, %v1936_v23, 0.0  ;;  %v1498_v6 = vpop.xlane.xlu1 %1497  ;;  %v1573_v58 = vadd.f32 %v1572_v29, %v1571_v46  ;;  %v1429_v54 = vpop.xlane.xlu0 %1428  ;;  %v2060_v2 = vsel %vm326_vm0, %v1960_v18, 0.0  ;;  %v4183_v46 = vsub.f32 %v3935_v60, %v1862_v1 }
 0x20e   : > { %4775 = vst [vmem:[#allocation17_spill] sm:$0xff] %v4177_v57  ;;  %v1588_v62 = vrot.slane %v1587_v5, 2  ;;  %1989 = vadd.xlane.f32.xlu1 %v1988_v55  ;;  %v1730_v30 = vrot.slane %v1498_v6, 4  ;;  %v1716_v4 = vrot.slane %v1715_v31, 1  ;;  %v1702_v52 = vrot.slane %v1701_v34, 2 }
 0x20f   : > { %v1592_v28 = vrot.slane %v1429_v54, 4  ;;  %v1934_v14 = vmul.f32 %v4177_v57, %v4177_v57  ;;  %v1841_v61 = vmul.f32 0.03125, %v1573_v58  ;;  %4776 = vst [vmem:[#allocation18_spill] sm:$0xff] %v4183_v46 }
 0x210   : > { %v1589_v19 = vadd.f32 %v1588_v62, %v1587_v5  ;;  %v1731_v35 = vadd.f32 %v1730_v30, %v1498_v6  ;;  %v1717_v3 = vadd.f32 %v1716_v4, %v1715_v31  ;;  %v1703_v53 = vadd.f32 %v1702_v52, %v1701_v34 }
 0x211   : > { %v1593_v16 = vadd.f32 %v1592_v28, %v1429_v54  ;;  %v1420_v56 = vpop.xlane.xlu1 %1419  ;;  %v1501_v8 = vpop.xlane.xlu0 %1500  ;;  %v4186_v38 = vsub.f32 %v3950_v26, %v1841_v61  ;;  %v1982_v18 = vsel %vm326_vm0, %v1934_v14, 0.0  ;;  %v1958_v52 = vmul.f32 %v4183_v46, %v4183_v46 }
 0x212   : > { %v1590_v23 = vrot.slane %v1589_v19, 1  ;;  %v1732_v29 = vrot.slane %v1731_v35, 2  ;;  %2061 = vadd.xlane.f32.xlu1 %v2060_v2  ;;  %v1574_v55 = vrot.slane %v1420_v56, 4  ;;  %v1865_v58 = vmul.f32 0.03125, %v1717_v3 }
 0x213   : > { %4777 = vst [vmem:[#allocation19_spill] sm:$0xff] %v4186_v38  ;;  %v1594_v5 = vrot.slane %v1593_v16, 2  ;;  %v1736_v6 = vrot.slane %v1501_v8, 4  ;;  %v1704_v31 = vrot.slane %v1703_v53, 1  ;;  %v1937_v60 = vmul.f32 %v4186_v38, %v4186_v38 }
 0x214   : > { %v1733_v34 = vadd.f32 %v1732_v29, %v1731_v35  ;;  %v1575_v62 = vadd.f32 %v1574_v55, %v1420_v56  ;;  %v1591_v1 = vadd.f32 %v1590_v23, %v1589_v19  ;;  %v1561_v3 = vadd.f32 %v1560_v32, %v1559_v49 }
 0x215   : > { %v1595_v30 = vadd.f32 %v1594_v5, %v1593_v16  ;;  %v1737_v54 = vadd.f32 %v1736_v6, %v1501_v8  ;;  %v1492_v4 = vpop.xlane.xlu1 %1491  ;;  %v1423_v2 = vpop.xlane.xlu0 %1422  ;;  %v1991_v35 = vsel %vm326_vm0, %v1937_v60, 0.0  ;;  %v1705_v8 = vadd.f32 %v1704_v31, %v1703_v53 }
 0x216   : > { %v1734_v26 = vrot.slane %v1733_v34, 1  ;;  %v1576_v28 = vrot.slane %v1575_v62, 2  ;;  %v1718_v61 = vrot.slane %v1492_v4, 4  ;;  %1983 = vadd.xlane.f32.xlu1 %v1982_v18  ;;  %1992 = vadd.xlane.f32.xlu0 %v1991_v35  ;;  %v1580_v19 = vrot.slane %v1423_v2, 4 }
 0x217   : > { %v1596_v14 = vrot.slane %v1595_v30, 1  ;;  %v1738_v57 = vrot.slane %v1737_v54, 2  ;;  %v1844_v16 = vmul.f32 0.03125, %v1591_v1  ;;  %v2054_v55 = vsel %vm326_vm0, %v1958_v52, 0.0 }
 0x218   : > { %v1577_v56 = vadd.f32 %v1576_v28, %v1575_v62  ;;  %v1719_v29 = vadd.f32 %v1718_v61, %v1492_v4  ;;  %v4196_v5 = vsub.f32 %v3957_v10, %v1865_v58  ;;  %v1735_v6 = vadd.f32 %v1734_v26, %v1733_v34 }
 0x219   : > { %v1438_v23 = vpop.xlane.xlu1 %1437  ;;  %v1739_v18 = vadd.f32 %v1738_v57, %v1737_v54  ;;  %v1581_v49 = vadd.f32 %v1580_v19, %v1423_v2  ;;  %v1495_v32 = vpop.xlane.xlu0 %1494  ;;  %v1839_v38 = vmul.f32 0.03125, %v1561_v3  ;;  %v1597_v60 = vadd.f32 %v1596_v14, %v1595_v30 }
 0x21a   : > { %v1720_v46 = vrot.slane %v1719_v29, 2  ;;  %2055 = vadd.xlane.f32.xlu1 %v2054_v55  ;;  %v1610_v62 = vrot.slane %v1438_v23, 4  ;;  %v1961_v4 = vmul.f32 %v4196_v5, %v4196_v5  ;;  %v1578_v1 = vrot.slane %v1577_v56, 1 }
 0x21b   : > { %v1582_v31 = vrot.slane %v1581_v49, 2  ;;  %v1724_v28 = vrot.slane %v1495_v32, 4  ;;  %v1863_v52 = vmul.f32 0.03125, %v1705_v8  ;;  %v4202_v57 = vsub.f32 %v3967_v40, %v1844_v16 }
 0x21c   : > { %v1721_v53 = vadd.f32 %v1720_v46, %v1719_v29  ;;  %v1611_v61 = vadd.f32 %v1610_v62, %v1438_v23  ;;  %v2063_v10 = vsel %vm326_vm0, %v1961_v4, 0.0  ;;  %v1868_v34 = vmul.f32 0.03125, %v1735_v6 }
 0x21d   : > { %v1510_v58 = vpop.xlane.xlu1 %1509  ;;  %v1740_v54 = vrot.slane %v1739_v18, 1  ;;  %v1583_v26 = vadd.f32 %v1582_v31, %v1581_v49  ;;  %2064 = vadd.xlane.f32.xlu0 %v2063_v10  ;;  %v1725_v30 = vadd.f32 %v1724_v28, %v1495_v32  ;;  %v1441_v2 = vpop.xlane.xlu0 %1440  ;;  %v1845_v3 = vmul.f32 0.03125, %v1597_v60 }
 0x21e   : > { %v1612_v14 = vrot.slane %v1611_v61, 2  ;;  %v1754_v35 = vrot.slane %v1510_v58, 4  ;;  %v1940_v46 = vmul.f32 %v4202_v57, %v4202_v57  ;;  %v1579_v29 = vadd.f32 %v1578_v1, %v1577_v56 }
 0x21f   : > { %v1722_v19 = vrot.slane %v1721_v53, 1  ;;  %v1726_v8 = vrot.slane %v1725_v30, 2  ;;  %v4207_v23 = vsub.f32 %v3945_v11, %v1839_v38  ;;  %v1616_v6 = vrot.slane %v1441_v2, 4 }
 0x220   : > { %v1613_v40 = vadd.f32 %v1612_v14, %v1611_v61  ;;  %v1755_v16 = vadd.f32 %v1754_v35, %v1510_v58  ;;  %v2000_v55 = vsel %vm326_vm0, %v1940_v46, 0.0  ;;  %v1741_v32 = vadd.f32 %v1740_v54, %v1739_v18 }
 0x221   : > { %v1432_v49 = vpop.xlane.xlu1 %1431  ;;  %v1584_v62 = vrot.slane %v1583_v26, 1  ;;  %v1727_v60 = vadd.f32 %v1726_v8, %v1725_v30  ;;  %2001 = vadd.xlane.f32.xlu1 %v2000_v55  ;;  %v1935_v4 = vmul.f32 %v4207_v23, %v4207_v23  ;;  %v1513_v31 = vpop.xlane.xlu0 %1512  ;;  %v1617_v28 = vadd.f32 %v1616_v6, %v1441_v2 }
 0x222   : > { %v1614_v56 = vrot.slane %v1613_v40, 1  ;;  %v1756_v1 = vrot.slane %v1755_v16, 2  ;;  %v1598_v10 = vrot.slane %v1432_v49, 4  ;;  %v1842_v11 = vmul.f32 0.03125, %v1579_v29 }
 0x223   : > { %v1723_v38 = vadd.f32 %v1722_v19, %v1721_v53  ;;  %v1985_v61 = vsel %vm326_vm0, %v1935_v4, 0.0  ;;  %v4214_v58 = vsub.f32 %v3972_v7, %v1868_v34  ;;  %v1728_v14 = vrot.slane %v1727_v60, 1 }
 0x224   : > { %v1757_v18 = vadd.f32 %v1756_v1, %v1755_v16  ;;  %1986 = vadd.xlane.f32.xlu0 %v1985_v61  ;;  %v1618_v54 = vrot.slane %v1617_v28, 2  ;;  %v1599_v30 = vadd.f32 %v1598_v10, %v1432_v49  ;;  %v1869_v46 = vmul.f32 0.03125, %v1741_v32 }
 0x225   : > { %4778 = vst [vmem:[#allocation20_spill] sm:$0xff] %v4214_v58  ;;  %v1504_v35 = vpop.xlane.xlu1 %1503  ;;  %v1964_v8 = vmul.f32 %v4214_v58, %v4214_v58  ;;  %v4219_v2 = vsub.f32 %v3964_v42, %v1863_v52  ;;  %v1760_v29 = vrot.slane %v1513_v31, 4  ;;  %v1435_v53 = vpop.xlane.xlu0 %1434  ;;  %v1585_v19 = vadd.f32 %v1584_v62, %v1583_v26 }
 0x226   : > { %v1615_v55 = vadd.f32 %v1614_v56, %v1613_v40  ;;  %v1619_v6 = vadd.f32 %v1618_v54, %v1617_v28  ;;  %v1600_v7 = vrot.slane %v1599_v30, 2  ;;  %v1866_v34 = vmul.f32 0.03125, %v1723_v38 }
 0x227   : > { %v2072_v16 = vsel %vm326_vm0, %v1964_v8, 0.0  ;;  %v1959_v49 = vmul.f32 %v4219_v2, %v4219_v2  ;;  %v1761_v4 = vadd.f32 %v1760_v29, %v1513_v31  ;;  %v1729_v32 = vadd.f32 %v1728_v14, %v1727_v60 }
 0x228   : > { %v1758_v1 = vrot.slane %v1757_v18, 1  ;;  %v1601_v10 = vadd.f32 %v1600_v7, %v1599_v30  ;;  %2073 = vadd.xlane.f32.xlu1 %v2072_v16  ;;  %v1742_v61 = vrot.slane %v1504_v35, 4  ;;  %v4226_v26 = vsub.f32 %v3983_v20, %v1842_v11 }
 0x229   : > { %v1450_v42 = vpop.xlane.xlu1 %1449  ;;  %v2057_v52 = vsel %vm326_vm0, %v1959_v49, 0.0  ;;  %v1762_v58 = vrot.slane %v1761_v4, 2  ;;  %v4229_v40 = vsub.f32 %v3977_v50, %v1845_v3  ;;  %v1507_v62 = vpop.xlane.xlu0 %1506  ;;  %v1843_v56 = vmul.f32 0.03125, %v1585_v19 }
 0x22a   : > { %v1848_v28 = vmul.f32 0.03125, %v1615_v55  ;;  %v1620_v38 = vrot.slane %v1619_v6, 1  ;;  %2058 = vadd.xlane.f32.xlu0 %v2057_v52  ;;  %v1743_v60 = vadd.f32 %v1742_v61, %v1504_v35  ;;  %v1938_v14 = vmul.f32 %v4226_v26, %v4226_v26 }
 0x22b   : > { %v1763_v31 = vadd.f32 %v1762_v58, %v1761_v4  ;;  %v1941_v54 = vmul.f32 %v4229_v40, %v4229_v40  ;;  %v1604_v30 = vrot.slane %v1435_v53, 4  ;;  %v4235_v8 = vmul.f32 0.03125, %v1729_v32 }
 0x22c   : > { %v1759_v20 = vadd.f32 %v1758_v1, %v1757_v18  ;;  %v1744_v11 = vrot.slane %v1743_v60, 2  ;;  %v1634_v50 = vrot.slane %v1450_v42, 4  ;;  %v1602_v29 = vrot.slane %v1601_v10, 1 }
 0x22d   : > { %v1522_v3 = vpop.xlane.xlu1 %1521  ;;  %v1994_v19 = vsel %vm326_vm0, %v1938_v14, 0.0  ;;  %v2003_v55 = vsel %vm326_vm0, %v1941_v54, 0.0  ;;  %v1605_v35 = vadd.f32 %v1604_v30, %v1435_v53  ;;  %v1453_v58 = vpop.xlane.xlu0 %1452  ;;  %v1764_v7 = vrot.slane %v1763_v31, 1 }
 0x22e   : > { %v1745_v16 = vadd.f32 %v1744_v11, %v1743_v60  ;;  %1995 = vadd.xlane.f32.xlu1 %v1994_v19  ;;  %2004 = vadd.xlane.f32.xlu0 %v2003_v55  ;;  %v1635_v49 = vadd.f32 %v1634_v50, %v1450_v42  ;;  %v4240_v4 = vsub.f32 %v3991_v17, %v1866_v34  ;;  %v1748_v61 = vrot.slane %v1507_v62, 4 }
 0x22f   : > { %v1621_v32 = vadd.f32 %v1620_v38, %v1619_v6  ;;  %v1606_v18 = vrot.slane %v1605_v35, 2  ;;  %v4243_v1 = vsub.f32 %v3986_v27, %v1869_v46  ;;  %v1778_v54 = vrot.slane %v1522_v3, 4 }
 0x230   : > { %4779 = vst [vmem:[#allocation21_spill] sm:$0xff] %v4240_v4  ;;  %v1746_v52 = vrot.slane %v1745_v16, 1  ;;  %v1636_v14 = vrot.slane %v1635_v49, 2  ;;  %v1962_v53 = vmul.f32 %v4240_v4, %v4240_v4  ;;  %v1603_v60 = vadd.f32 %v1602_v29, %v1601_v10 }
 0x231   : > { %v1444_v30 = vpop.xlane.xlu1 %1443  ;;  %v1607_v11 = vadd.f32 %v1606_v18, %v1605_v35  ;;  %v1965_v42 = vmul.f32 %v4243_v1, %v4243_v1  ;;  %v1749_v17 = vadd.f32 %v1748_v61, %v1507_v62  ;;  %v1525_v34 = vpop.xlane.xlu0 %1524  ;;  %v1765_v6 = vadd.f32 %v1764_v7, %v1763_v31 }
 0x232   : > { %v1637_v38 = vadd.f32 %v1636_v14, %v1635_v49  ;;  %v2066_v27 = vsel %vm326_vm0, %v1962_v53, 0.0  ;;  %v1779_v46 = vadd.f32 %v1778_v54, %v1522_v3  ;;  %v4252_v4 = vsub.f32 %v4007_v48, %v1848_v28 }
 0x233   : > { %v1608_v50 = vrot.slane %v1607_v11, 1  ;;  %2067 = vadd.xlane.f32.xlu1 %v2066_v27  ;;  %v2075_v19 = vsel %vm326_vm0, %v1965_v42, 0.0  ;;  %v1750_v55 = vrot.slane %v1749_v17, 2  ;;  %v1872_v10 = vmul.f32 0.03125, %v1759_v20 }
 0x234   : > { %v1747_v29 = vadd.f32 %v1746_v52, %v1745_v16  ;;  %2076 = vadd.xlane.f32.xlu0 %v2075_v19  ;;  %v1780_v35 = vrot.slane %v1779_v46, 2  ;;  %v4255_v62 = vsub.f32 %v3995_v25, %v1843_v56  ;;  %v1849_v7 = vmul.f32 0.03125, %v1621_v32 }
 0x235   : > { %v1516_v31 = vpop.xlane.xlu1 %1515  ;;  %v1751_v49 = vadd.f32 %v1750_v55, %v1749_v17  ;;  %v1944_v3 = vmul.f32 %v4252_v4, %v4252_v4  ;;  %v1640_v18 = vrot.slane %v1453_v58, 4  ;;  %v1447_v61 = vpop.xlane.xlu0 %1446  ;;  %v1846_v14 = vmul.f32 0.03125, %v1603_v60 }
 0x236   : > { %v1638_v53 = vrot.slane %v1637_v38, 1  ;;  %v1939_v48 = vmul.f32 %v4255_v62, %v4255_v62  ;;  %v1622_v28 = vrot.slane %v1444_v30, 4  ;;  %v1873_v20 = vmul.f32 0.03125, %v1765_v6 }
 0x237   : > { %v1609_v16 = vadd.f32 %v1608_v50, %v1607_v11  ;;  %v2012_v52 = vsel %vm326_vm0, %v1944_v3, 0.0  ;;  %v1641_v25 = vadd.f32 %v1640_v18, %v1453_v58  ;;  %v1870_v56 = vmul.f32 0.03125, %v1747_v29 }
 0x238   : > { %v1781_v54 = vadd.f32 %v1780_v35, %v1779_v46  ;;  %2013 = vadd.xlane.f32.xlu1 %v2012_v52  ;;  %v1997_v32 = vsel %vm326_vm0, %v1939_v48, 0.0  ;;  %v1623_v42 = vadd.f32 %v1622_v28, %v1444_v30  ;;  %v1752_v27 = vrot.slane %v1751_v49, 1 }
 0x239   : > { %v1462_v17 = vpop.xlane.xlu1 %1461  ;;  %1998 = vadd.xlane.f32.xlu0 %v1997_v32  ;;  %v1642_v60 = vrot.slane %v1641_v25, 2  ;;  %v4264_v19 = vsub.f32 %v4013_v21, %v1872_v10  ;;  %v4268_v6 = vsub.f32 %v4004_v24, %v4235_v8  ;;  %v1519_v11 = vpop.xlane.xlu0 %1518  ;;  %v1639_v50 = vadd.f32 %v1638_v53, %v1637_v38 }
 0x23a   : > { %v1624_v58 = vrot.slane %v1623_v42, 2  ;;  %v1784_v55 = vrot.slane %v1525_v34, 4  ;;  %v1766_v46 = vrot.slane %v1516_v31, 4  ;;  %v4270_v29 = vmul.f32 0.03125, %v1609_v16 }
 0x23b   : > { %v1643_v35 = vadd.f32 %v1642_v60, %v1641_v25  ;;  %v1968_v30 = vmul.f32 %v4264_v19, %v4264_v19  ;;  %v1963_v3 = vmul.f32 %v4268_v6, %v4268_v6  ;;  %v1782_v21 = vrot.slane %v1781_v54, 1 }
 0x23c   : > { %v1625_v10 = vadd.f32 %v1624_v58, %v1623_v42  ;;  %v1785_v18 = vadd.f32 %v1784_v55, %v1525_v34  ;;  %v1767_v48 = vadd.f32 %v1766_v46, %v1516_v31  ;;  %v1753_v8 = vadd.f32 %v1752_v27, %v1751_v49 }
 0x23d   : > { %v1534_v24 = vpop.xlane.xlu1 %1533  ;;  %v2084_v38 = vsel %vm326_vm0, %v1968_v30, 0.0  ;;  %v2069_v53 = vsel %vm326_vm0, %v1963_v3, 0.0  ;;  %v4279_v28 = vsub.f32 %v4024_v9, %v1846_v14  ;;  %v1644_v16 = vrot.slane %v1643_v35, 1  ;;  %v1465_v42 = vpop.xlane.xlu0 %1464 }
 0x23e   : > { %2085 = vadd.xlane.f32.xlu1 %v2084_v38  ;;  %2070 = vadd.xlane.f32.xlu0 %v2069_v53  ;;  %v1786_v52 = vrot.slane %v1785_v18, 2  ;;  %v1768_v25 = vrot.slane %v1767_v48, 2  ;;  %v4282_v32 = vsub.f32 %v4018_v45, %v1849_v7  ;;  %v1852_v34 = vmul.f32 0.03125, %v1639_v50 }
 0x23f   : > { %4780 = vst [vmem:[#allocation22_spill] sm:$0xff] %v4279_v28  ;;  %v1942_v31 = vmul.f32 %v4279_v28, %v4279_v28  ;;  %v1628_v49 = vrot.slane %v1447_v61, 4  ;;  %v1658_v27 = vrot.slane %v1462_v17, 4  ;;  %v1783_v60 = vadd.f32 %v1782_v21, %v1781_v54 }
 0x240   : > { %v1626_v58 = vrot.slane %v1625_v10, 1  ;;  %v1787_v55 = vadd.f32 %v1786_v52, %v1785_v18  ;;  %v1945_v9 = vmul.f32 %v4282_v32, %v4282_v32  ;;  %v1769_v14 = vadd.f32 %v1768_v25, %v1767_v48 }
 0x241   : > { %v2006_v46 = vsel %vm326_vm0, %v1942_v31, 0.0  ;;  %v1629_v30 = vadd.f32 %v1628_v49, %v1447_v61  ;;  %v1659_v3 = vadd.f32 %v1658_v27, %v1462_v17  ;;  %v1456_v45 = vpop.xlane.xlu1 %1455  ;;  %v1871_v7 = vmul.f32 0.03125, %v1753_v8  ;;  %v1537_v25 = vpop.xlane.xlu0 %1536 }
 0x242   : > { %v1645_v38 = vadd.f32 %v1644_v16, %v1643_v35  ;;  %v1788_v50 = vrot.slane %v1787_v55, 1  ;;  %2007 = vadd.xlane.f32.xlu1 %v2006_v46  ;;  %v2015_v53 = vsel %vm326_vm0, %v1945_v9, 0.0  ;;  %v4291_v21 = vsub.f32 %v4032_v43, %v1870_v56 }
 0x243   : > { %2016 = vadd.xlane.f32.xlu0 %v2015_v53  ;;  %v1630_v28 = vrot.slane %v1629_v30, 2  ;;  %v1660_v54 = vrot.slane %v1659_v3, 2  ;;  %v4294_v18 = vsub.f32 %v4027_v63, %v1873_v20  ;;  %v1876_v48 = vmul.f32 0.03125, %v1783_v60 }
 0x244   : > { %v1627_v52 = vadd.f32 %v1626_v58, %v1625_v10  ;;  %v1772_v61 = vrot.slane %v1519_v11, 4  ;;  %v1802_v17 = vrot.slane %v1534_v24, 4  ;;  %v1770_v8 = vrot.slane %v1769_v14, 1 }
 0x245   : > { %v1631_v35 = vadd.f32 %v1630_v28, %v1629_v30  ;;  %v1966_v16 = vmul.f32 %v4291_v21, %v4291_v21  ;;  %v1969_v31 = vmul.f32 %v4294_v18, %v4294_v18  ;;  %v1853_v49 = vmul.f32 0.03125, %v1645_v38  ;;  %v1528_v60 = vpop.xlane.xlu1 %1527 }
 0x246   : > { %v1661_v27 = vadd.f32 %v1660_v54, %v1659_v3  ;;  %v1773_v43 = vadd.f32 %v1772_v61, %v1519_v11  ;;  %v1803_v56 = vadd.f32 %v1802_v17, %v1534_v24  ;;  %v1789_v9 = vadd.f32 %v1788_v50, %v1787_v55  ;;  %v1459_v61 = vpop.xlane.xlu0 %1458 }
 0x247   : > { %v1632_v63 = vrot.slane %v1631_v35, 1  ;;  %v2078_v20 = vsel %vm326_vm0, %v1966_v16, 0.0  ;;  %v2087_v10 = vsel %vm326_vm0, %v1969_v31, 0.0  ;;  %v4303_v46 = vsub.f32 %v4048_v47, %v1852_v34 }
 0x248   : > { %2079 = vadd.xlane.f32.xlu1 %v2078_v20  ;;  %2088 = vadd.xlane.f32.xlu0 %v2087_v10  ;;  %v1774_v28 = vrot.slane %v1773_v43, 2  ;;  %v1804_v58 = vrot.slane %v1803_v56, 2  ;;  %v4307_v30 = vsub.f32 %v4036_v41, %v4270_v29  ;;  %v1850_v11 = vmul.f32 0.03125, %v1627_v52 }
 0x249   : > { %v1771_v24 = vadd.f32 %v1770_v8, %v1769_v14  ;;  %v1664_v55 = vrot.slane %v1465_v42, 4  ;;  %v1646_v3 = vrot.slane %v1456_v45, 4  ;;  %v1662_v38 = vrot.slane %v1661_v27, 1 }
 0x24a   : > { %v1775_v50 = vadd.f32 %v1774_v28, %v1773_v43  ;;  %v1948_v53 = vmul.f32 %v4303_v46, %v4303_v46  ;;  %v1943_v54 = vmul.f32 %v4307_v30, %v4307_v30  ;;  %v1877_v17 = vmul.f32 0.03125, %v1789_v9  ;;  %v1474_v9 = vpop.xlane.xlu1 %1473 }
 0x24b   : > { %v1805_v47 = vadd.f32 %v1804_v58, %v1803_v56  ;;  %v1665_v34 = vadd.f32 %v1664_v55, %v1465_v42  ;;  %v1647_v16 = vadd.f32 %v1646_v3, %v1456_v45  ;;  %v1633_v31 = vadd.f32 %v1632_v63, %v1631_v35 }
 0x24c   : > { %v1776_v41 = vrot.slane %v1775_v50, 1  ;;  %v2024_v29 = vsel %vm326_vm0, %v1948_v53, 0.0  ;;  %v2009_v14 = vsel %vm326_vm0, %v1943_v54, 0.0  ;;  %v4316_v43 = vsub.f32 %v4053_v33, %v1876_v48  ;;  %v1531_v53 = vpop.xlane.xlu0 %1530 }
 0x24d   : > { %2025 = vadd.xlane.f32.xlu1 %v2024_v29  ;;  %2010 = vadd.xlane.f32.xlu0 %v2009_v14  ;;  %v1666_v52 = vrot.slane %v1665_v34, 2  ;;  %v1648_v8 = vrot.slane %v1647_v16, 2  ;;  %v4319_v20 = vsub.f32 %v4045_v0, %v1871_v7  ;;  %v1874_v56 = vmul.f32 0.03125, %v1771_v24 }
 0x24e   : > { %v1663_v42 = vadd.f32 %v1662_v38, %v1661_v27  ;;  %v1808_v45 = vrot.slane %v1537_v25, 4  ;;  %v1790_v35 = vrot.slane %v1528_v60, 4  ;;  %v1806_v63 = vrot.slane %v1805_v47, 1 }
 0x24f   : > { %v1667_v10 = vadd.f32 %v1666_v52, %v1665_v34  ;;  %v1972_v28 = vmul.f32 %v4316_v43, %v4316_v43  ;;  %v1967_v58 = vmul.f32 %v4319_v20, %v4319_v20  ;;  %v1851_v55 = vmul.f32 0.03125, %v1633_v31 }
 0x250   : > { %v1649_v3 = vadd.f32 %v1648_v8, %v1647_v16  ;;  %v1809_v33 = vadd.f32 %v1808_v45, %v1537_v25  ;;  %v1791_v48 = vadd.f32 %v1790_v35, %v1528_v60  ;;  %v1777_v0 = vadd.f32 %v1776_v41, %v1775_v50  ;;  %v1546_v50 = vpop.xlane.xlu1 %1545 }
 0x251   : > { %v1668_v7 = vrot.slane %v1667_v10, 1  ;;  %v2096_v24 = vsel %vm326_vm0, %v1972_v28, 0.0  ;;  %v2081_v27 = vsel %vm326_vm0, %v1967_v58, 0.0  ;;  %v4328_v34 = vsub.f32 %v4064_v22, %v1850_v11 }
 0x252   : > { %2097 = vadd.xlane.f32.xlu1 %v2096_v24  ;;  %2082 = vadd.xlane.f32.xlu0 %v2081_v27  ;;  %v1810_v38 = vrot.slane %v1809_v33, 2  ;;  %v1792_v54 = vrot.slane %v1791_v48, 2  ;;  %v4331_v29 = vsub.f32 %v4058_v59, %v1853_v49  ;;  %v1856_v16 = vmul.f32 0.03125, %v1663_v42  ;;  %v1477_v42 = vpop.xlane.xlu0 %1476 }
 0x253   : > { %v1807_v25 = vadd.f32 %v1806_v63, %v1805_v47  ;;  %v1652_v60 = vrot.slane %v1459_v61, 4  ;;  %v1682_v31 = vrot.slane %v1474_v9, 4  ;;  %v1650_v41 = vrot.slane %v1649_v3, 1 }
 0x254   : > { %v1811_v14 = vadd.f32 %v1810_v38, %v1809_v33  ;;  %v1946_v52 = vmul.f32 %v4328_v34, %v4328_v34  ;;  %v1949_v8 = vmul.f32 %v4331_v29, %v4331_v29  ;;  %v1875_v45 = vmul.f32 0.03125, %v1777_v0 }
 0x255   : > { %v1793_v35 = vadd.f32 %v1792_v54, %v1791_v48  ;;  %v1653_v22 = vadd.f32 %v1652_v60, %v1459_v61  ;;  %v1683_v11 = vadd.f32 %v1682_v31, %v1474_v9  ;;  %v1669_v28 = vadd.f32 %v1668_v7, %v1667_v10  ;;  %v1468_v54 = vpop.xlane.xlu1 %1467 }
 0x256   : > { %v1812_v59 = vrot.slane %v1811_v14, 1  ;;  %v2018_v49 = vsel %vm326_vm0, %v1946_v52, 0.0  ;;  %v2027_v47 = vsel %vm326_vm0, %v1949_v8, 0.0  ;;  %v4340_v33 = vsub.f32 %v4072_v36, %v1874_v56 }
 0x257   : > { %2019 = vadd.xlane.f32.xlu1 %v2018_v49  ;;  %2028 = vadd.xlane.f32.xlu0 %v2027_v47  ;;  %v1654_v63 = vrot.slane %v1653_v22, 2  ;;  %v1684_v58 = vrot.slane %v1683_v11, 2  ;;  %v4343_v24 = vsub.f32 %v4067_v12, %v1877_v17  ;;  %v1880_v48 = vmul.f32 0.03125, %v1807_v25 }
 0x258   : > { %v1651_v61 = vadd.f32 %v1650_v41, %v1649_v3  ;;  %v1796_v9 = vrot.slane %v1531_v53, 4  ;;  %v1826_v10 = vrot.slane %v1546_v50, 4  ;;  %v1794_v0 = vrot.slane %v1793_v35, 1 }
 0x259   : > { %v1655_v7 = vadd.f32 %v1654_v63, %v1653_v22  ;;  %v1970_v27 = vmul.f32 %v4340_v33, %v4340_v33  ;;  %v1973_v38 = vmul.f32 %v4343_v24, %v4343_v24  ;;  %v1857_v60 = vmul.f32 0.03125, %v1669_v28  ;;  %v1549_v28 = vpop.xlane.xlu0 %1548 }
 0x25a   : > { %v1685_v31 = vadd.f32 %v1684_v58, %v1683_v11  ;;  %v1797_v36 = vadd.f32 %v1796_v9, %v1531_v53  ;;  %v1827_v56 = vadd.f32 %v1826_v10, %v1546_v50  ;;  %v1813_v52 = vadd.f32 %v1812_v59, %v1811_v14  ;;  %v1540_v10 = vpop.xlane.xlu1 %1539 }
 0x25b   : > { %v1656_v12 = vrot.slane %v1655_v7, 1  ;;  %v2090_v17 = vsel %vm326_vm0, %v1970_v27, 0.0  ;;  %v2099_v3 = vsel %vm326_vm0, %v1973_v38, 0.0  ;;  %v4352_v8 = vsub.f32 %v4088_v13, %v1856_v16 }
 0x25c   : > { %2091 = vadd.xlane.f32.xlu1 %v2090_v17  ;;  %2100 = vadd.xlane.f32.xlu0 %v2099_v3  ;;  %v1798_v25 = vrot.slane %v1797_v36, 2  ;;  %v1828_v41 = vrot.slane %v1827_v56, 2  ;;  %v4355_v22 = vsub.f32 %v4076_v37, %v1851_v55  ;;  %v1854_v11 = vmul.f32 0.03125, %v1651_v61 }
 0x25d   : > { %v1795_v53 = vadd.f32 %v1794_v0, %v1793_v35  ;;  %v1688_v50 = vrot.slane %v1477_v42, 4  ;;  %v1670_v14 = vrot.slane %v1468_v54, 4  ;;  %v1686_v59 = vrot.slane %v1685_v31, 1 }
 0x25e   : > { %v1799_v49 = vadd.f32 %v1798_v25, %v1797_v36  ;;  %v1952_v47 = vmul.f32 %v4352_v8, %v4352_v8  ;;  %v1947_v63 = vmul.f32 %v4355_v22, %v4355_v22  ;;  %v1881_v58 = vmul.f32 0.03125, %v1813_v52 }
 0x25f   : > { %v1657_v9 = vadd.f32 %v1656_v12, %v1655_v7  ;;  %v1689_v13 = vadd.f32 %v1688_v50, %v1477_v42  ;;  %v1671_v16 = vadd.f32 %v1670_v14, %v1468_v54  ;;  %v1829_v55 = vadd.f32 %v1828_v41, %v1827_v56  ;;  %v1471_v12 = vpop.xlane.xlu0 %1470 }
 0x260   : > { %v1800_v37 = vrot.slane %v1799_v49, 1  ;;  %v2036_v61 = vsel %vm326_vm0, %v1952_v47, 0.0  ;;  %v2021_v35 = vsel %vm326_vm0, %v1947_v63, 0.0  ;;  %v4364_v38 = vsub.f32 %v4093_v44, %v1880_v48 }
 0x261   : > { %2037 = vadd.xlane.f32.xlu1 %v2036_v61  ;;  %2022 = vadd.xlane.f32.xlu0 %v2021_v35  ;;  %v1690_v0 = vrot.slane %v1689_v13, 2  ;;  %v1672_v27 = vrot.slane %v1671_v16, 2  ;;  %v4367_v36 = vsub.f32 %v4085_v39, %v1875_v45  ;;  %v1878_v7 = vmul.f32 0.03125, %v1795_v53 }
 0x262   : > { %v1687_v42 = vadd.f32 %v1686_v59, %v1685_v31  ;;  %v1832_v54 = vrot.slane %v1549_v28, 4  ;;  %v1814_v52 = vrot.slane %v1540_v10, 4  ;;  %v1976_v3 = vmul.f32 %v4364_v38, %v4364_v38 }
 0x263   : > { %v1691_v56 = vadd.f32 %v1690_v0, %v1689_v13  ;;  %v1673_v17 = vadd.f32 %v1672_v27, %v1671_v16  ;;  %v1971_v25 = vmul.f32 %v4367_v36, %v4367_v36  ;;  %v1855_v41 = vmul.f32 0.03125, %v1657_v9  ;;  %v4781_v16 = vld [vmem:[#allocation4_spill] sm:$0xff]  ;;  %v1543_v0 = vpop.xlane.xlu0 %1542 }
 0x264   : > { %v1801_v50 = vadd.f32 %v1800_v37, %v1799_v49  ;;  %v1830_v44 = vrot.slane %v1829_v55, 1  ;;  %v1815_v48 = vadd.f32 %v1814_v52, %v1540_v10  ;;  %v2108_v39 = vsel %vm326_vm0, %v1976_v3, 0.0 }
 0x265   : > { %v1674_v14 = vrot.slane %v1673_v17, 1  ;;  %v2093_v45 = vsel %vm326_vm0, %v1971_v25, 0.0  ;;  %v1833_v31 = vadd.f32 %v1832_v54, %v1549_v28  ;;  %v1692_v53 = vrot.slane %v1691_v56, 1  ;;  %2109 = vadd.xlane.f32.xlu1 %v2108_v39 }
 0x266   : > { %2094 = vadd.xlane.f32.xlu0 %v2093_v45  ;;  %v1816_v59 = vrot.slane %v1815_v48, 2  ;;  %v4376_v47 = vsub.f32 %v4104_v51, %v1854_v11  ;;  %v4379_v63 = vsub.f32 %v4098_v15, %v1857_v60  ;;  %v1860_v9 = vmul.f32 0.03125, %v1687_v42 }
 0x267   : > { %v1675_v49 = vadd.f32 %v1674_v14, %v1673_v17  ;;  %v1676_v13 = vrot.slane %v1471_v12, 4  ;;  %v4382_v10 = vsub.f32 %v4781_v16, %v1878_v7  ;;  %v1831_v37 = vadd.f32 %v1830_v44, %v1829_v55  ;;  %v4782_v17 = vld [vmem:[#allocation3_spill] sm:$0xff]  ;;  %v4785_v16 = vld [vmem:[#allocation6_spill] sm:$0xff] }
 0x268   : > { %v1817_v61 = vadd.f32 %v1816_v59, %v1815_v48  ;;  %v1950_v28 = vmul.f32 %v4376_v47, %v4376_v47  ;;  %v1953_v35 = vmul.f32 %v4379_v63, %v4379_v63  ;;  %v1879_v51 = vmul.f32 0.03125, %v1801_v50  ;;  %v4783_v44 = vld [vmem:[#allocation7_spill] sm:$0xff] }
 0x269   : > { %v1834_v11 = vrot.slane %v1833_v31, 2  ;;  %v1677_v27 = vadd.f32 %v1676_v13, %v1471_v12  ;;  %v1974_v15 = vmul.f32 %v4382_v10, %v4382_v10  ;;  %v1693_v60 = vadd.f32 %v1692_v53, %v1691_v56  ;;  %v4784_v56 = vld [vmem:[#allocation5_spill] sm:$0xff] }
 0x26a   : > { %v1818_v42 = vrot.slane %v1817_v61, 1  ;;  %v2030_v7 = vsel %vm326_vm0, %v1950_v28, 0.0  ;;  %v2039_v55 = vsel %vm326_vm0, %v1953_v35, 0.0  ;;  %v1858_v54 = vmul.f32 0.03125, %v1675_v49 }
 0x26b   : > { %2031 = vadd.xlane.f32.xlu1 %v2030_v7  ;;  %2040 = vadd.xlane.f32.xlu0 %v2039_v55  ;;  %v1678_v52 = vrot.slane %v1677_v27, 2  ;;  %v4393_v3 = vsub.f32 %v4782_v17, %v1881_v58  ;;  %v1820_v25 = vrot.slane %v1543_v0, 4  ;;  %v2102_v12 = vsel %vm326_vm0, %v1974_v15, 0.0 }
 0x26c   : > { %v1819_v50 = vadd.f32 %v1818_v42, %v1817_v61  ;;  %v4397_v48 = vsub.f32 %v4783_v44, %v1860_v9  ;;  %v4400_v14 = vsub.f32 %v4784_v56, %v1855_v41  ;;  %v1835_v39 = vadd.f32 %v1834_v11, %v1833_v31 }
 0x26d   : > { %v1679_v45 = vadd.f32 %v1678_v52, %v1677_v27  ;;  %v1977_v53 = vmul.f32 %v4393_v3, %v4393_v3  ;;  %v1821_v59 = vadd.f32 %v1820_v25, %v1543_v0  ;;  %v1861_v49 = vmul.f32 0.03125, %v1693_v60  ;;  %v4786_v0 = vld [vmem:[#allocation10_spill] sm:$0xff]  ;;  %v4787_v60 = vld [vmem:[#allocation12_spill] sm:$0xff] }
 0x26e   : > { %v1882_v13 = vmul.f32 0.03125, %v1819_v50  ;;  %v1956_v58 = vmul.f32 %v4397_v48, %v4397_v48  ;;  %v4407_v61 = vsub.f32 %v4785_v16, %v1879_v51  ;;  %v1951_v31 = vmul.f32 %v4400_v14, %v4400_v14 }
 0x26f   : > { %v1680_v28 = vrot.slane %v1679_v45, 1  ;;  %2103 = vadd.xlane.f32.xlu1 %v2102_v12  ;;  %v2111_v9 = vsel %vm326_vm0, %v1977_v53, 0.0  ;;  %v1822_v41 = vrot.slane %v1821_v59, 2  ;;  %v4414_v11 = vsub.f32 %v4786_v0, %v1858_v54  ;;  %v4789_v54 = vld [vmem:[#allocation9_spill] sm:$0xff] }
 0x270   : > { %2112 = vadd.xlane.f32.xlu0 %v2111_v9  ;;  %v2048_v35 = vsel %vm326_vm0, %v1956_v58, 0.0  ;;  %v4417_v42 = vsub.f32 %v4787_v60, %v1882_v13  ;;  %v1884_v51 = vmul.f32 0.03125, %v1831_v37  ;;  %v1836_v7 = vrot.slane %v1835_v39, 1 }
 0x271   : > { %v1681_v27 = vadd.f32 %v1680_v28, %v1679_v45  ;;  %v1823_v15 = vadd.f32 %v1822_v41, %v1821_v59  ;;  %v1975_v55 = vmul.f32 %v4407_v61, %v4407_v61  ;;  %v1954_v52 = vmul.f32 %v4414_v11, %v4414_v11  ;;  %v4790_v45 = vld [vmem:[#allocation13_spill] sm:$0xff]  ;;  %v4792_v59 = vld [vmem:[#allocation8_spill] sm:$0xff] }
 0x272   : > { %4788 = vst [vmem:[#allocation4_spill] sm:$0xff] %v4417_v42  ;;  %v2033_v50 = vsel %vm326_vm0, %v1951_v31, 0.0  ;;  %v4425_v12 = vsub.f32 %v4789_v54, %v1861_v49  ;;  %v1978_v37 = vmul.f32 %v4417_v42, %v4417_v42  ;;  %v4434_v13 = vsub.f32 %v4792_v59, %v1884_v51  ;;  %v4794_v31 = vld [vmem:[#allocation14_spill] sm:$0xff] }
 0x273   : > { %v1859_v17 = vmul.f32 0.03125, %v1681_v27  ;;  %v1824_v25 = vrot.slane %v1823_v15, 1  ;;  %2049 = vadd.xlane.f32.xlu1 %v2048_v35  ;;  %v2042_v44 = vsel %vm326_vm0, %v1954_v52, 0.0  ;;  %v1837_v58 = vadd.f32 %v1836_v7, %v1835_v39  ;;  %v4796_v7 = vld [vmem:[#allocation11_spill] sm:$0xff] }
 0x274   : > { %2034 = vadd.xlane.f32.xlu0 %v2033_v50  ;;  %4793 = vst [vmem:[#allocation7_spill] sm:$0xff] %v4434_v13  ;;  %v2105_v28 = vsel %vm326_vm0, %v1975_v55, 0.0  ;;  %v1957_v49 = vmul.f32 %v4425_v12, %v4425_v12  ;;  %v2114_v9 = vsel %vm326_vm0, %v1978_v37, 0.0  ;;  %v1980_v0 = vmul.f32 %v4434_v13, %v4434_v13 }
 0x275   : > { %v1825_v56 = vadd.f32 %v1824_v25, %v1823_v15  ;;  %v4431_v53 = vsub.f32 %v4790_v45, %v1859_v17  ;;  %v1885_v39 = vmul.f32 0.03125, %v1837_v58 }
 0x276   : > { %v2051_v27 = vsel %vm326_vm0, %v1957_v49, 0.0  ;;  %v2120_v51 = vsel %vm326_vm0, %v1980_v0, 0.0 }
 0x277   : > { %4791 = vst [vmem:[#allocation3_spill] sm:$0xff] %v4431_v53  ;;  %v1883_v16 = vmul.f32 0.03125, %v1825_v56  ;;  %2043 = vadd.xlane.f32.xlu1 %v2042_v44  ;;  %v1955_v41 = vmul.f32 %v4431_v53, %v4431_v53  ;;  %v4453_v55 = vsub.f32 %v4796_v7, %v1885_v39 }
 0x278   : > { %2106 = vadd.xlane.f32.xlu0 %v2105_v28 }
 0x279   : > { %v4443_v35 = vsub.f32 %v4794_v31, %v1883_v16  ;;  %v2045_v15 = vsel %vm326_vm0, %v1955_v41, 0.0  ;;  %4797 = vst [vmem:[#allocation6_spill] sm:$0xff] %v4453_v55  ;;  %v1981_v17 = vmul.f32 %v4453_v55, %v4453_v55 }
 0x27b   : > { %4795 = vst [vmem:[#allocation5_spill] sm:$0xff] %v4443_v35  ;;  %2115 = vadd.xlane.f32.xlu1 %v2114_v9  ;;  %v1979_v60 = vmul.f32 %v4443_v35, %v4443_v35  ;;  %v2123_v25 = vsel %vm326_vm0, %v1981_v17, 0.0 }
 0x27c   : > { %2052 = vadd.xlane.f32.xlu0 %v2051_v27 }
 0x27d   : > { %v2117_v52 = vsel %vm326_vm0, %v1979_v60, 0.0 }
 0x27f   : > { %2121 = vadd.xlane.f32.xlu1 %v2120_v51 }
 0x280   : > { %2046 = vadd.xlane.f32.xlu0 %v2045_v15 }
 0x284   : > { %2118 = vadd.xlane.f32.xlu0 %v2117_v52 }
 0x288   : > { %2124 = vadd.xlane.f32.xlu0 %v2123_v25 }
 0x297   : > { %v1990_v50 = vpop.xlane.xlu1 %1989 }
 0x298   : > { %v2138_v54 = vrot.slane %v1990_v50, 4 }
 0x29a   : > { %v2139_v44 = vadd.f32 %v2138_v54, %v1990_v50 }
 0x29b   : > { %v2062_v37 = vpop.xlane.xlu1 %2061 }
 0x29c   : > { %v2140_v56 = vrot.slane %v2139_v44, 2  ;;  %v2282_v45 = vrot.slane %v2062_v37, 4 }
 0x29e   : > { %v2141_v59 = vadd.f32 %v2140_v56, %v2139_v44  ;;  %v2283_v58 = vadd.f32 %v2282_v45, %v2062_v37 }
 0x29f   : > { %v1984_v16 = vpop.xlane.xlu1 %1983  ;;  %v1993_v41 = vpop.xlane.xlu0 %1992 }
 0x2a0   : > { %v2142_v28 = vrot.slane %v2141_v59, 1  ;;  %v2284_v49 = vrot.slane %v2283_v58, 2  ;;  %v2126_v9 = vrot.slane %v1984_v16, 4  ;;  %v2144_v27 = vrot.slane %v1993_v41, 4 }
 0x2a2   : > { %v2143_v31 = vadd.f32 %v2142_v28, %v2141_v59  ;;  %v2285_v0 = vadd.f32 %v2284_v49, %v2283_v58  ;;  %v2127_v39 = vadd.f32 %v2126_v9, %v1984_v16  ;;  %v2145_v52 = vadd.f32 %v2144_v27, %v1993_v41 }
 0x2a3   : > { %v2056_v15 = vpop.xlane.xlu1 %2055 }
 0x2a4   : > { %v2416_v60 = vmul.f32 0.03125, %v2143_v31  ;;  %v2286_v51 = vrot.slane %v2285_v0, 1  ;;  %v2128_v7 = vrot.slane %v2127_v39, 2  ;;  %v2270_v17 = vrot.slane %v2056_v15, 4 }
 0x2a5   : > { %v2146_v44 = vrot.slane %v2145_v52, 2 }
 0x2a6   : > { %v2464_v25 = vadd.f32 1e-05, %v2416_v60  ;;  %v2287_v50 = vadd.f32 %v2286_v51, %v2285_v0  ;;  %v2129_v54 = vadd.f32 %v2128_v7, %v2127_v39  ;;  %v2271_v37 = vadd.f32 %v2270_v17, %v2056_v15  ;;  %v2065_v56 = vpop.xlane.xlu0 %2064 }
 0x2a7   : > { %v2147_v35 = vadd.f32 %v2146_v44, %v2145_v52  ;;  %v2288_v58 = vrot.slane %v2065_v56, 4 }
 0x2a8   : > { %3185 = vrsqrt.f32 %v2464_v25  ;;  %v2440_v45 = vmul.f32 0.03125, %v2287_v50  ;;  %v2130_v55 = vrot.slane %v2129_v54, 1  ;;  %v2272_v59 = vrot.slane %v2271_v37, 2 }
 0x2a9   : > { %v2148_v49 = vrot.slane %v2147_v35, 1  ;;  %v2289_v31 = vadd.f32 %v2288_v58, %v2065_v56 }
 0x2aa   : > { %v2488_v16 = vadd.f32 1e-05, %v2440_v45  ;;  %v2131_v28 = vadd.f32 %v2130_v55, %v2129_v54  ;;  %v2273_v9 = vadd.f32 %v2272_v59, %v2271_v37  ;;  %v2002_v13 = vpop.xlane.xlu1 %2001 }
 0x2ab   : > { %v2149_v27 = vadd.f32 %v2148_v49, %v2147_v35  ;;  %v2162_v0 = vrot.slane %v2002_v13, 4  ;;  %v2290_v60 = vrot.slane %v2289_v31, 2 }
 0x2ac   : > { %3187 = vrsqrt.f32 %v2488_v16  ;;  %v2414_v41 = vmul.f32 0.03125, %v2131_v28  ;;  %v2274_v39 = vrot.slane %v2273_v9, 1 }
 0x2ad   : > { %v2417_v51 = vmul.f32 0.03125, %v2149_v27  ;;  %v2163_v7 = vadd.f32 %v2162_v0, %v2002_v13  ;;  %v1987_v17 = vpop.xlane.xlu0 %1986  ;;  %v2291_v52 = vadd.f32 %v2290_v60, %v2289_v31 }
 0x2ae   : > { %v2462_v15 = vadd.f32 1e-05, %v2414_v41  ;;  %v2275_v25 = vadd.f32 %v2274_v39, %v2273_v9  ;;  %v2132_v50 = vrot.slane %v1987_v17, 4  ;;  %v4462_v9 = vld [vmem:[%s4733_s4] sm:$0xff]  ;;  %v4798_v39 = vld [vmem:[#allocation16_spill] sm:$0xff] }
 0x2af   : > { %v2465_v44 = vadd.f32 1e-05, %v2417_v51  ;;  %v2164_v55 = vrot.slane %v2163_v7, 2  ;;  %v2292_v37 = vrot.slane %v2291_v52, 1 }
 0x2b0   : > { %3189 = vrsqrt.f32 %v2462_v15  ;;  %v2438_v54 = vmul.f32 0.03125, %v2275_v25  ;;  %v2133_v56 = vadd.f32 %v2132_v50, %v1987_v17 }
 0x2b1   : > { %3191 = vrsqrt.f32 %v2465_v44  ;;  %v2165_v45 = vadd.f32 %v2164_v55, %v2163_v7  ;;  %v2074_v59 = vpop.xlane.xlu1 %2073  ;;  %v2293_v58 = vadd.f32 %v2292_v37, %v2291_v52  ;;  %v4468_v7 = vld [vmem:[%s4734_s5] sm:$0xff] }
 0x2b2   : > { %v2486_v35 = vadd.f32 1e-05, %v2438_v54  ;;  %v2134_v16 = vrot.slane %v2133_v56, 2  ;;  %v2306_v28 = vrot.slane %v2074_v59, 4 }
 0x2b3   : > { %v2166_v49 = vrot.slane %v2165_v45, 1  ;;  %v2059_v41 = vpop.xlane.xlu0 %2058  ;;  %v2441_v31 = vmul.f32 0.03125, %v2293_v58 }
 0x2b4   : > { %3193 = vrsqrt.f32 %v2486_v35  ;;  %v2135_v27 = vadd.f32 %v2134_v16, %v2133_v56  ;;  %v2307_v0 = vadd.f32 %v2306_v28, %v2074_v59  ;;  %v2276_v51 = vrot.slane %v2059_v41, 4  ;;  %v4799_v16 = vld [vmem:[#allocation15_spill] sm:$0xff] }
 0x2b5   : > { %v3186_v13 = vpop.eup %3185  ;;  %v2167_v15 = vadd.f32 %v2166_v49, %v2165_v45  ;;  %v2489_v17 = vadd.f32 1e-05, %v2441_v31 }
 0x2b6   : > { %v2560_v60 = vmul.f32 %v3186_v13, %v4798_v39  ;;  %v2136_v25 = vrot.slane %v2135_v27, 1  ;;  %v2308_v52 = vrot.slane %v2307_v0, 2  ;;  %v2277_v55 = vadd.f32 %v2276_v51, %v2059_v41 }
 0x2b7   : > { %v2420_v44 = vmul.f32 0.03125, %v2167_v15  ;;  %v1996_v54 = vpop.xlane.xlu1 %1995  ;;  %v2005_v37 = vpop.xlane.xlu0 %2004  ;;  %3195 = vrsqrt.f32 %v2489_v17 }
 0x2b8   : > { %v2608_v50 = vmul.f32 %v2560_v60, %v4462_v9  ;;  %v2137_v45 = vadd.f32 %v2136_v25, %v2135_v27  ;;  %v2309_v59 = vadd.f32 %v2308_v52, %v2307_v0  ;;  %v2150_v35 = vrot.slane %v1996_v54, 4 }
 0x2b9   : > { %v3188_v56 = vpop.eup %3187  ;;  %v2468_v49 = vadd.f32 1e-05, %v2420_v44  ;;  %v2278_v41 = vrot.slane %v2277_v55, 2  ;;  %v2168_v60 = vrot.slane %v2005_v37, 4 }
 0x2ba   : > { %v2656_v58 = vadd.f32 %v2608_v50, %v4468_v7  ;;  %v2584_v28 = vmul.f32 %v3188_v56, %v4799_v16  ;;  %v2415_v13 = vmul.f32 0.03125, %v2137_v45  ;;  %v2310_v31 = vrot.slane %v2309_v59, 1  ;;  %v4800_v56 = vld [vmem:[#allocation17_spill] sm:$0xff] }
 0x2bb   : > { %v2151_v39 = vadd.f32 %v2150_v35, %v1996_v54  ;;  %3197 = vrsqrt.f32 %v2468_v49  ;;  %v2279_v51 = vadd.f32 %v2278_v41, %v2277_v55  ;;  %v2169_v52 = vadd.f32 %v2168_v60, %v2005_v37 }
 0x2bc   : > { %2704 = vst.msk [vmem:[%s4476_s22 + $0x10] sm:$0xff] %vm326_vm0, %v2656_v58  ;;  %v2632_v15 = vmul.f32 %v2584_v28, %v4462_v9  ;;  %v2463_v27 = vadd.f32 1e-05, %v2415_v13  ;;  %v2311_v0 = vadd.f32 %v2310_v31, %v2309_v59  ;;  %v2068_v50 = vpop.xlane.xlu1 %2067  ;;  %v4801_v59 = vld [vmem:[#allocation19_spill] sm:$0xff] }
 0x2bd   : > { %v3190_v17 = vpop.eup %3189  ;;  %v2152_v25 = vrot.slane %v2151_v39, 2  ;;  %v2280_v16 = vrot.slane %v2279_v51, 1  ;;  %v2294_v54 = vrot.slane %v2068_v50, 4  ;;  %v2077_v35 = vpop.xlane.xlu0 %2076  ;;  %v2170_v49 = vrot.slane %v2169_v52, 2 }
 0x2be   : > { %v2680_v44 = vadd.f32 %v2632_v15, %v4468_v7  ;;  %v2558_v45 = vmul.f32 %v3190_v17, %v4800_v56  ;;  %v3192_v53 = vpop.eup %3191  ;;  %3199 = vrsqrt.f32 %v2463_v27  ;;  %v2444_v58 = vmul.f32 0.03125, %v2311_v0 }
 0x2bf   : > { %v2153_v28 = vadd.f32 %v2152_v25, %v2151_v39  ;;  %v2561_v41 = vmul.f32 %v3192_v53, %v4801_v59  ;;  %v2281_v37 = vadd.f32 %v2280_v16, %v2279_v51  ;;  %v2295_v13 = vadd.f32 %v2294_v54, %v2068_v50 }
 0x2c0   : > { %2728 = vst.msk [vmem:[%s4476_s22 + $0xd0] sm:$0xff] %vm326_vm0, %v2680_v44  ;;  %v2606_v55 = vmul.f32 %v2558_v45, %v4462_v9  ;;  %v2492_v31 = vadd.f32 1e-05, %v2444_v58  ;;  %v2171_v15 = vadd.f32 %v2170_v49, %v2169_v52  ;;  %v2312_v17 = vrot.slane %v2077_v35, 4  ;;  %v4802_v44 = vld [vmem:[#allocation18_spill] sm:$0xff] }
 0x2c1   : > { %v2154_v60 = vrot.slane %v2153_v28, 1  ;;  %v3194_v56 = vpop.eup %3193  ;;  %v2609_v27 = vmul.f32 %v2561_v41, %v4462_v9  ;;  %v2439_v39 = vmul.f32 0.03125, %v2281_v37  ;;  %v2296_v0 = vrot.slane %v2295_v13, 2  ;;  %v2014_v25 = vpop.xlane.xlu1 %2013 }
 0x2c2   : > { %v2654_v42 = vadd.f32 %v2606_v55, %v4468_v7  ;;  %v2582_v45 = vmul.f32 %v3194_v56, %v4802_v44  ;;  %3201 = vrsqrt.f32 %v2492_v31  ;;  %v2172_v51 = vrot.slane %v2171_v15, 1  ;;  %v1999_v50 = vpop.xlane.xlu0 %1998 }
 0x2c3   : > { %v2155_v53 = vadd.f32 %v2154_v60, %v2153_v28  ;;  %v2657_v52 = vadd.f32 %v2609_v27, %v4468_v7  ;;  %v2487_v16 = vadd.f32 1e-05, %v2439_v39  ;;  %v2297_v54 = vadd.f32 %v2296_v0, %v2295_v13 }
 0x2c4   : > { %2702 = vst.msk [vmem:[%s4476_s22] sm:$0xff] %vm326_vm0, %v2654_v42  ;;  %v2313_v58 = vadd.f32 %v2312_v17, %v2077_v35  ;;  %v2630_v49 = vmul.f32 %v2582_v45, %v4462_v9  ;;  %v2173_v59 = vadd.f32 %v2172_v51, %v2171_v15  ;;  %v2186_v41 = vrot.slane %v2014_v25, 4  ;;  %v3196_v37 = vpop.eup %3195 }
 0x2c5   : > { %v2418_v55 = vmul.f32 0.03125, %v2155_v53  ;;  %2705 = vst.msk [vmem:[%s4476_s22 + $0x18] sm:$0xff] %vm326_vm0, %v2657_v52  ;;  %3203 = vrsqrt.f32 %v2487_v16  ;;  %v2298_v28 = vrot.slane %v2297_v54, 1  ;;  %v2156_v60 = vrot.slane %v1999_v50, 4 }
 0x2c6   : > { %v2314_v31 = vrot.slane %v2313_v58, 2  ;;  %v2678_v42 = vadd.f32 %v2630_v49, %v4468_v7  ;;  %v2585_v56 = vmul.f32 %v3196_v37, %v4196_v5  ;;  %v2421_v13 = vmul.f32 0.03125, %v2173_v59 }
 0x2c7   : > { %v2466_v27 = vadd.f32 1e-05, %v2418_v55  ;;  %v2299_v35 = vadd.f32 %v2298_v28, %v2297_v54  ;;  %v2187_v39 = vadd.f32 %v2186_v41, %v2014_v25  ;;  %v2157_v0 = vadd.f32 %v2156_v60, %v1999_v50  ;;  %v2086_v15 = vpop.xlane.xlu1 %2085  ;;  %v2071_v44 = vpop.xlane.xlu0 %2070 }
 0x2c8   : > { %v2315_v17 = vadd.f32 %v2314_v31, %v2313_v58  ;;  %v3198_v45 = vpop.eup %3197  ;;  %2726 = vst.msk [vmem:[%s4476_s22 + $0xc0] sm:$0xff] %vm326_vm0, %v2678_v42  ;;  %v2633_v53 = vmul.f32 %v2585_v56, %v4462_v9  ;;  %v2469_v51 = vadd.f32 1e-05, %v2421_v13  ;;  %v2330_v52 = vrot.slane %v2086_v15, 4 }
 0x2c9   : > { %3205 = vrsqrt.f32 %v2466_v27  ;;  %v2564_v16 = vmul.f32 %v3198_v45, %v4202_v57  ;;  %v2442_v5 = vmul.f32 0.03125, %v2299_v35  ;;  %v2188_v55 = vrot.slane %v2187_v39, 2 }
 0x2ca   : > { %v2316_v49 = vrot.slane %v2315_v17, 1  ;;  %v2681_v54 = vadd.f32 %v2633_v53, %v4468_v7  ;;  %3207 = vrsqrt.f32 %v2469_v51  ;;  %v2158_v25 = vrot.slane %v2157_v0, 2 }
 0x2cb   : > { %v2331_v50 = vadd.f32 %v2330_v52, %v2086_v15  ;;  %v3200_v58 = vpop.eup %3199  ;;  %v2612_v59 = vmul.f32 %v2564_v16, %v4462_v9  ;;  %v2490_v41 = vadd.f32 1e-05, %v2442_v5  ;;  %v2189_v28 = vadd.f32 %v2188_v55, %v2187_v39  ;;  %v2008_v31 = vpop.xlane.xlu1 %2007 }
 0x2cc   : > { %v2317_v37 = vadd.f32 %v2316_v49, %v2315_v17  ;;  %2729 = vst.msk [vmem:[%s4476_s22 + $0xd8] sm:$0xff] %vm326_vm0, %v2681_v54  ;;  %v2559_v57 = vmul.f32 %v3200_v58, %v4207_v23  ;;  %v2159_v60 = vadd.f32 %v2158_v25, %v2157_v0  ;;  %v2300_v56 = vrot.slane %v2071_v44, 4  ;;  %v2017_v27 = vpop.xlane.xlu0 %2016  ;;  %v4803_v49 = vld [vmem:[#allocation20_spill] sm:$0xff] }
 0x2cd   : > { %v2332_v42 = vrot.slane %v2331_v50, 2  ;;  %v2660_v13 = vadd.f32 %v2612_v59, %v4468_v7  ;;  %3209 = vrsqrt.f32 %v2490_v41  ;;  %v2190_v15 = vrot.slane %v2189_v28, 1 }
 0x2ce   : > { %v2445_v35 = vmul.f32 0.03125, %v2317_v37  ;;  %v2607_v45 = vmul.f32 %v2559_v57, %v4462_v9  ;;  %v2160_v53 = vrot.slane %v2159_v60, 1  ;;  %v2301_v39 = vadd.f32 %v2300_v56, %v2071_v44 }
 0x2cf   : > { %v2333_v17 = vadd.f32 %v2332_v42, %v2331_v50  ;;  %v3202_v51 = vpop.eup %3201  ;;  %2708 = vst.msk [vmem:[%s4476_s22 + $0x30] sm:$0xff] %vm326_vm0, %v2660_v13  ;;  %v2191_v23 = vadd.f32 %v2190_v15, %v2189_v28  ;;  %v2174_v0 = vrot.slane %v2008_v31, 4  ;;  %v2192_v16 = vrot.slane %v2017_v27, 4 }
 0x2d0   : > { %v2493_v52 = vadd.f32 1e-05, %v2445_v35  ;;  %v2655_v5 = vadd.f32 %v2607_v45, %v4468_v7  ;;  %v2588_v55 = vmul.f32 %v3202_v51, %v4803_v49  ;;  %v2161_v54 = vadd.f32 %v2160_v53, %v2159_v60 }
 0x2d1   : > { %v2334_v25 = vrot.slane %v2333_v17, 1  ;;  %v2424_v58 = vmul.f32 0.03125, %v2191_v23  ;;  %v2302_v59 = vrot.slane %v2301_v39, 2  ;;  %v2175_v41 = vadd.f32 %v2174_v0, %v2008_v31  ;;  %v2080_v50 = vpop.xlane.xlu1 %2079  ;;  %v2089_v44 = vpop.xlane.xlu0 %2088 }
 0x2d2   : > { %3211 = vrsqrt.f32 %v2493_v52  ;;  %v3204_v37 = vpop.eup %3203  ;;  %2703 = vst.msk [vmem:[%s4476_s22 + $0x8] sm:$0xff] %vm326_vm0, %v2655_v5  ;;  %v2636_v57 = vmul.f32 %v2588_v55, %v4462_v9  ;;  %v2419_v28 = vmul.f32 0.03125, %v2161_v54  ;;  %v2193_v56 = vadd.f32 %v2192_v16, %v2017_v27 }
 0x2d3   : > { %v2335_v42 = vadd.f32 %v2334_v25, %v2333_v17  ;;  %v2583_v13 = vmul.f32 %v3204_v37, %v4219_v2  ;;  %v2472_v35 = vadd.f32 1e-05, %v2424_v58  ;;  %v2303_v60 = vadd.f32 %v2302_v59, %v2301_v39 }
 0x2d4   : > { %v2176_v15 = vrot.slane %v2175_v41, 2  ;;  %v2684_v45 = vadd.f32 %v2636_v57, %v4468_v7  ;;  %v2467_v53 = vadd.f32 1e-05, %v2419_v28  ;;  %v2194_v51 = vrot.slane %v2193_v56, 2 }
 0x2d5   : > { %v2448_v31 = vmul.f32 0.03125, %v2335_v42  ;;  %v2631_v23 = vmul.f32 %v2583_v13, %v4462_v9  ;;  %3213 = vrsqrt.f32 %v2472_v35  ;;  %v2304_v0 = vrot.slane %v2303_v60, 1 }
 0x2d6   : > { %v3206_v52 = vpop.eup %3205  ;;  %v2177_v5 = vadd.f32 %v2176_v15, %v2175_v41  ;;  %2732 = vst.msk [vmem:[%s4476_s22 + $0xf0] sm:$0xff] %vm326_vm0, %v2684_v45  ;;  %3215 = vrsqrt.f32 %v2467_v53  ;;  %v2195_v17 = vadd.f32 %v2194_v51, %v2193_v56  ;;  %v2026_v39 = vpop.xlane.xlu1 %2025  ;;  %v2318_v58 = vrot.slane %v2080_v50, 4  ;;  %v4804_v45 = vld [vmem:[#allocation21_spill] sm:$0xff] }
 0x2d7   : > { %v2562_v27 = vmul.f32 %v3206_v52, %v4226_v26  ;;  %v2496_v2 = vadd.f32 1e-05, %v2448_v31  ;;  %v2011_v16 = vpop.xlane.xlu0 %2010  ;;  %v3208_v49 = vpop.eup %3207  ;;  %v2679_v55 = vadd.f32 %v2631_v23, %v4468_v7  ;;  %v2305_v54 = vadd.f32 %v2304_v0, %v2303_v60 }
 0x2d8   : > { %v2178_v25 = vrot.slane %v2177_v5, 1  ;;  %v2565_v41 = vmul.f32 %v3208_v49, %v4229_v40  ;;  %v2196_v37 = vrot.slane %v2195_v17, 1  ;;  %v2319_v28 = vadd.f32 %v2318_v58, %v2080_v50 }
 0x2d9   : > { %v2610_v59 = vmul.f32 %v2562_v27, %v4462_v9  ;;  %3217 = vrsqrt.f32 %v2496_v2  ;;  %2727 = vst.msk [vmem:[%s4476_s22 + $0xc8] sm:$0xff] %vm326_vm0, %v2679_v55  ;;  %v2443_v26 = vmul.f32 0.03125, %v2305_v54  ;;  %v2336_v42 = vrot.slane %v2089_v44, 4 }
 0x2da   : > { %v2179_v57 = vadd.f32 %v2178_v25, %v2177_v5  ;;  %v3210_v56 = vpop.eup %3209  ;;  %v2613_v35 = vmul.f32 %v2565_v41, %v4462_v9  ;;  %v2197_v60 = vadd.f32 %v2196_v37, %v2195_v17  ;;  %v2210_v15 = vrot.slane %v2026_v39, 4 }
 0x2db   : > { %v2658_v13 = vadd.f32 %v2610_v59, %v4468_v7  ;;  %v2586_v53 = vmul.f32 %v3210_v56, %v4804_v45  ;;  %v2491_v40 = vadd.f32 1e-05, %v2443_v26  ;;  %v2320_v51 = vrot.slane %v2319_v28, 2  ;;  %v2098_v52 = vpop.xlane.xlu1 %2097  ;;  %v2083_v23 = vpop.xlane.xlu0 %2082 }
 0x2dc   : > { %v2422_v31 = vmul.f32 0.03125, %v2179_v57  ;;  %v2661_v50 = vadd.f32 %v2613_v35, %v4468_v7  ;;  %v2425_v0 = vmul.f32 0.03125, %v2197_v60  ;;  %v2337_v5 = vadd.f32 %v2336_v42, %v2089_v44 }
 0x2dd   : > { %2706 = vst.msk [vmem:[%s4476_s22 + $0x20] sm:$0xff] %vm326_vm0, %v2658_v13  ;;  %v2211_v27 = vadd.f32 %v2210_v15, %v2026_v39  ;;  %v2634_v2 = vmul.f32 %v2586_v53, %v4462_v9  ;;  %3219 = vrsqrt.f32 %v2491_v40  ;;  %v2321_v49 = vadd.f32 %v2320_v51, %v2319_v28 }
 0x2de   : > { %v2470_v17 = vadd.f32 1e-05, %v2422_v31  ;;  %2709 = vst.msk [vmem:[%s4476_s22 + $0x38] sm:$0xff] %vm326_vm0, %v2661_v50  ;;  %v2473_v54 = vadd.f32 1e-05, %v2425_v0  ;;  %v2338_v25 = vrot.slane %v2337_v5, 2 }
 0x2df   : > { %v3212_v55 = vpop.eup %3211  ;;  %v2212_v58 = vrot.slane %v2211_v27, 2  ;;  %v2180_v59 = vrot.slane %v2011_v16, 4  ;;  %v2682_v41 = vadd.f32 %v2634_v2, %v4468_v7  ;;  %v2322_v44 = vrot.slane %v2321_v49, 1 }
 0x2e0   : > { %v2589_v37 = vmul.f32 %v3212_v55, %v4243_v1  ;;  %3221 = vrsqrt.f32 %v2470_v17  ;;  %v2339_v39 = vadd.f32 %v2338_v25, %v2337_v5  ;;  %v2020_v42 = vpop.xlane.xlu1 %2019  ;;  %v2354_v13 = vrot.slane %v2098_v52, 4  ;;  %v2029_v60 = vpop.xlane.xlu0 %2028 }
 0x2e1   : > { %3223 = vrsqrt.f32 %v2473_v54  ;;  %v2213_v26 = vadd.f32 %v2212_v58, %v2211_v27  ;;  %v2181_v57 = vadd.f32 %v2180_v59, %v2011_v16  ;;  %2730 = vst.msk [vmem:[%s4476_s22 + $0xe0] sm:$0xff] %vm326_vm0, %v2682_v41  ;;  %v2323_v56 = vadd.f32 %v2322_v44, %v2321_v49 }
 0x2e2   : > { %v2637_v28 = vmul.f32 %v2589_v37, %v4462_v9  ;;  %v2324_v35 = vrot.slane %v2083_v23, 4  ;;  %v3214_v15 = vpop.eup %3213  ;;  %v2340_v45 = vrot.slane %v2339_v39, 1  ;;  %v2198_v40 = vrot.slane %v2020_v42, 4 }
 0x2e3   : > { %v2214_v53 = vrot.slane %v2213_v26, 1  ;;  %v2182_v1 = vrot.slane %v2181_v57, 2  ;;  %v3216_v31 = vpop.eup %3215  ;;  %v2568_v16 = vmul.f32 %v3214_v15, %v4252_v4  ;;  %v2446_v50 = vmul.f32 0.03125, %v2323_v56 }
 0x2e4   : > { %v2685_v51 = vadd.f32 %v2637_v28, %v4468_v7  ;;  %v2355_v0 = vadd.f32 %v2354_v13, %v2098_v52  ;;  %v2563_v5 = vmul.f32 %v3216_v31, %v4255_v62  ;;  %v2341_v27 = vadd.f32 %v2340_v45, %v2339_v39 }
 0x2e5   : > { %v2215_v2 = vadd.f32 %v2214_v53, %v2213_v26  ;;  %v2183_v17 = vadd.f32 %v2182_v1, %v2181_v57  ;;  %v2616_v55 = vmul.f32 %v2568_v16, %v4462_v9  ;;  %v2494_v54 = vadd.f32 1e-05, %v2446_v50  ;;  %v2092_v59 = vpop.xlane.xlu1 %2091  ;;  %v2101_v26 = vpop.xlane.xlu0 %2100 }
 0x2e6   : > { %v3218_v49 = vpop.eup %3217  ;;  %2733 = vst.msk [vmem:[%s4476_s22 + $0xf8] sm:$0xff] %vm326_vm0, %v2685_v51  ;;  %v2356_v25 = vrot.slane %v2355_v0, 2  ;;  %v2325_v58 = vadd.f32 %v2324_v35, %v2083_v23  ;;  %v2611_v41 = vmul.f32 %v2563_v5, %v4462_v9  ;;  %v2449_v52 = vmul.f32 0.03125, %v2341_v27 }
 0x2e7   : > { %v2592_v4 = vmul.f32 %v3218_v49, %v4264_v19  ;;  %v2428_v37 = vmul.f32 0.03125, %v2215_v2  ;;  %v2664_v62 = vadd.f32 %v2616_v55, %v4468_v7  ;;  %3225 = vrsqrt.f32 %v2494_v54  ;;  %v4805_v55 = vld [vmem:[#allocation22_spill] sm:$0xff] }
 0x2e8   : > { %v2184_v44 = vrot.slane %v2183_v17, 1  ;;  %v2357_v39 = vadd.f32 %v2356_v25, %v2355_v0  ;;  %v2659_v57 = vadd.f32 %v2611_v41, %v4468_v7  ;;  %v2497_v56 = vadd.f32 1e-05, %v2449_v52 }
 0x2e9   : > { %v2640_v28 = vmul.f32 %v2592_v4, %v4462_v9  ;;  %v2476_v23 = vadd.f32 1e-05, %v2428_v37  ;;  %2712 = vst.msk [vmem:[%s4476_s22 + $0x50] sm:$0xff] %vm326_vm0, %v2664_v62  ;;  %v2326_v35 = vrot.slane %v2325_v58, 2  ;;  %v2199_v15 = vadd.f32 %v2198_v40, %v2020_v42 }
 0x2ea   : > { %v2185_v13 = vadd.f32 %v2184_v44, %v2183_v17  ;;  %v2358_v19 = vrot.slane %v2357_v39, 1  ;;  %v3220_v45 = vpop.eup %3219  ;;  %2707 = vst.msk [vmem:[%s4476_s22 + $0x28] sm:$0xff] %vm326_vm0, %v2659_v57  ;;  %3227 = vrsqrt.f32 %v2497_v56  ;;  %v2216_v1 = vrot.slane %v2029_v60, 4  ;;  %v2038_v0 = vpop.xlane.xlu1 %2037 }
 0x2eb   : > { %v2688_v53 = vadd.f32 %v2640_v28, %v4468_v7  ;;  %v2342_v31 = vrot.slane %v2092_v59, 4  ;;  %v2587_v51 = vmul.f32 %v3220_v45, %v4268_v6  ;;  %3229 = vrsqrt.f32 %v2476_v23  ;;  %v2023_v6 = vpop.xlane.xlu0 %2022 }
 0x2ec   : > { %v2423_v16 = vmul.f32 0.03125, %v2185_v13  ;;  %v2359_v50 = vadd.f32 %v2358_v19, %v2357_v39  ;;  %v2327_v27 = vadd.f32 %v2326_v35, %v2325_v58  ;;  %v2200_v2 = vrot.slane %v2199_v15, 2 }
 0x2ed   : > { %v3222_v5 = vpop.eup %3221  ;;  %2736 = vst.msk [vmem:[%s4476_s22 + $0x110] sm:$0xff] %vm326_vm0, %v2688_v53  ;;  %v2217_v42 = vadd.f32 %v2216_v1, %v2029_v60  ;;  %v2343_v40 = vadd.f32 %v2342_v31, %v2092_v59  ;;  %v2635_v49 = vmul.f32 %v2587_v51, %v4462_v9  ;;  %v2360_v23 = vrot.slane %v2101_v26, 4 }
 0x2ee   : > { %v3224_v17 = vpop.eup %3223  ;;  %v2566_v54 = vmul.f32 %v3222_v5, %v4805_v55  ;;  %v2471_v25 = vadd.f32 1e-05, %v2423_v16  ;;  %v2452_v41 = vmul.f32 0.03125, %v2359_v50  ;;  %v2328_v52 = vrot.slane %v2327_v27, 1  ;;  %v2110_v13 = vpop.xlane.xlu1 %2109 }
 0x2ef   : > { %v2569_v4 = vmul.f32 %v3224_v17, %v4282_v32  ;;  %v2201_v37 = vadd.f32 %v2200_v2, %v2199_v15  ;;  %v2218_v62 = vrot.slane %v2217_v42, 2  ;;  %v2683_v44 = vadd.f32 %v2635_v49, %v4468_v7  ;;  %v2095_v16 = vpop.xlane.xlu0 %2094 }
 0x2f0   : > { %v2614_v58 = vmul.f32 %v2566_v54, %v4462_v9  ;;  %3231 = vrsqrt.f32 %v2471_v25  ;;  %v2500_v60 = vadd.f32 1e-05, %v2452_v41  ;;  %v2329_v39 = vadd.f32 %v2328_v52, %v2327_v27 }
 0x2f1   : > { %v2617_v59 = vmul.f32 %v2569_v4, %v4462_v9  ;;  %v2202_v57 = vrot.slane %v2201_v37, 1  ;;  %v2219_v28 = vadd.f32 %v2218_v62, %v2217_v42  ;;  %2731 = vst.msk [vmem:[%s4476_s22 + $0xe8] sm:$0xff] %vm326_vm0, %v2683_v44  ;;  %v2344_v32 = vrot.slane %v2343_v40, 2 }
 0x2f2   : > { %v2662_v56 = vadd.f32 %v2614_v58, %v4468_v7  ;;  %3233 = vrsqrt.f32 %v2500_v60  ;;  %v2447_v35 = vmul.f32 0.03125, %v2329_v39  ;;  %v2361_v1 = vadd.f32 %v2360_v23, %v2101_v26 }
 0x2f3   : > { %v2665_v19 = vadd.f32 %v2617_v59, %v4468_v7  ;;  %v2203_v15 = vadd.f32 %v2202_v57, %v2201_v37  ;;  %v2220_v45 = vrot.slane %v2219_v28, 1  ;;  %v2345_v53 = vadd.f32 %v2344_v32, %v2343_v40 }
 0x2f4   : > { %2710 = vst.msk [vmem:[%s4476_s22 + $0x40] sm:$0xff] %vm326_vm0, %v2662_v56  ;;  %v2234_v31 = vrot.slane %v2038_v0, 4  ;;  %v2204_v51 = vrot.slane %v2023_v6, 4  ;;  %v3226_v50 = vpop.eup %3225  ;;  %v2495_v5 = vadd.f32 1e-05, %v2447_v35  ;;  %v2378_v42 = vrot.slane %v2110_v13, 4  ;;  %v2032_v23 = vpop.xlane.xlu1 %2031 }
 0x2f5   : > { %2713 = vst.msk [vmem:[%s4476_s22 + $0x58] sm:$0xff] %vm326_vm0, %v2665_v19  ;;  %v2426_v27 = vmul.f32 0.03125, %v2203_v15  ;;  %v2221_v2 = vadd.f32 %v2220_v45, %v2219_v28  ;;  %v2590_v17 = vmul.f32 %v3226_v50, %v4291_v21  ;;  %v2346_v49 = vrot.slane %v2345_v53, 1 }
 0x2f6   : > { %v2362_v55 = vrot.slane %v2361_v1, 2  ;;  %v2235_v54 = vadd.f32 %v2234_v31, %v2038_v0  ;;  %3235 = vrsqrt.f32 %v2495_v5  ;;  %v2205_v40 = vadd.f32 %v2204_v51, %v2023_v6  ;;  %v2041_v6 = vpop.xlane.xlu0 %2040 }
 0x2f7   : > { %v2474_v25 = vadd.f32 1e-05, %v2426_v27  ;;  %v2429_v41 = vmul.f32 0.03125, %v2221_v2  ;;  %v3228_v26 = vpop.eup %3227  ;;  %v2638_v4 = vmul.f32 %v2590_v17, %v4462_v9  ;;  %v2347_v52 = vadd.f32 %v2346_v49, %v2345_v53 }
 0x2f8   : > { %v2363_v37 = vadd.f32 %v2362_v55, %v2361_v1  ;;  %v2236_v62 = vrot.slane %v2235_v54, 2  ;;  %v3230_v44 = vpop.eup %3229  ;;  %v2593_v58 = vmul.f32 %v3228_v26, %v4294_v18  ;;  %v2206_v21 = vrot.slane %v2205_v40, 2 }
 0x2f9   : > { %3237 = vrsqrt.f32 %v2474_v25  ;;  %v2477_v60 = vadd.f32 1e-05, %v2429_v41  ;;  %v2686_v59 = vadd.f32 %v2638_v4, %v4468_v7  ;;  %v2572_v0 = vmul.f32 %v3230_v44, %v4303_v46 }
 0x2fa   : > { %v2450_v39 = vmul.f32 0.03125, %v2347_v52  ;;  %v2364_v57 = vrot.slane %v2363_v37, 1  ;;  %v2641_v28 = vmul.f32 %v2593_v58, %v4462_v9  ;;  %v2237_v56 = vadd.f32 %v2236_v62, %v2235_v54  ;;  %v2113_v41 = vpop.xlane.xlu0 %2112  ;;  %v2104_v52 = vpop.xlane.xlu1 %2103 }
 0x2fb   : > { %3239 = vrsqrt.f32 %v2477_v60  ;;  %v2207_v32 = vadd.f32 %v2206_v21, %v2205_v40  ;;  %2734 = vst.msk [vmem:[%s4476_s22 + $0x100] sm:$0xff] %vm326_vm0, %v2686_v59  ;;  %v2620_v18 = vmul.f32 %v2572_v0, %v4462_v9  ;;  %v2379_v15 = vadd.f32 %v2378_v42, %v2110_v13 }
 0x2fc   : > { %v2498_v19 = vadd.f32 1e-05, %v2450_v39  ;;  %v2365_v35 = vadd.f32 %v2364_v57, %v2363_v37  ;;  %v2689_v46 = vadd.f32 %v2641_v28, %v4468_v7  ;;  %v2238_v53 = vrot.slane %v2237_v56, 1 }
 0x2fd   : > { %v3232_v45 = vpop.eup %3231  ;;  %v2208_v1 = vrot.slane %v2207_v32, 1  ;;  %v2348_v31 = vrot.slane %v2095_v16, 4  ;;  %v2668_v51 = vadd.f32 %v2620_v18, %v4468_v7  ;;  %v2380_v49 = vrot.slane %v2379_v15, 2 }
 0x2fe   : > { %v2567_v50 = vmul.f32 %v3232_v45, %v4307_v30  ;;  %3241 = vrsqrt.f32 %v2498_v19  ;;  %v2453_v5 = vmul.f32 0.03125, %v2365_v35  ;;  %2737 = vst.msk [vmem:[%s4476_s22 + $0x118] sm:$0xff] %vm326_vm0, %v2689_v46  ;;  %v2239_v2 = vadd.f32 %v2238_v53, %v2237_v56 }
 0x2ff   : > { %v3234_v27 = vpop.eup %3233  ;;  %v2209_v17 = vadd.f32 %v2208_v1, %v2207_v32  ;;  %v2349_v13 = vadd.f32 %v2348_v31, %v2095_v16  ;;  %2716 = vst.msk [vmem:[%s4476_s22 + $0x70] sm:$0xff] %vm326_vm0, %v2668_v51  ;;  %v2222_v25 = vrot.slane %v2032_v23, 4  ;;  %v2381_v26 = vadd.f32 %v2380_v49, %v2379_v15  ;;  %v2035_v15 = vpop.xlane.xlu0 %2034 }
 0x300   : > { %v2615_v42 = vmul.f32 %v2567_v50, %v4462_v9  ;;  %v2596_v55 = vmul.f32 %v3234_v27, %v4316_v43  ;;  %v2501_v54 = vadd.f32 1e-05, %v2453_v5  ;;  %v2432_v30 = vmul.f32 0.03125, %v2239_v2 }
 0x301   : > { %v2427_v40 = vmul.f32 0.03125, %v2209_v17  ;;  %v2350_v4 = vrot.slane %v2349_v13, 2  ;;  %v2223_v16 = vadd.f32 %v2222_v25, %v2032_v23  ;;  %v2382_v60 = vrot.slane %v2381_v26, 1 }
 0x302   : > { %v2663_v37 = vadd.f32 %v2615_v42, %v4468_v7  ;;  %v2644_v62 = vmul.f32 %v2596_v55, %v4462_v9  ;;  %3243 = vrsqrt.f32 %v2501_v54  ;;  %v2480_v44 = vadd.f32 1e-05, %v2432_v30  ;;  %v2050_v55 = vpop.xlane.xlu1 %2049 }
 0x303   : > { %v2475_v58 = vadd.f32 1e-05, %v2427_v40  ;;  %v2351_v43 = vadd.f32 %v2350_v4, %v2349_v13  ;;  %v3236_v21 = vpop.eup %3235  ;;  %v2224_v0 = vrot.slane %v2223_v16, 2  ;;  %v2240_v39 = vrot.slane %v2041_v6, 4 }
 0x304   : > { %2711 = vst.msk [vmem:[%s4476_s22 + $0x48] sm:$0xff] %vm326_vm0, %v2663_v37  ;;  %v2692_v59 = vadd.f32 %v2644_v62, %v4468_v7  ;;  %v2366_v57 = vrot.slane %v2104_v52, 4  ;;  %v2591_v28 = vmul.f32 %v3236_v21, %v4319_v20  ;;  %3245 = vrsqrt.f32 %v2480_v44  ;;  %v2107_v37 = vpop.xlane.xlu0 %2106 }
 0x305   : > { %v2383_v56 = vadd.f32 %v2382_v60, %v2381_v26  ;;  %v2352_v32 = vrot.slane %v2351_v43, 1  ;;  %3247 = vrsqrt.f32 %v2475_v58  ;;  %v2225_v23 = vadd.f32 %v2224_v0, %v2223_v16 }
 0x306   : > { %v3238_v18 = vpop.eup %3237  ;;  %2740 = vst.msk [vmem:[%s4476_s22 + $0x130] sm:$0xff] %vm326_vm0, %v2692_v59  ;;  %v2241_v19 = vadd.f32 %v2240_v39, %v2041_v6  ;;  %v2367_v35 = vadd.f32 %v2366_v57, %v2104_v52  ;;  %v2639_v45 = vmul.f32 %v2591_v28, %v4462_v9  ;;  %v2384_v5 = vrot.slane %v2113_v41, 4  ;;  %v2044_v57 = vpop.xlane.xlu1 %2043 }
 0x307   : > { %v2570_v46 = vmul.f32 %v3238_v18, %v4328_v34  ;;  %v2456_v53 = vmul.f32 0.03125, %v2383_v56  ;;  %v2353_v1 = vadd.f32 %v2352_v32, %v2351_v43  ;;  %v2226_v20 = vrot.slane %v2225_v23, 1 }
 0x308   : > { %v3240_v31 = vpop.eup %3239  ;;  %v2242_v51 = vrot.slane %v2241_v19, 2  ;;  %v2368_v50 = vrot.slane %v2367_v35, 2  ;;  %v2687_v27 = vadd.f32 %v2639_v45, %v4468_v7  ;;  %v2385_v40 = vadd.f32 %v2384_v5, %v2113_v41 }
 0x309   : > { %v2618_v2 = vmul.f32 %v2570_v46, %v4462_v9  ;;  %v2573_v6 = vmul.f32 %v3240_v31, %v4331_v29  ;;  %v2504_v17 = vadd.f32 1e-05, %v2456_v53  ;;  %v2451_v49 = vmul.f32 0.03125, %v2353_v1 }
 0x30a   : > { %v2227_v13 = vadd.f32 %v2226_v20, %v2225_v23  ;;  %v2243_v42 = vadd.f32 %v2242_v51, %v2241_v19  ;;  %v2369_v34 = vadd.f32 %v2368_v50, %v2367_v35  ;;  %2735 = vst.msk [vmem:[%s4476_s22 + $0x108] sm:$0xff] %vm326_vm0, %v2687_v27  ;;  %v2386_v44 = vrot.slane %v2385_v40, 2  ;;  %v2053_v20 = vpop.xlane.xlu0 %2052 }
 0x30b   : > { %v3242_v54 = vpop.eup %3241  ;;  %v2666_v25 = vadd.f32 %v2618_v2, %v4468_v7  ;;  %v2621_v30 = vmul.f32 %v2573_v6, %v4462_v9  ;;  %3249 = vrsqrt.f32 %v2504_v17  ;;  %v2499_v29 = vadd.f32 1e-05, %v2451_v49 }
 0x30c   : > { %v2594_v26 = vmul.f32 %v3242_v54, %v4340_v33  ;;  %v2430_v4 = vmul.f32 0.03125, %v2227_v13  ;;  %v2244_v52 = vrot.slane %v2243_v42, 1  ;;  %v2370_v16 = vrot.slane %v2369_v34, 1 }
 0x30d   : > { %2714 = vst.msk [vmem:[%s4476_s22 + $0x60] sm:$0xff] %vm326_vm0, %v2666_v25  ;;  %v2669_v62 = vadd.f32 %v2621_v30, %v4468_v7  ;;  %v2258_v58 = vrot.slane %v2050_v55, 4  ;;  %3251 = vrsqrt.f32 %v2499_v29  ;;  %v2387_v59 = vadd.f32 %v2386_v44, %v2385_v40  ;;  %v2116_v40 = vpop.xlane.xlu1 %2115 }
 0x30e   : > { %v2642_v60 = vmul.f32 %v2594_v26, %v4462_v9  ;;  %v2478_v43 = vadd.f32 1e-05, %v2430_v4  ;;  %v2245_v21 = vadd.f32 %v2244_v52, %v2243_v42  ;;  %v2371_v33 = vadd.f32 %v2370_v16, %v2369_v34  ;;  %v2047_v16 = vpop.xlane.xlu0 %2046 }
 0x30f   : > { %v3244_v41 = vpop.eup %3243  ;;  %2717 = vst.msk [vmem:[%s4476_s22 + $0x78] sm:$0xff] %vm326_vm0, %v2669_v62  ;;  %v2259_v0 = vadd.f32 %v2258_v58, %v2050_v55  ;;  %v2228_v39 = vrot.slane %v2035_v15, 4  ;;  %v2388_v23 = vrot.slane %v2387_v59, 1  ;;  %v2372_v1 = vrot.slane %v2107_v37, 4 }
 0x310   : > { %v2690_v28 = vadd.f32 %v2642_v60, %v4468_v7  ;;  %v2597_v56 = vmul.f32 %v3244_v41, %v4343_v24  ;;  %3253 = vrsqrt.f32 %v2478_v43  ;;  %v2433_v32 = vmul.f32 0.03125, %v2245_v21 }
 0x311   : > { %v2454_v18 = vmul.f32 0.03125, %v2371_v33  ;;  %v2260_v19 = vrot.slane %v2259_v0, 2  ;;  %v2229_v35 = vadd.f32 %v2228_v39, %v2035_v15  ;;  %v3246_v45 = vpop.eup %3245  ;;  %v2246_v31 = vrot.slane %v2044_v57, 4 }
 0x312   : > { %2738 = vst.msk [vmem:[%s4476_s22 + $0x120] sm:$0xff] %vm326_vm0, %v2690_v28  ;;  %v2645_v46 = vmul.f32 %v2597_v56, %v4462_v9  ;;  %v2481_v53 = vadd.f32 1e-05, %v2433_v32  ;;  %v3248_v51 = vpop.eup %3247  ;;  %v2576_v50 = vmul.f32 %v3246_v45, %v4352_v8  ;;  %v2389_v5 = vadd.f32 %v2388_v23, %v2387_v59  ;;  %v4643_v45 = vld [vmem:[%s4733_s4] sm:$0xff] }
 0x313   : > { %v2502_v24 = vadd.f32 1e-05, %v2454_v18  ;;  %v2261_v27 = vadd.f32 %v2260_v19, %v2259_v0  ;;  %v2571_v15 = vmul.f32 %v3248_v51, %v4355_v22  ;;  %v2230_v6 = vrot.slane %v2229_v35, 2  ;;  %v2122_v51 = vpop.xlane.xlu1 %2121 }
 0x314   : > { %v2693_v2 = vadd.f32 %v2645_v46, %v4468_v7  ;;  %3255 = vrsqrt.f32 %v2481_v53  ;;  %v2624_v17 = vmul.f32 %v2576_v50, %v4462_v9  ;;  %v2457_v49 = vmul.f32 0.03125, %v2389_v5  ;;  %v2119_v50 = vpop.xlane.xlu0 %2118 }
 0x315   : > { %3257 = vrsqrt.f32 %v2502_v24  ;;  %v2262_v13 = vrot.slane %v2261_v27, 1  ;;  %v2619_v42 = vmul.f32 %v2571_v15, %v4462_v9  ;;  %v2231_v8 = vadd.f32 %v2230_v6, %v2229_v35  ;;  %v4652_v24 = vld [vmem:[%s4734_s5] sm:$0xff] }
 0x316   : > { %2741 = vst.msk [vmem:[%s4476_s22 + $0x138] sm:$0xff] %vm326_vm0, %v2693_v2  ;;  %v2373_v34 = vadd.f32 %v2372_v1, %v2107_v37  ;;  %v2247_v55 = vadd.f32 %v2246_v31, %v2044_v57  ;;  %v2672_v54 = vadd.f32 %v2624_v17, %v4468_v7  ;;  %v2505_v25 = vadd.f32 1e-05, %v2457_v49 }
 0x317   : > { %v2263_v22 = vadd.f32 %v2262_v13, %v2261_v27  ;;  %v2264_v30 = vrot.slane %v2053_v20, 4  ;;  %v2667_v29 = vadd.f32 %v2619_v42, %v4468_v7  ;;  %v2232_v4 = vrot.slane %v2231_v8, 1 }
 0x318   : > { %v3250_v26 = vpop.eup %3249  ;;  %v2374_v52 = vrot.slane %v2373_v34, 2  ;;  %v2248_v62 = vrot.slane %v2247_v55, 2  ;;  %2720 = vst.msk [vmem:[%s4476_s22 + $0x90] sm:$0xff] %vm326_vm0, %v2672_v54  ;;  %3259 = vrsqrt.f32 %v2505_v25  ;;  %v2390_v41 = vrot.slane %v2116_v40, 4 }
 0x319   : > { %v2600_v44 = vmul.f32 %v3250_v26, %v4364_v38  ;;  %v2436_v37 = vmul.f32 0.03125, %v2263_v22  ;;  %v2265_v58 = vadd.f32 %v2264_v30, %v2053_v20  ;;  %2715 = vst.msk [vmem:[%s4476_s22 + $0x68] sm:$0xff] %vm326_vm0, %v2667_v29  ;;  %v2233_v60 = vadd.f32 %v2232_v4, %v2231_v8 }
 0x31a   : > { %v2375_v43 = vadd.f32 %v2374_v52, %v2373_v34  ;;  %v2249_v21 = vadd.f32 %v2248_v62, %v2247_v55  ;;  %v3252_v33 = vpop.eup %3251  ;;  %v2252_v57 = vrot.slane %v2047_v16, 4  ;;  %v2391_v35 = vadd.f32 %v2390_v41, %v2116_v40  ;;  %v2125_v62 = vpop.xlane.xlu0 %2124 }
 0x31b   : > { %v2648_v59 = vmul.f32 %v2600_v44, %v4462_v9  ;;  %v2484_v0 = vadd.f32 1e-05, %v2436_v37  ;;  %v2266_v39 = vrot.slane %v2265_v58, 2  ;;  %v2595_v28 = vmul.f32 %v3252_v33, %v4367_v36 }
 0x31c   : > { %v2431_v56 = vmul.f32 0.03125, %v2233_v60  ;;  %v2376_v38 = vrot.slane %v2375_v43, 1  ;;  %v2250_v32 = vrot.slane %v2249_v21, 1  ;;  %v2253_v20 = vadd.f32 %v2252_v57, %v2047_v16 }
 0x31d   : > { %v3254_v18 = vpop.eup %3253  ;;  %v2696_v23 = vadd.f32 %v2648_v59, %v4468_v7  ;;  %3261 = vrsqrt.f32 %v2484_v0  ;;  %v2267_v19 = vadd.f32 %v2266_v39, %v2265_v58  ;;  %v2643_v9 = vmul.f32 %v4643_v45, %v2595_v28 }
 0x31e   : > { %v2574_v46 = vmul.f32 %v3254_v18, %v4376_v47  ;;  %v2479_v53 = vadd.f32 1e-05, %v2431_v56  ;;  %v2377_v36 = vadd.f32 %v2376_v38, %v2375_v43  ;;  %v2251_v1 = vadd.f32 %v2250_v32, %v2249_v21 }
 0x31f   : > { %2744 = vst.msk [vmem:[%s4476_s22 + $0x150] sm:$0xff] %vm326_vm0, %v2696_v23  ;;  %v2268_v31 = vrot.slane %v2267_v19, 1  ;;  %v2392_v7 = vrot.slane %v2391_v35, 2  ;;  %v2691_v5 = vadd.f32 %v4652_v24, %v2643_v9  ;;  %v2254_v49 = vrot.slane %v2253_v20, 2 }
 0x320   : > { %v2622_v47 = vmul.f32 %v4643_v45, %v2574_v46  ;;  %3263 = vrsqrt.f32 %v2479_v53  ;;  %v2455_v27 = vmul.f32 0.03125, %v2377_v36  ;;  %v2434_v15 = vmul.f32 0.03125, %v2251_v1 }
 0x321   : > { %v3256_v2 = vpop.eup %3255  ;;  %v2269_v6 = vadd.f32 %v2268_v31, %v2267_v19  ;;  %v2393_v17 = vadd.f32 %v2392_v7, %v2391_v35  ;;  %2739 = vst.msk [vmem:[%s4476_s22 + $0x128] sm:$0xff] %vm326_vm0, %v2691_v5  ;;  %v2402_v55 = vrot.slane %v2122_v51, 4  ;;  %v2255_v26 = vadd.f32 %v2254_v49, %v2253_v20 }
 0x322   : > { %v3258_v13 = vpop.eup %3257  ;;  %v2670_v42 = vadd.f32 %v4652_v24, %v2622_v47  ;;  %v2577_v8 = vmul.f32 %v3256_v2, %v4379_v63  ;;  %v2503_v34 = vadd.f32 1e-05, %v2455_v27  ;;  %v2482_v25 = vadd.f32 1e-05, %v2434_v15 }
 0x323   : > { %v2598_v54 = vmul.f32 %v3258_v13, %v4382_v10  ;;  %v2437_v22 = vmul.f32 0.03125, %v2269_v6  ;;  %v2394_v30 = vrot.slane %v2393_v17, 1  ;;  %v2403_v29 = vadd.f32 %v2402_v55, %v2122_v51 }
 0x324   : > { %2718 = vst.msk [vmem:[%s4476_s22 + $0x80] sm:$0xff] %vm326_vm0, %v2670_v42  ;;  %v2625_v40 = vmul.f32 %v4643_v45, %v2577_v8  ;;  %3265 = vrsqrt.f32 %v2503_v34  ;;  %v2256_v44 = vrot.slane %v2255_v26, 1  ;;  %v2396_v58 = vrot.slane %v2119_v50, 4 }
 0x325   : > { %v2646_v4 = vmul.f32 %v4643_v45, %v2598_v54  ;;  %3267 = vrsqrt.f32 %v2482_v25  ;;  %v2485_v52 = vadd.f32 1e-05, %v2437_v22  ;;  %v2395_v63 = vadd.f32 %v2394_v30, %v2393_v17  ;;  %v3260_v16 = vpop.eup %3259 }
 0x326   : > { %v2673_v10 = vadd.f32 %v4652_v24, %v2625_v40  ;;  %v2404_v37 = vrot.slane %v2403_v29, 2  ;;  %v2601_v43 = vmul.f32 %v3260_v16, %v4393_v3  ;;  %v2257_v41 = vadd.f32 %v2256_v44, %v2255_v26  ;;  %v4806_v26 = vld [vmem:[#allocation4_spill] sm:$0xff] }
 0x327   : > { %v2694_v60 = vadd.f32 %v4652_v24, %v2646_v4  ;;  %3269 = vrsqrt.f32 %v2485_v52  ;;  %v2458_v21 = vmul.f32 0.03125, %v2395_v63  ;;  %v2397_v59 = vadd.f32 %v2396_v58, %v2119_v50  ;;  %v4807_v52 = vld [vmem:[#allocation3_spill] sm:$0xff] }
 0x328   : > { %2721 = vst.msk [vmem:[%s4476_s22 + $0x98] sm:$0xff] %vm326_vm0, %v2673_v10  ;;  %v2405_v33 = vadd.f32 %v2404_v37, %v2403_v29  ;;  %v2408_v0 = vrot.slane %v2125_v62, 4  ;;  %v2649_v39 = vmul.f32 %v4643_v45, %v2601_v43  ;;  %v2435_v56 = vmul.f32 0.03125, %v2257_v41  ;;  %v4808_v37 = vld [vmem:[#allocation7_spill] sm:$0xff]  ;;  %v4809_v41 = vld [vmem:[#allocation5_spill] sm:$0xff] }
 0x329   : > { %2742 = vst.msk [vmem:[%s4476_s22 + $0x140] sm:$0xff] %vm326_vm0, %v2694_v60  ;;  %v2506_v57 = vadd.f32 1e-05, %v2458_v21  ;;  %v2398_v32 = vrot.slane %v2397_v59, 2 }
 0x32a   : > { %v3262_v28 = vpop.eup %3261  ;;  %v2406_v38 = vrot.slane %v2405_v33, 1  ;;  %v2409_v18 = vadd.f32 %v2408_v0, %v2125_v62  ;;  %v2697_v3 = vadd.f32 %v4652_v24, %v2649_v39  ;;  %v2483_v19 = vadd.f32 1e-05, %v2435_v56  ;;  %v4810_v39 = vld [vmem:[#allocation6_spill] sm:$0xff] }
 0x32b   : > { %v2580_v23 = vmul.f32 %v3262_v28, %v4397_v48  ;;  %3271 = vrsqrt.f32 %v2506_v57  ;;  %v2399_v9 = vadd.f32 %v2398_v32, %v2397_v59 }
 0x32c   : > { %v2407_v35 = vadd.f32 %v2406_v38, %v2405_v33  ;;  %v2410_v46 = vrot.slane %v2409_v18, 2  ;;  %2745 = vst.msk [vmem:[%s4476_s22 + $0x158] sm:$0xff] %vm326_vm0, %v2697_v3  ;;  %3273 = vrsqrt.f32 %v2483_v19 }
 0x32d   : > { %v3264_v53 = vpop.eup %3263  ;;  %v2628_v36 = vmul.f32 %v4643_v45, %v2580_v23  ;;  %v2400_v7 = vrot.slane %v2399_v9, 1 }
 0x32e   : > { %v2575_v1 = vmul.f32 %v3264_v53, %v4400_v14  ;;  %v2460_v31 = vmul.f32 0.03125, %v2407_v35  ;;  %v2411_v48 = vadd.f32 %v2410_v46, %v2409_v18 }
 0x32f   : > { %v2676_v20 = vadd.f32 %v4652_v24, %v2628_v36  ;;  %v2401_v5 = vadd.f32 %v2400_v7, %v2399_v9 }
 0x330   : > { %v2623_v51 = vmul.f32 %v4643_v45, %v2575_v1  ;;  %v2508_v50 = vadd.f32 1e-05, %v2460_v31  ;;  %v2412_v27 = vrot.slane %v2411_v48, 1 }
 0x331   : > { %v3266_v47 = vpop.eup %3265  ;;  %2724 = vst.msk [vmem:[%s4476_s22 + $0xb0] sm:$0xff] %vm326_vm0, %v2676_v20  ;;  %v2459_v6 = vmul.f32 0.03125, %v2401_v5 }
 0x332   : > { %v3268_v2 = vpop.eup %3267  ;;  %v2671_v15 = vadd.f32 %v4652_v24, %v2623_v51  ;;  %v2599_v14 = vmul.f32 %v3266_v47, %v4407_v61  ;;  %3275 = vrsqrt.f32 %v2508_v50  ;;  %v2413_v49 = vadd.f32 %v2412_v27, %v2411_v48 }
 0x333   : > { %v2578_v17 = vmul.f32 %v3268_v2, %v4414_v11  ;;  %v2507_v8 = vadd.f32 1e-05, %v2459_v6 }
 0x334   : > { %v3270_v13 = vpop.eup %3269  ;;  %2719 = vst.msk [vmem:[%s4476_s22 + $0x88] sm:$0xff] %vm326_vm0, %v2671_v15  ;;  %v2647_v42 = vmul.f32 %v4643_v45, %v2599_v14  ;;  %v2461_v54 = vmul.f32 0.03125, %v2413_v49 }
 0x335   : > { %v2626_v34 = vmul.f32 %v4643_v45, %v2578_v17  ;;  %v2581_v55 = vmul.f32 %v3270_v13, %v4425_v12  ;;  %3277 = vrsqrt.f32 %v2507_v8 }
 0x336   : > { %v2695_v61 = vadd.f32 %v4652_v24, %v2647_v42  ;;  %v2509_v22 = vadd.f32 1e-05, %v2461_v54 }
 0x337   : > { %v2674_v25 = vadd.f32 %v4652_v24, %v2626_v34  ;;  %v2629_v11 = vmul.f32 %v4643_v45, %v2581_v55 }
 0x338   : > { %v3272_v30 = vpop.eup %3271  ;;  %2743 = vst.msk [vmem:[%s4476_s22 + $0x148] sm:$0xff] %vm326_vm0, %v2695_v61  ;;  %3279 = vrsqrt.f32 %v2509_v22 }
 0x339   : > { %2722 = vst.msk [vmem:[%s4476_s22 + $0xa0] sm:$0xff] %vm326_vm0, %v2674_v25  ;;  %v2677_v40 = vadd.f32 %v4652_v24, %v2629_v11  ;;  %v2602_v12 = vmul.f32 %v3272_v30, %v4806_v26  ;;  %v3274_v29 = vpop.eup %3273 }
 0x33a   : > { %v2579_v63 = vmul.f32 %v3274_v29, %v4807_v52 }
 0x33b   : > { %2725 = vst.msk [vmem:[%s4476_s22 + $0xb8] sm:$0xff] %vm326_vm0, %v2677_v40  ;;  %v2650_v4 = vmul.f32 %v4643_v45, %v2602_v12 }
 0x33c   : > { %v2627_v16 = vmul.f32 %v4643_v45, %v2579_v63 }
 0x33d   : > { %v2698_v62 = vadd.f32 %v4652_v24, %v2650_v4 }
 0x33e   : > { %v2675_v44 = vadd.f32 %v4652_v24, %v2627_v16 }
 0x33f   : > { %v3276_v10 = vpop.eup %3275  ;;  %2746 = vst.msk [vmem:[%s4476_s22 + $0x160] sm:$0xff] %vm326_vm0, %v2698_v62 }
 0x340   : > { %v2604_v58 = vmul.f32 %v3276_v10, %v4808_v37  ;;  %2723 = vst.msk [vmem:[%s4476_s22 + $0xa8] sm:$0xff] %vm326_vm0, %v2675_v44 }
 0x342   : > { %v2652_v60 = vmul.f32 %v4643_v45, %v2604_v58  ;;  %v3278_v43 = vpop.eup %3277 }
 0x343   : > { %v2603_v33 = vmul.f32 %v3278_v43, %v4809_v41 }
 0x344   : > { %v2700_v21 = vadd.f32 %v4652_v24, %v2652_v60 }
 0x345   : > { %v3280_v59 = vpop.eup %3279  ;;  %v2651_v0 = vmul.f32 %v4643_v45, %v2603_v33 }
 0x346   : > { %2748 = vst.msk [vmem:[%s4476_s22 + $0x170] sm:$0xff] %vm326_vm0, %v2700_v21  ;;  %v2605_v57 = vmul.f32 %v3280_v59, %v4810_v39 }
 0x347   : > { %v2699_v28 = vadd.f32 %v4652_v24, %v2651_v0 }
 0x348   : > { %v2653_v56 = vmul.f32 %v4643_v45, %v2605_v57 }
 0x349   : > { %2747 = vst.msk [vmem:[%s4476_s22 + $0x168] sm:$0xff] %vm326_vm0, %v2699_v28 }
 0x34a   : > { %v2701_v38 = vadd.f32 %v4652_v24, %v2653_v56 }
 0x34c   : > { %2749 = vst.msk [vmem:[%s4476_s22 + $0x178] sm:$0xff] %vm326_vm0, %v2701_v38 }
 0x34d PF: > { %s16_s21 = sadd.s32 1, %s3336_s21  }
 0x34e   : > { %p13_p5 = scmp.ge.s32.totalorder %s16_s21, 4  }
 0x350   :  { %15 = sbr.rel (!%p13_p5) target bundleno = 1 (0x1), region = 77 }

</bundles_post_ra>
